<compile_context>
chip_gen: v6e
topology: v6e:2x2x1
jax: 0.10.0
libtpu: 0.0.40
codegen_flags: <defaults>
</compile_context>

<pallas_src>
import functools

import jax
import jax.numpy as jnp
from jax.experimental import pallas as pl
from jax.experimental.pallas import tpu as pltpu

VMEM = pltpu.MemorySpace.VMEM
_BN_EPS = 1e-5


# --------------------------------------------------------------------------
# Pallas kernels
# --------------------------------------------------------------------------
def _bn_relu(v, g, b):
    # BatchNorm1d training-mode batch statistics (biased variance) + ReLU,
    # used inside kernel bodies.
    m = jnp.mean(v, axis=0, keepdims=True)
    var = jnp.mean((v - m) ** 2, axis=0, keepdims=True)
    return jnp.maximum((v - m) * jax.lax.rsqrt(var + _BN_EPS) * g + b, 0.0)


def _linear_kernel(x_ref, w_ref, b_ref, o_ref):
    o_ref[...] = (
        jnp.dot(x_ref[...], w_ref[...], preferred_element_type=jnp.float32)
        + b_ref[...]
    )


def linear(x, w, b, tile_rows=512):
    """y = x @ w + b (torch.nn.Linear).

    Whole-array VMEM specs at small N; row-tiled grid (parallel axis) when the
    node count grows, to stay within v5e/v7x scoped-VMEM limits.
    """
    N, Cin = x.shape
    Cout = w.shape[1]
    b2 = b.reshape(1, Cout)
    if N > tile_rows and N % tile_rows == 0:
        return pl.pallas_call(
            _linear_kernel,
            out_shape=jax.ShapeDtypeStruct((N, Cout), jnp.float32),
            grid=(N // tile_rows,),
            in_specs=[
                pl.BlockSpec((tile_rows, Cin), lambda i: (i, 0)),
                pl.BlockSpec((Cin, Cout), lambda i: (0, 0)),
                pl.BlockSpec((1, Cout), lambda i: (0, 0)),
            ],
            out_specs=pl.BlockSpec((tile_rows, Cout), lambda i: (i, 0)),
            compiler_params=pltpu.CompilerParams(
                dimension_semantics=("parallel",)),
        )(x, w, b2)
    return pl.pallas_call(
        _linear_kernel,
        out_shape=jax.ShapeDtypeStruct((N, Cout), jnp.float32),
        in_specs=[pl.BlockSpec(memory_space=VMEM)] * 3,
        out_specs=pl.BlockSpec(memory_space=VMEM),
    )(x, w, b2)


def _outproj_bn_relu_kernel(a_ref, w_ref, b_ref, g_ref, be_ref, o_ref):
    # out-projection matmul + bias, then BatchNorm(train stats) + ReLU fused.
    y = jnp.dot(a_ref[...], w_ref[...], preferred_element_type=jnp.float32) + b_ref[...]
    o_ref[...] = _bn_relu(y, g_ref[...], be_ref[...])


def _outproj_skip_bn_relu_kernel(a_ref, x_ref, w_ref, b_ref, gate_ref,
                                 g_ref, be_ref, o_ref):
    # out-projection + gated skip connection + BatchNorm + ReLU fused.
    y = jnp.dot(a_ref[...], w_ref[...], preferred_element_type=jnp.float32) + b_ref[...]
    gate = gate_ref[...]
    y = gate * y + (1.0 - gate) * x_ref[...]
    o_ref[...] = _bn_relu(y, g_ref[...], be_ref[...])


def out_proj_bn_relu(agg, w, b, gamma, beta):
    N = agg.shape[0]
    C = w.shape[1]
    return pl.pallas_call(
        _outproj_bn_relu_kernel,
        out_shape=jax.ShapeDtypeStruct((N, C), jnp.float32),
        in_specs=[pl.BlockSpec(memory_space=VMEM)] * 5,
        out_specs=pl.BlockSpec(memory_space=VMEM),
    )(agg, w, b.reshape(1, C), gamma.reshape(1, C), beta.reshape(1, C))


def out_proj_skip_bn_relu(agg, x_skip, w, b, gate, gamma, beta):
    N = agg.shape[0]
    C = w.shape[1]
    gate_row = jnp.broadcast_to(jnp.asarray(gate, jnp.float32), (1, C))
    return pl.pallas_call(
        _outproj_skip_bn_relu_kernel,
        out_shape=jax.ShapeDtypeStruct((N, C), jnp.float32),
        in_specs=[pl.BlockSpec(memory_space=VMEM)] * 7,
        out_specs=pl.BlockSpec(memory_space=VMEM),
    )(agg, x_skip, w, b.reshape(1, C), gate_row,
      gamma.reshape(1, C), beta.reshape(1, C))


def _mlp_head_kernel(x_ref, pool_ref,
                     g2_ref, b2_ref,
                     w1_ref, c1_ref, g3_ref, b3_ref,
                     w2_ref, c2_ref, g4_ref, b4_ref,
                     w3_ref, c3_ref, g5_ref, b5_ref,
                     w4_ref, c4_ref, g6_ref, b6_ref,
                     w5_ref, c5_ref, o_ref):
    """Whole MLP head in one kernel, activations never leave VMEM:
       AvgPool1d(2) (as matmul) -> bn_2/relu -> fc1..fc4 each + bn/relu -> fc5."""
    def lin(v, w, c):
        return jnp.dot(v, w[...], preferred_element_type=jnp.float32) + c[...]

    x = jnp.dot(x_ref[...], pool_ref[...], preferred_element_type=jnp.float32)
    x = _bn_relu(x, g2_ref[...], b2_ref[...])
    x = _bn_relu(lin(x, w1_ref, c1_ref), g3_ref[...], b3_ref[...])
    x = _bn_relu(lin(x, w2_ref, c2_ref), g4_ref[...], b4_ref[...])
    x = _bn_relu(lin(x, w3_ref, c3_ref), g5_ref[...], b5_ref[...])
    x = _bn_relu(lin(x, w4_ref, c4_ref), g6_ref[...], b6_ref[...])
    o_ref[...] = lin(x, w5_ref, c5_ref)


def _pool_matrix(c):
    # AvgPool1d(kernel_size=2, stride=2) over the feature axis as a [C, C//2]
    # matmul: P[2j, j] = P[2j+1, j] = 0.5.
    return jax.nn.one_hot(jnp.arange(c) // 2, c // 2, dtype=jnp.float32) * 0.5


def mlp_head(x, p):
    N, C = x.shape
    pool = _pool_matrix(C)

    def row(v):
        return v.reshape(1, -1)

    args = [
        x, pool,
        row(p["bn_2"]["gamma"]), row(p["bn_2"]["beta"]),
        p["fc1"]["w"], row(p["fc1"]["b"]), row(p["bn3"]["gamma"]), row(p["bn3"]["beta"]),
        p["fc2"]["w"], row(p["fc2"]["b"]), row(p["bn4"]["gamma"]), row(p["bn4"]["beta"]),
        p["fc3"]["w"], row(p["fc3"]["b"]), row(p["bn5"]["gamma"]), row(p["bn5"]["beta"]),
        p["fc4"]["w"], row(p["fc4"]["b"]), row(p["bn6"]["gamma"]), row(p["bn6"]["beta"]),
        p["fc5"]["w"], row(p["fc5"]["b"]),
    ]
    return pl.pallas_call(
        _mlp_head_kernel,
        out_shape=jax.ShapeDtypeStruct((N, 1), jnp.float32),
        in_specs=[pl.BlockSpec(memory_space=VMEM)] * len(args),
        out_specs=pl.BlockSpec(memory_space=VMEM),
    )(*args)


# --------------------------------------------------------------------------
# HGTConv (PyG semantics) built on the kernels above
# --------------------------------------------------------------------------
def segment_softmax(scores, seg_ids, num_segments):
    # scores: [E, H]; softmax over all edges sharing a destination node.
    seg_max = jax.ops.segment_max(scores, seg_ids, num_segments=num_segments)
    seg_max = jnp.where(jnp.isfinite(seg_max), seg_max, 0.0)
    ex = jnp.exp(scores - seg_max[seg_ids])
    denom = jax.ops.segment_sum(ex, seg_ids, num_segments=num_segments)
    return ex / (denom[seg_ids] + 1e-16)


def _block_diag(mats):
    # mats: [H, D, D] -> block-diagonal [H*D, H*D]
    H, D, _ = mats.shape
    eye = jnp.eye(H, dtype=mats.dtype)
    return (eye[:, None, :, None] * mats[:, :, None, :]).reshape(H * D, H * D)


def hgt_conv(x_dict, edge_index_dict, lp, bn, heads):
    node_types = list(x_dict.keys())
    hidden = lp["kqv_w"][node_types[0]].shape[1] // 3
    D = hidden // heads

    # ---- trace-time weight composition: fold a_rel/m_rel into the K/V
    # ---- projections (k_rel = x @ (W_k @ blockdiag(a_rel)) + b_k @ BD).
    # ---- One lane-dense fused matmul per node type: [q | k_rel|v_rel per et].
    proj = {}
    edge_col = {}
    for nt in node_types:
        Wkqv = lp["kqv_w"][nt]
        bkqv = lp["kqv_b"][nt]
        Wk, Wq, Wv = Wkqv[:, :hidden], Wkqv[:, hidden:2 * hidden], Wkqv[:, 2 * hidden:]
        bk, bq, bv = bkqv[:hidden], bkqv[hidden:2 * hidden], bkqv[2 * hidden:]
        w_cols, b_cols = [Wq], [bq]
        col = hidden
        for et in edge_index_dict:
            if et[0] != nt:
                continue
            ep = lp["rel"][et]
            A = _block_diag(ep["a_rel"])
            M = _block_diag(ep["m_rel"])
            w_cols += [Wk @ A, Wv @ M]
            b_cols += [bk @ A, bv @ M]
            edge_col[et] = col
            col += 2 * hidden
        W_cat = jnp.concatenate(w_cols, axis=1)
        b_cat = jnp.concatenate(b_cols, axis=0)
        proj[nt] = linear(x_dict[nt], W_cat, b_cat)   # Pallas matmul

    # TODO(synk): the sparse edge gathers, segment-softmax and scatter-add of
    # the attention aggregation have no clean Pallas equivalent here and stay
    # in plain JAX; dense matmuls around them run in Pallas kernels.
    per_dst = {nt: {"alpha": [], "msg": [], "dst": []} for nt in node_types}
    scale = 1.0 / (float(D) ** 0.5)
    for et, ei in edge_index_dict.items():
        src_t, _, dst_t = et
        ep = lp["rel"][et]
        c = edge_col[et]
        sp = proj[src_t]
        Ns = sp.shape[0]
        k_rel = sp[:, c:c + hidden].reshape(Ns, heads, D)
        v_rel = sp[:, c + hidden:c + 2 * hidden].reshape(Ns, heads, D)
        q = proj[dst_t][:, :hidden].reshape(-1, heads, D)
        src, dst = ei[0], ei[1]
        alpha = (q[dst] * k_rel[src]).sum(-1) * ep["p_rel"] * scale   # [E, H]
        per_dst[dst_t]["alpha"].append(alpha)
        per_dst[dst_t]["msg"].append(v_rel[src])
        per_dst[dst_t]["dst"].append(dst)

    # ---- aggregate, then fused output-projection / skip / BN / ReLU kernel.
    out_dict = {}
    for nt in node_types:
        x = x_dict[nt]
        N = x.shape[0]
        if per_dst[nt]["alpha"]:
            alpha = jnp.concatenate(per_dst[nt]["alpha"], axis=0)
            msg = jnp.concatenate(per_dst[nt]["msg"], axis=0)
            dst = jnp.concatenate(per_dst[nt]["dst"], axis=0)
            att = segment_softmax(alpha, dst, N)
            agg = jax.ops.segment_sum(msg * att[:, :, None], dst, num_segments=N)
        else:
            agg = jnp.zeros((N, heads, D), jnp.float32)
        # exact GELU stays in JAX glue (fuses with the scatter output)
        agg = jax.nn.gelu(agg.reshape(N, hidden), approximate=False)
        if x.shape[-1] == hidden:
            gate = jax.nn.sigmoid(lp["skip"][nt])
            out_dict[nt] = out_proj_skip_bn_relu(
                agg, x, lp["out_w"][nt], lp["out_b"][nt], gate,
                bn["gamma"], bn["beta"])
        else:
            out_dict[nt] = out_proj_bn_relu(
                agg, lp["out_w"][nt], lp["out_b"][nt], bn["gamma"], bn["beta"])
    return out_dict


# --------------------------------------------------------------------------
# Full Model forward (jitted; `heads` static)
# --------------------------------------------------------------------------
@functools.partial(jax.jit, static_argnames=("heads",))
def model_forward(params, x_dict, edge_index_dict, edge_label_index, *, heads):
    h = dict(x_dict)
    for layer in range(len(params["convs"])):
        h = hgt_conv(h, edge_index_dict, params["convs"][layer],
                     params["bns"][layer], heads)
    out = {k: mlp_head(v, params) for k, v in h.items()}
    # Classifier: after fc5 node features are width-1, so the edge "dot
    # product" is a scalar multiply + sigmoid -> pure JAX glue (no kernel).
    a = out["req"][edge_label_index[0], 0]
    b = out["code"][edge_label_index[1], 0]
    return jax.nn.sigmoid(a * b)


# --------------------------------------------------------------------------
# Deterministic parameter initialization
# --------------------------------------------------------------------------
def _uniform(key, shape, bound):
    return jax.random.uniform(key, shape, jnp.float32, -bound, bound)


def init_linear(key, cin, cout):
    k1, k2 = jax.random.split(key)
    bound = 1.0 / float(cin) ** 0.5
    return {"w": _uniform(k1, (cin, cout), bound), "b": _uniform(k2, (cout,), bound)}


def build_params(key, in_channels, hidden, heads, num_layers, node_types, edge_types):
    params = {}
    keys = iter(jax.random.split(key, 512))
    D = hidden // heads

    convs = []
    for layer in range(num_layers):
        cin = in_channels if layer == 0 else hidden
        lp = {"kqv_w": {}, "kqv_b": {}, "out_w": {}, "out_b": {}, "skip": {}, "rel": {}}
        for nt in node_types:
            l = init_linear(next(keys), cin, 3 * hidden)
            lp["kqv_w"][nt], lp["kqv_b"][nt] = l["w"], l["b"]
            l = init_linear(next(keys), hidden, hidden)
            lp["out_w"][nt], lp["out_b"][nt] = l["w"], l["b"]
            lp["skip"][nt] = jnp.float32(1.0)
        for et in edge_types:
            lp["rel"][et] = {
                "a_rel": jax.random.normal(next(keys), (heads, D, D), jnp.float32) / (D ** 0.5),
                "m_rel": jax.random.normal(next(keys), (heads, D, D), jnp.float32) / (D ** 0.5),
                "p_rel": jnp.ones((heads,), jnp.float32),
            }
        convs.append(lp)
    params["convs"] = convs

    params["bns"] = [
        {"gamma": jnp.ones((hidden,), jnp.float32), "beta": jnp.zeros((hidden,), jnp.float32)}
        for _ in range(num_layers)
    ]
    params["bn_2"] = {"gamma": jnp.ones((hidden // 2,), jnp.float32),
                      "beta": jnp.zeros((hidden // 2,), jnp.float32)}
    for i, (ci, co) in enumerate([(hidden // 2, 512), (512, 256), (256, 128), (128, 64), (64, 1)], 1):
        params[f"fc{i}"] = init_linear(next(keys), ci, co)
    for name, c in (("bn3", 512), ("bn4", 256), ("bn5", 128), ("bn6", 64)):
        params[name] = {"gamma": jnp.ones((c,), jnp.float32), "beta": jnp.zeros((c,), jnp.float32)}
    return params


# --------------------------------------------------------------------------
if __name__ == "__main__":
    key = jax.random.PRNGKey(0)
    in_channels, hidden, heads, num_layers = 32, 64, 8, 2
    n_req, n_code, n_reason = 16, 16, 8
    node_types = ["req", "code", "reason"]
    edge_types = [
        ("req", "link", "code"),
        ("code", "rev_link", "req"),
        ("req", "describes", "reason"),
        ("reason", "rev_describes", "req"),
    ]
    counts = {"req": n_req, "code": n_code, "reason": n_reason}

    kx, ke, kp, kl = jax.random.split(key, 4)
    kx1, kx2, kx3 = jax.random.split(kx, 3)
    x_dict = {
        "req": jax.random.normal(kx1, (n_req, in_channels), jnp.float32),
        "code": jax.random.normal(kx2, (n_code, in_channels), jnp.float32),
        "reason": jax.random.normal(kx3, (n_reason, in_channels), jnp.float32),
    }

    n_edges = 32
    edge_index_dict = {}
    for et, k in zip(edge_types, jax.random.split(ke, len(edge_types))):
        k1, k2 = jax.random.split(k)
        src = jax.random.randint(k1, (n_edges,), 0, counts[et[0]], jnp.int32)
        dst = jax.random.randint(k2, (n_edges,), 0, counts[et[2]], jnp.int32)
        edge_index_dict[et] = jnp.stack([src, dst])

    n_label = 8
    kl1, kl2 = jax.random.split(kl)
    edge_label_index = jnp.stack([
        jax.random.randint(kl1, (n_label,), 0, n_req, jnp.int32),
        jax.random.randint(kl2, (n_label,), 0, n_code, jnp.int32),
    ])

    params = build_params(kp, in_channels, hidden, heads, num_layers, node_types, edge_types)

    pred = model_forward(params, x_dict, edge_index_dict, edge_label_index, heads=heads)
    pred = jax.block_until_ready(pred)

    assert pred.shape == (n_label,), pred.shape
    assert bool(jnp.all(jnp.isfinite(pred)))
    assert bool(jnp.all((pred >= 0.0) & (pred <= 1.0)))
    print("KERNEL_OK")
</pallas_src>

<mosaic_0001>
module attributes {stable_mosaic.version = 11 : i64} {
  func.func @_linear_kernel(%arg0: memref<16x32xf32, #tpu.memory_space<vmem>>, %arg1: memref<32x320xf32, #tpu.memory_space<vmem>>, %arg2: memref<1x320xf32, #tpu.memory_space<vmem>>, %arg3: memref<16x320xf32, #tpu.memory_space<vmem>>) attributes {dimension_semantics = [], scalar_prefetch = 0 : i64, scratch_operands = 0 : i64, tpu.core_type = #tpu.core_type<tc>} {
    %c0 = arith.constant 0 : index
    %c0_0 = arith.constant 0 : index
    %0 = vector.load %arg0[%c0, %c0_0] : memref<16x32xf32, #tpu.memory_space<vmem>>, vector<16x32xf32>
    %c0_1 = arith.constant 0 : index
    %c0_2 = arith.constant 0 : index
    %1 = vector.load %arg1[%c0_1, %c0_2] : memref<32x320xf32, #tpu.memory_space<vmem>>, vector<32x320xf32>
    %cst = arith.constant dense<0.000000e+00> : vector<16x320xf32>
    %2 = tpu.matmul %0, %1, %cst {dimension_numbers = #tpu.dot_dimension_numbers<[1], [0], [0], [1], [0, 0, 1, 1], [], []>} : vector<16x32xf32>, vector<32x320xf32>, vector<16x320xf32> -> vector<16x320xf32>
    %c0_3 = arith.constant 0 : index
    %c0_4 = arith.constant 0 : index
    %3 = vector.load %arg2[%c0_3, %c0_4] : memref<1x320xf32, #tpu.memory_space<vmem>>, vector<1x320xf32>
    %4 = vector.broadcast %3 : vector<1x320xf32> to vector<16x320xf32>
    %5 = arith.addf %2, %4 : vector<16x320xf32>
    %c0_5 = arith.constant 0 : index
    %c0_6 = arith.constant 0 : index
    %6 = vector.load %arg3[%c0_5, %c0_6] : memref<16x320xf32, #tpu.memory_space<vmem>>, vector<16x320xf32>
    tpu.vector_store %arg3[%c0_5, %c0_6], %5 {strides = array<i32>} : memref<16x320xf32, #tpu.memory_space<vmem>>, vector<16x320xf32>,
    return
  }
}

module attributes {stable_mosaic.version = 11 : i64} {
  func.func @_linear_kernel(%arg0: memref<16x32xf32, #tpu.memory_space<vmem>>, %arg1: memref<32x192xf32, #tpu.memory_space<vmem>>, %arg2: memref<1x192xf32, #tpu.memory_space<vmem>>, %arg3: memref<16x192xf32, #tpu.memory_space<vmem>>) attributes {dimension_semantics = [], scalar_prefetch = 0 : i64, scratch_operands = 0 : i64, tpu.core_type = #tpu.core_type<tc>} {
    %c0 = arith.constant 0 : index
    %c0_0 = arith.constant 0 : index
    %0 = vector.load %arg0[%c0, %c0_0] : memref<16x32xf32, #tpu.memory_space<vmem>>, vector<16x32xf32>
    %c0_1 = arith.constant 0 : index
    %c0_2 = arith.constant 0 : index
    %1 = vector.load %arg1[%c0_1, %c0_2] : memref<32x192xf32, #tpu.memory_space<vmem>>, vector<32x192xf32>
    %cst = arith.constant dense<0.000000e+00> : vector<16x192xf32>
    %2 = tpu.matmul %0, %1, %cst {dimension_numbers = #tpu.dot_dimension_numbers<[1], [0], [0], [1], [0, 0, 1, 1], [], []>} : vector<16x32xf32>, vector<32x192xf32>, vector<16x192xf32> -> vector<16x192xf32>
    %c0_3 = arith.constant 0 : index
    %c0_4 = arith.constant 0 : index
    %3 = vector.load %arg2[%c0_3, %c0_4] : memref<1x192xf32, #tpu.memory_space<vmem>>, vector<1x192xf32>
    %4 = vector.broadcast %3 : vector<1x192xf32> to vector<16x192xf32>
    %5 = arith.addf %2, %4 : vector<16x192xf32>
    %c0_5 = arith.constant 0 : index
    %c0_6 = arith.constant 0 : index
    %6 = vector.load %arg3[%c0_5, %c0_6] : memref<16x192xf32, #tpu.memory_space<vmem>>, vector<16x192xf32>
    tpu.vector_store %arg3[%c0_5, %c0_6], %5 {strides = array<i32>} : memref<16x192xf32, #tpu.memory_space<vmem>>, vector<16x192xf32>,
    return
  }
}

module attributes {stable_mosaic.version = 11 : i64} {
  func.func @_linear_kernel(%arg0: memref<8x32xf32, #tpu.memory_space<vmem>>, %arg1: memref<32x192xf32, #tpu.memory_space<vmem>>, %arg2: memref<1x192xf32, #tpu.memory_space<vmem>>, %arg3: memref<8x192xf32, #tpu.memory_space<vmem>>) attributes {dimension_semantics = [], scalar_prefetch = 0 : i64, scratch_operands = 0 : i64, tpu.core_type = #tpu.core_type<tc>} {
    %c0 = arith.constant 0 : index
    %c0_0 = arith.constant 0 : index
    %0 = vector.load %arg0[%c0, %c0_0] : memref<8x32xf32, #tpu.memory_space<vmem>>, vector<8x32xf32>
    %c0_1 = arith.constant 0 : index
    %c0_2 = arith.constant 0 : index
    %1 = vector.load %arg1[%c0_1, %c0_2] : memref<32x192xf32, #tpu.memory_space<vmem>>, vector<32x192xf32>
    %cst = arith.constant dense<0.000000e+00> : vector<8x192xf32>
    %2 = tpu.matmul %0, %1, %cst {dimension_numbers = #tpu.dot_dimension_numbers<[1], [0], [0], [1], [0, 0, 1, 1], [], []>} : vector<8x32xf32>, vector<32x192xf32>, vector<8x192xf32> -> vector<8x192xf32>
    %c0_3 = arith.constant 0 : index
    %c0_4 = arith.constant 0 : index
    %3 = vector.load %arg2[%c0_3, %c0_4] : memref<1x192xf32, #tpu.memory_space<vmem>>, vector<1x192xf32>
    %4 = vector.broadcast %3 : vector<1x192xf32> to vector<8x192xf32>
    %5 = arith.addf %2, %4 : vector<8x192xf32>
    %c0_5 = arith.constant 0 : index
    %c0_6 = arith.constant 0 : index
    %6 = vector.load %arg3[%c0_5, %c0_6] : memref<8x192xf32, #tpu.memory_space<vmem>>, vector<8x192xf32>
    tpu.vector_store %arg3[%c0_5, %c0_6], %5 {strides = array<i32>} : memref<8x192xf32, #tpu.memory_space<vmem>>, vector<8x192xf32>,
    return
  }
}

module attributes {stable_mosaic.version = 11 : i64} {
  func.func @_outproj_bn_relu_kernel(%arg0: memref<16x64xf32, #tpu.memory_space<vmem>>, %arg1: memref<64x64xf32, #tpu.memory_space<vmem>>, %arg2: memref<1x64xf32, #tpu.memory_space<vmem>>, %arg3: memref<1x64xf32, #tpu.memory_space<vmem>>, %arg4: memref<1x64xf32, #tpu.memory_space<vmem>>, %arg5: memref<16x64xf32, #tpu.memory_space<vmem>>) attributes {dimension_semantics = [], scalar_prefetch = 0 : i64, scratch_operands = 0 : i64, tpu.core_type = #tpu.core_type<tc>} {
    %c0 = arith.constant 0 : index
    %c0_0 = arith.constant 0 : index
    %0 = vector.load %arg0[%c0, %c0_0] : memref<16x64xf32, #tpu.memory_space<vmem>>, vector<16x64xf32>
    %c0_1 = arith.constant 0 : index
    %c0_2 = arith.constant 0 : index
    %1 = vector.load %arg1[%c0_1, %c0_2] : memref<64x64xf32, #tpu.memory_space<vmem>>, vector<64x64xf32>
    %cst = arith.constant dense<0.000000e+00> : vector<16x64xf32>
    %2 = tpu.matmul %0, %1, %cst {dimension_numbers = #tpu.dot_dimension_numbers<[1], [0], [0], [1], [0, 0, 1, 1], [], []>} : vector<16x64xf32>, vector<64x64xf32>, vector<16x64xf32> -> vector<16x64xf32>
    %c0_3 = arith.constant 0 : index
    %c0_4 = arith.constant 0 : index
    %3 = vector.load %arg2[%c0_3, %c0_4] : memref<1x64xf32, #tpu.memory_space<vmem>>, vector<1x64xf32>
    %4 = vector.broadcast %3 : vector<1x64xf32> to vector<16x64xf32>
    %5 = arith.addf %2, %4 : vector<16x64xf32>
    %c0_5 = arith.constant 0 : index
    %c0_6 = arith.constant 0 : index
    %6 = vector.load %arg3[%c0_5, %c0_6] : memref<1x64xf32, #tpu.memory_space<vmem>>, vector<1x64xf32>
    %c0_7 = arith.constant 0 : index
    %c0_8 = arith.constant 0 : index
    %7 = vector.load %arg4[%c0_7, %c0_8] : memref<1x64xf32, #tpu.memory_space<vmem>>, vector<1x64xf32>
    %cst_9 = arith.constant dense<0.000000e+00> : vector<64xf32>
    %8 = vector.multi_reduction <add>, %5, %cst_9 [0] : vector<16x64xf32> to vector<64xf32>
    %9 = vector.shape_cast %8 : vector<64xf32> to vector<1x64xf32>
    %cst_10 = arith.constant 1.600000e+01 : f32
    %10 = vector.broadcast %cst_10 : f32 to vector<1x64xf32>
    %11 = arith.divf %9, %10 : vector<1x64xf32>
    %12 = vector.broadcast %11 : vector<1x64xf32> to vector<16x64xf32>
    %13 = arith.subf %5, %12 : vector<16x64xf32>
    %14 = arith.mulf %13, %13 : vector<16x64xf32>
    %cst_11 = arith.constant dense<0.000000e+00> : vector<64xf32>
    %15 = vector.multi_reduction <add>, %14, %cst_11 [0] : vector<16x64xf32> to vector<64xf32>
    %16 = vector.shape_cast %15 : vector<64xf32> to vector<1x64xf32>
    %cst_12 = arith.constant 1.600000e+01 : f32
    %17 = vector.broadcast %cst_12 : f32 to vector<1x64xf32>
    %18 = arith.divf %16, %17 : vector<1x64xf32>
    %19 = vector.broadcast %11 : vector<1x64xf32> to vector<16x64xf32>
    %20 = arith.subf %5, %19 : vector<16x64xf32>
    %cst_13 = arith.constant 9.99999974E-6 : f32
    %21 = vector.broadcast %cst_13 : f32 to vector<1x64xf32>
    %22 = arith.addf %18, %21 : vector<1x64xf32>
    %23 = math.rsqrt %22 : vector<1x64xf32>
    %24 = vector.broadcast %23 : vector<1x64xf32> to vector<16x64xf32>
    %25 = arith.mulf %20, %24 : vector<16x64xf32>
    %26 = vector.broadcast %6 : vector<1x64xf32> to vector<16x64xf32>
    %27 = arith.mulf %25, %26 : vector<16x64xf32>
    %28 = vector.broadcast %7 : vector<1x64xf32> to vector<16x64xf32>
    %29 = arith.addf %27, %28 : vector<16x64xf32>
    %cst_14 = arith.constant 0.000000e+00 : f32
    %30 = vector.broadcast %cst_14 : f32 to vector<16x64xf32>
    %31 = arith.maximumf %29, %30 : vector<16x64xf32>
    %c0_15 = arith.constant 0 : index
    %c0_16 = arith.constant 0 : index
    %32 = vector.load %arg5[%c0_15, %c0_16] : memref<16x64xf32, #tpu.memory_space<vmem>>, vector<16x64xf32>
    tpu.vector_store %arg5[%c0_15, %c0_16], %31 {strides = array<i32>} : memref<16x64xf32, #tpu.memory_space<vmem>>, vector<16x64xf32>,
    return
  }
}

module attributes {stable_mosaic.version = 11 : i64} {
  func.func @_linear_kernel(%arg0: memref<16x64xf32, #tpu.memory_space<vmem>>, %arg1: memref<64x320xf32, #tpu.memory_space<vmem>>, %arg2: memref<1x320xf32, #tpu.memory_space<vmem>>, %arg3: memref<16x320xf32, #tpu.memory_space<vmem>>) attributes {dimension_semantics = [], scalar_prefetch = 0 : i64, scratch_operands = 0 : i64, tpu.core_type = #tpu.core_type<tc>} {
    %c0 = arith.constant 0 : index
    %c0_0 = arith.constant 0 : index
    %0 = vector.load %arg0[%c0, %c0_0] : memref<16x64xf32, #tpu.memory_space<vmem>>, vector<16x64xf32>
    %c0_1 = arith.constant 0 : index
    %c0_2 = arith.constant 0 : index
    %1 = vector.load %arg1[%c0_1, %c0_2] : memref<64x320xf32, #tpu.memory_space<vmem>>, vector<64x320xf32>
    %cst = arith.constant dense<0.000000e+00> : vector<16x320xf32>
    %2 = tpu.matmul %0, %1, %cst {dimension_numbers = #tpu.dot_dimension_numbers<[1], [0], [0], [1], [0, 0, 1, 1], [], []>} : vector<16x64xf32>, vector<64x320xf32>, vector<16x320xf32> -> vector<16x320xf32>
    %c0_3 = arith.constant 0 : index
    %c0_4 = arith.constant 0 : index
    %3 = vector.load %arg2[%c0_3, %c0_4] : memref<1x320xf32, #tpu.memory_space<vmem>>, vector<1x320xf32>
    %4 = vector.broadcast %3 : vector<1x320xf32> to vector<16x320xf32>
    %5 = arith.addf %2, %4 : vector<16x320xf32>
    %c0_5 = arith.constant 0 : index
    %c0_6 = arith.constant 0 : index
    %6 = vector.load %arg3[%c0_5, %c0_6] : memref<16x320xf32, #tpu.memory_space<vmem>>, vector<16x320xf32>
    tpu.vector_store %arg3[%c0_5, %c0_6], %5 {strides = array<i32>} : memref<16x320xf32, #tpu.memory_space<vmem>>, vector<16x320xf32>,
    return
  }
}

module attributes {stable_mosaic.version = 11 : i64} {
  func.func @_linear_kernel(%arg0: memref<16x64xf32, #tpu.memory_space<vmem>>, %arg1: memref<64x192xf32, #tpu.memory_space<vmem>>, %arg2: memref<1x192xf32, #tpu.memory_space<vmem>>, %arg3: memref<16x192xf32, #tpu.memory_space<vmem>>) attributes {dimension_semantics = [], scalar_prefetch = 0 : i64, scratch_operands = 0 : i64, tpu.core_type = #tpu.core_type<tc>} {
    %c0 = arith.constant 0 : index
    %c0_0 = arith.constant 0 : index
    %0 = vector.load %arg0[%c0, %c0_0] : memref<16x64xf32, #tpu.memory_space<vmem>>, vector<16x64xf32>
    %c0_1 = arith.constant 0 : index
    %c0_2 = arith.constant 0 : index
    %1 = vector.load %arg1[%c0_1, %c0_2] : memref<64x192xf32, #tpu.memory_space<vmem>>, vector<64x192xf32>
    %cst = arith.constant dense<0.000000e+00> : vector<16x192xf32>
    %2 = tpu.matmul %0, %1, %cst {dimension_numbers = #tpu.dot_dimension_numbers<[1], [0], [0], [1], [0, 0, 1, 1], [], []>} : vector<16x64xf32>, vector<64x192xf32>, vector<16x192xf32> -> vector<16x192xf32>
    %c0_3 = arith.constant 0 : index
    %c0_4 = arith.constant 0 : index
    %3 = vector.load %arg2[%c0_3, %c0_4] : memref<1x192xf32, #tpu.memory_space<vmem>>, vector<1x192xf32>
    %4 = vector.broadcast %3 : vector<1x192xf32> to vector<16x192xf32>
    %5 = arith.addf %2, %4 : vector<16x192xf32>
    %c0_5 = arith.constant 0 : index
    %c0_6 = arith.constant 0 : index
    %6 = vector.load %arg3[%c0_5, %c0_6] : memref<16x192xf32, #tpu.memory_space<vmem>>, vector<16x192xf32>
    tpu.vector_store %arg3[%c0_5, %c0_6], %5 {strides = array<i32>} : memref<16x192xf32, #tpu.memory_space<vmem>>, vector<16x192xf32>,
    return
  }
}

module attributes {stable_mosaic.version = 11 : i64} {
  func.func @_outproj_skip_bn_relu_kernel(%arg0: memref<16x64xf32, #tpu.memory_space<vmem>>, %arg1: memref<16x64xf32, #tpu.memory_space<vmem>>, %arg2: memref<64x64xf32, #tpu.memory_space<vmem>>, %arg3: memref<1x64xf32, #tpu.memory_space<vmem>>, %arg4: memref<1x64xf32, #tpu.memory_space<vmem>>, %arg5: memref<1x64xf32, #tpu.memory_space<vmem>>, %arg6: memref<1x64xf32, #tpu.memory_space<vmem>>, %arg7: memref<16x64xf32, #tpu.memory_space<vmem>>) attributes {dimension_semantics = [], scalar_prefetch = 0 : i64, scratch_operands = 0 : i64, tpu.core_type = #tpu.core_type<tc>} {
    %c0 = arith.constant 0 : index
    %c0_0 = arith.constant 0 : index
    %0 = vector.load %arg0[%c0, %c0_0] : memref<16x64xf32, #tpu.memory_space<vmem>>, vector<16x64xf32>
    %c0_1 = arith.constant 0 : index
    %c0_2 = arith.constant 0 : index
    %1 = vector.load %arg2[%c0_1, %c0_2] : memref<64x64xf32, #tpu.memory_space<vmem>>, vector<64x64xf32>
    %cst = arith.constant dense<0.000000e+00> : vector<16x64xf32>
    %2 = tpu.matmul %0, %1, %cst {dimension_numbers = #tpu.dot_dimension_numbers<[1], [0], [0], [1], [0, 0, 1, 1], [], []>} : vector<16x64xf32>, vector<64x64xf32>, vector<16x64xf32> -> vector<16x64xf32>
    %c0_3 = arith.constant 0 : index
    %c0_4 = arith.constant 0 : index
    %3 = vector.load %arg3[%c0_3, %c0_4] : memref<1x64xf32, #tpu.memory_space<vmem>>, vector<1x64xf32>
    %4 = vector.broadcast %3 : vector<1x64xf32> to vector<16x64xf32>
    %5 = arith.addf %2, %4 : vector<16x64xf32>
    %c0_5 = arith.constant 0 : index
    %c0_6 = arith.constant 0 : index
    %6 = vector.load %arg4[%c0_5, %c0_6] : memref<1x64xf32, #tpu.memory_space<vmem>>, vector<1x64xf32>
    %7 = vector.broadcast %6 : vector<1x64xf32> to vector<16x64xf32>
    %8 = arith.mulf %7, %5 : vector<16x64xf32>
    %cst_7 = arith.constant 1.000000e+00 : f32
    %9 = vector.broadcast %cst_7 : f32 to vector<1x64xf32>
    %10 = arith.subf %9, %6 : vector<1x64xf32>
    %c0_8 = arith.constant 0 : index
    %c0_9 = arith.constant 0 : index
    %11 = vector.load %arg1[%c0_8, %c0_9] : memref<16x64xf32, #tpu.memory_space<vmem>>, vector<16x64xf32>
    %12 = vector.broadcast %10 : vector<1x64xf32> to vector<16x64xf32>
    %13 = arith.mulf %12, %11 : vector<16x64xf32>
    %14 = arith.addf %8, %13 : vector<16x64xf32>
    %c0_10 = arith.constant 0 : index
    %c0_11 = arith.constant 0 : index
    %15 = vector.load %arg5[%c0_10, %c0_11] : memref<1x64xf32, #tpu.memory_space<vmem>>, vector<1x64xf32>
    %c0_12 = arith.constant 0 : index
    %c0_13 = arith.constant 0 : index
    %16 = vector.load %arg6[%c0_12, %c0_13] : memref<1x64xf32, #tpu.memory_space<vmem>>, vector<1x64xf32>
    %cst_14 = arith.constant dense<0.000000e+00> : vector<64xf32>
    %17 = vector.multi_reduction <add>, %14, %cst_14 [0] : vector<16x64xf32> to vector<64xf32>
    %18 = vector.shape_cast %17 : vector<64xf32> to vector<1x64xf32>
    %cst_15 = arith.constant 1.600000e+01 : f32
    %19 = vector.broadcast %cst_15 : f32 to vector<1x64xf32>
    %20 = arith.divf %18, %19 : vector<1x64xf32>
    %21 = vector.broadcast %20 : vector<1x64xf32> to vector<16x64xf32>
    %22 = arith.subf %14, %21 : vector<16x64xf32>
    %23 = arith.mulf %22, %22 : vector<16x64xf32>
    %cst_16 = arith.constant dense<0.000000e+00> : vector<64xf32>
    %24 = vector.multi_reduction <add>, %23, %cst_16 [0] : vector<16x64xf32> to vector<64xf32>
    %25 = vector.shape_cast %24 : vector<64xf32> to vector<1x64xf32>
    %cst_17 = arith.constant 1.600000e+01 : f32
    %26 = vector.broadcast %cst_17 : f32 to vector<1x64xf32>
    %27 = arith.divf %25, %26 : vector<1x64xf32>
    %28 = vector.broadcast %20 : vector<1x64xf32> to vector<16x64xf32>
    %29 = arith.subf %14, %28 : vector<16x64xf32>
    %cst_18 = arith.constant 9.99999974E-6 : f32
    %30 = vector.broadcast %cst_18 : f32 to vector<1x64xf32>
    %31 = arith.addf %27, %30 : vector<1x64xf32>
    %32 = math.rsqrt %31 : vector<1x64xf32>
    %33 = vector.broadcast %32 : vector<1x64xf32> to vector<16x64xf32>
    %34 = arith.mulf %29, %33 : vector<16x64xf32>
    %35 = vector.broadcast %15 : vector<1x64xf32> to vector<16x64xf32>
    %36 = arith.mulf %34, %35 : vector<16x64xf32>
    %37 = vector.broadcast %16 : vector<1x64xf32> to vector<16x64xf32>
    %38 = arith.addf %36, %37 : vector<16x64xf32>
    %cst_19 = arith.constant 0.000000e+00 : f32
    %39 = vector.broadcast %cst_19 : f32 to vector<16x64xf32>
    %40 = arith.maximumf %38, %39 : vector<16x64xf32>
    %c0_20 = arith.constant 0 : index
    %c0_21 = arith.constant 0 : index
    %41 = vector.load %arg7[%c0_20, %c0_21] : memref<16x64xf32, #tpu.memory_space<vmem>>, vector<16x64xf32>
    tpu.vector_store %arg7[%c0_20, %c0_21], %40 {strides = array<i32>} : memref<16x64xf32, #tpu.memory_space<vmem>>, vector<16x64xf32>,
    return
  }
}

module attributes {stable_mosaic.version = 11 : i64} {
  func.func @_mlp_head_kernel(%arg0: memref<16x64xf32, #tpu.memory_space<vmem>>, %arg1: memref<64x32xf32, #tpu.memory_space<vmem>>, %arg2: memref<1x32xf32, #tpu.memory_space<vmem>>, %arg3: memref<1x32xf32, #tpu.memory_space<vmem>>, %arg4: memref<32x512xf32, #tpu.memory_space<vmem>>, %arg5: memref<1x512xf32, #tpu.memory_space<vmem>>, %arg6: memref<1x512xf32, #tpu.memory_space<vmem>>, %arg7: memref<1x512xf32, #tpu.memory_space<vmem>>, %arg8: memref<512x256xf32, #tpu.memory_space<vmem>>, %arg9: memref<1x256xf32, #tpu.memory_space<vmem>>, %arg10: memref<1x256xf32, #tpu.memory_space<vmem>>, %arg11: memref<1x256xf32, #tpu.memory_space<vmem>>, %arg12: memref<256x128xf32, #tpu.memory_space<vmem>>, %arg13: memref<1x128xf32, #tpu.memory_space<vmem>>, %arg14: memref<1x128xf32, #tpu.memory_space<vmem>>, %arg15: memref<1x128xf32, #tpu.memory_space<vmem>>, %arg16: memref<128x64xf32, #tpu.memory_space<vmem>>, %arg17: memref<1x64xf32, #tpu.memory_space<vmem>>, %arg18: memref<1x64xf32, #tpu.memory_space<vmem>>, %arg19: memref<1x64xf32, #tpu.memory_space<vmem>>, %arg20: memref<64x1xf32, #tpu.memory_space<vmem>>, %arg21: memref<1x1xf32, #tpu.memory_space<vmem>>, %arg22: memref<16x1xf32, #tpu.memory_space<vmem>>) attributes {dimension_semantics = [], scalar_prefetch = 0 : i64, scratch_operands = 0 : i64, tpu.core_type = #tpu.core_type<tc>} {
    %c0 = arith.constant 0 : index
    %c0_0 = arith.constant 0 : index
    %0 = vector.load %arg0[%c0, %c0_0] : memref<16x64xf32, #tpu.memory_space<vmem>>, vector<16x64xf32>
    %c0_1 = arith.constant 0 : index
    %c0_2 = arith.constant 0 : index
    %1 = vector.load %arg1[%c0_1, %c0_2] : memref<64x32xf32, #tpu.memory_space<vmem>>, vector<64x32xf32>
    %cst = arith.constant dense<0.000000e+00> : vector<16x32xf32>
    %2 = tpu.matmul %0, %1, %cst {dimension_numbers = #tpu.dot_dimension_numbers<[1], [0], [0], [1], [0, 0, 1, 1], [], []>} : vector<16x64xf32>, vector<64x32xf32>, vector<16x32xf32> -> vector<16x32xf32>
    %c0_3 = arith.constant 0 : index
    %c0_4 = arith.constant 0 : index
    %3 = vector.load %arg2[%c0_3, %c0_4] : memref<1x32xf32, #tpu.memory_space<vmem>>, vector<1x32xf32>
    %c0_5 = arith.constant 0 : index
    %c0_6 = arith.constant 0 : index
    %4 = vector.load %arg3[%c0_5, %c0_6] : memref<1x32xf32, #tpu.memory_space<vmem>>, vector<1x32xf32>
    %cst_7 = arith.constant dense<0.000000e+00> : vector<32xf32>
    %5 = vector.multi_reduction <add>, %2, %cst_7 [0] : vector<16x32xf32> to vector<32xf32>
    %6 = vector.shape_cast %5 : vector<32xf32> to vector<1x32xf32>
    %cst_8 = arith.constant 1.600000e+01 : f32
    %7 = vector.broadcast %cst_8 : f32 to vector<1x32xf32>
    %8 = arith.divf %6, %7 : vector<1x32xf32>
    %9 = vector.broadcast %8 : vector<1x32xf32> to vector<16x32xf32>
    %10 = arith.subf %2, %9 : vector<16x32xf32>
    %11 = arith.mulf %10, %10 : vector<16x32xf32>
    %cst_9 = arith.constant dense<0.000000e+00> : vector<32xf32>
    %12 = vector.multi_reduction <add>, %11, %cst_9 [0] : vector<16x32xf32> to vector<32xf32>
    %13 = vector.shape_cast %12 : vector<32xf32> to vector<1x32xf32>
    %cst_10 = arith.constant 1.600000e+01 : f32
    %14 = vector.broadcast %cst_10 : f32 to vector<1x32xf32>
    %15 = arith.divf %13, %14 : vector<1x32xf32>
    %16 = vector.broadcast %8 : vector<1x32xf32> to vector<16x32xf32>
    %17 = arith.subf %2, %16 : vector<16x32xf32>
    %cst_11 = arith.constant 9.99999974E-6 : f32
    %18 = vector.broadcast %cst_11 : f32 to vector<1x32xf32>
    %19 = arith.addf %15, %18 : vector<1x32xf32>
    %20 = math.rsqrt %19 : vector<1x32xf32>
    %21 = vector.broadcast %20 : vector<1x32xf32> to vector<16x32xf32>
    %22 = arith.mulf %17, %21 : vector<16x32xf32>
    %23 = vector.broadcast %3 : vector<1x32xf32> to vector<16x32xf32>
    %24 = arith.mulf %22, %23 : vector<16x32xf32>
    %25 = vector.broadcast %4 : vector<1x32xf32> to vector<16x32xf32>
    %26 = arith.addf %24, %25 : vector<16x32xf32>
    %cst_12 = arith.constant 0.000000e+00 : f32
    %27 = vector.broadcast %cst_12 : f32 to vector<16x32xf32>
    %28 = arith.maximumf %26, %27 : vector<16x32xf32>
    %c0_13 = arith.constant 0 : index
    %c0_14 = arith.constant 0 : index
    %29 = vector.load %arg4[%c0_13, %c0_14] : memref<32x512xf32, #tpu.memory_space<vmem>>, vector<32x512xf32>
    %cst_15 = arith.constant dense<0.000000e+00> : vector<16x512xf32>
    %30 = tpu.matmul %28, %29, %cst_15 {dimension_numbers = #tpu.dot_dimension_numbers<[1], [0], [0], [1], [0, 0, 1, 1], [], []>} : vector<16x32xf32>, vector<32x512xf32>, vector<16x512xf32> -> vector<16x512xf32>
    %c0_16 = arith.constant 0 : index
    %c0_17 = arith.constant 0 : index
    %31 = vector.load %arg5[%c0_16, %c0_17] : memref<1x512xf32, #tpu.memory_space<vmem>>, vector<1x512xf32>
    %32 = vector.broadcast %31 : vector<1x512xf32> to vector<16x512xf32>
    %33 = arith.addf %30, %32 : vector<16x512xf32>
    %c0_18 = arith.constant 0 : index
    %c0_19 = arith.constant 0 : index
    %34 = vector.load %arg6[%c0_18, %c0_19] : memref<1x512xf32, #tpu.memory_space<vmem>>, vector<1x512xf32>
    %c0_20 = arith.constant 0 : index
    %c0_21 = arith.constant 0 : index
    %35 = vector.load %arg7[%c0_20, %c0_21] : memref<1x512xf32, #tpu.memory_space<vmem>>, vector<1x512xf32>
    %cst_22 = arith.constant dense<0.000000e+00> : vector<512xf32>
    %36 = vector.multi_reduction <add>, %33, %cst_22 [0] : vector<16x512xf32> to vector<512xf32>
    %37 = vector.shape_cast %36 : vector<512xf32> to vector<1x512xf32>
    %cst_23 = arith.constant 1.600000e+01 : f32
    %38 = vector.broadcast %cst_23 : f32 to vector<1x512xf32>
    %39 = arith.divf %37, %38 : vector<1x512xf32>
    %40 = vector.broadcast %39 : vector<1x512xf32> to vector<16x512xf32>
    %41 = arith.subf %33, %40 : vector<16x512xf32>
    %42 = arith.mulf %41, %41 : vector<16x512xf32>
    %cst_24 = arith.constant dense<0.000000e+00> : vector<512xf32>
    %43 = vector.multi_reduction <add>, %42, %cst_24 [0] : vector<16x512xf32> to vector<512xf32>
    %44 = vector.shape_cast %43 : vector<512xf32> to vector<1x512xf32>
    %cst_25 = arith.constant 1.600000e+01 : f32
    %45 = vector.broadcast %cst_25 : f32 to vector<1x512xf32>
    %46 = arith.divf %44, %45 : vector<1x512xf32>
    %47 = vector.broadcast %39 : vector<1x512xf32> to vector<16x512xf32>
    %48 = arith.subf %33, %47 : vector<16x512xf32>
    %cst_26 = arith.constant 9.99999974E-6 : f32
    %49 = vector.broadcast %cst_26 : f32 to vector<1x512xf32>
    %50 = arith.addf %46, %49 : vector<1x512xf32>
    %51 = math.rsqrt %50 : vector<1x512xf32>
    %52 = vector.broadcast %51 : vector<1x512xf32> to vector<16x512xf32>
    %53 = arith.mulf %48, %52 : vector<16x512xf32>
    %54 = vector.broadcast %34 : vector<1x512xf32> to vector<16x512xf32>
    %55 = arith.mulf %53, %54 : vector<16x512xf32>
    %56 = vector.broadcast %35 : vector<1x512xf32> to vector<16x512xf32>
    %57 = arith.addf %55, %56 : vector<16x512xf32>
    %cst_27 = arith.constant 0.000000e+00 : f32
    %58 = vector.broadcast %cst_27 : f32 to vector<16x512xf32>
    %59 = arith.maximumf %57, %58 : vector<16x512xf32>
    %c0_28 = arith.constant 0 : index
    %c0_29 = arith.constant 0 : index
    %60 = vector.load %arg8[%c0_28, %c0_29] : memref<512x256xf32, #tpu.memory_space<vmem>>, vector<512x256xf32>
    %cst_30 = arith.constant dense<0.000000e+00> : vector<16x256xf32>
    %61 = tpu.matmul %59, %60, %cst_30 {dimension_numbers = #tpu.dot_dimension_numbers<[1], [0], [0], [1], [0, 0, 1, 1], [], []>} : vector<16x512xf32>, vector<512x256xf32>, vector<16x256xf32> -> vector<16x256xf32>
    %c0_31 = arith.constant 0 : index
    %c0_32 = arith.constant 0 : index
    %62 = vector.load %arg9[%c0_31, %c0_32] : memref<1x256xf32, #tpu.memory_space<vmem>>, vector<1x256xf32>
    %63 = vector.broadcast %62 : vector<1x256xf32> to vector<16x256xf32>
    %64 = arith.addf %61, %63 : vector<16x256xf32>
    %c0_33 = arith.constant 0 : index
    %c0_34 = arith.constant 0 : index
    %65 = vector.load %arg10[%c0_33, %c0_34] : memref<1x256xf32, #tpu.memory_space<vmem>>, vector<1x256xf32>
    %c0_35 = arith.constant 0 : index
    %c0_36 = arith.constant 0 : index
    %66 = vector.load %arg11[%c0_35, %c0_36] : memref<1x256xf32, #tpu.memory_space<vmem>>, vector<1x256xf32>
    %cst_37 = arith.constant dense<0.000000e+00> : vector<256xf32>
    %67 = vector.multi_reduction <add>, %64, %cst_37 [0] : vector<16x256xf32> to vector<256xf32>
    %68 = vector.shape_cast %67 : vector<256xf32> to vector<1x256xf32>
    %cst_38 = arith.constant 1.600000e+01 : f32
    %69 = vector.broadcast %cst_38 : f32 to vector<1x256xf32>
    %70 = arith.divf %68, %69 : vector<1x256xf32>
    %71 = vector.broadcast %70 : vector<1x256xf32> to vector<16x256xf32>
    %72 = arith.subf %64, %71 : vector<16x256xf32>
    %73 = arith.mulf %72, %72 : vector<16x256xf32>
    %cst_39 = arith.constant dense<0.000000e+00> : vector<256xf32>
    %74 = vector.multi_reduction <add>, %73, %cst_39 [0] : vector<16x256xf32> to vector<256xf32>
    %75 = vector.shape_cast %74 : vector<256xf32> to vector<1x256xf32>
    %cst_40 = arith.constant 1.600000e+01 : f32
    %76 = vector.broadcast %cst_40 : f32 to vector<1x256xf32>
    %77 = arith.divf %75, %76 : vector<1x256xf32>
    %78 = vector.broadcast %70 : vector<1x256xf32> to vector<16x256xf32>
    %79 = arith.subf %64, %78 : vector<16x256xf32>
    %cst_41 = arith.constant 9.99999974E-6 : f32
    %80 = vector.broadcast %cst_41 : f32 to vector<1x256xf32>
    %81 = arith.addf %77, %80 : vector<1x256xf32>
    %82 = math.rsqrt %81 : vector<1x256xf32>
    %83 = vector.broadcast %82 : vector<1x256xf32> to vector<16x256xf32>
    %84 = arith.mulf %79, %83 : vector<16x256xf32>
    %85 = vector.broadcast %65 : vector<1x256xf32> to vector<16x256xf32>
    %86 = arith.mulf %84, %85 : vector<16x256xf32>
    %87 = vector.broadcast %66 : vector<1x256xf32> to vector<16x256xf32>
    %88 = arith.addf %86, %87 : vector<16x256xf32>
    %cst_42 = arith.constant 0.000000e+00 : f32
    %89 = vector.broadcast %cst_42 : f32 to vector<16x256xf32>
    %90 = arith.maximumf %88, %89 : vector<16x256xf32>
    %c0_43 = arith.constant 0 : index
    %c0_44 = arith.constant 0 : index
    %91 = vector.load %arg12[%c0_43, %c0_44] : memref<256x128xf32, #tpu.memory_space<vmem>>, vector<256x128xf32>
    %cst_45 = arith.constant dense<0.000000e+00> : vector<16x128xf32>
    %92 = tpu.matmul %90, %91, %cst_45 {dimension_numbers = #tpu.dot_dimension_numbers<[1], [0], [0], [1], [0, 0, 1, 1], [], []>} : vector<16x256xf32>, vector<256x128xf32>, vector<16x128xf32> -> vector<16x128xf32>
    %c0_46 = arith.constant 0 : index
    %c0_47 = arith.constant 0 : index
    %93 = vector.load %arg13[%c0_46, %c0_47] : memref<1x128xf32, #tpu.memory_space<vmem>>, vector<1x128xf32>
    %94 = vector.broadcast %93 : vector<1x128xf32> to vector<16x128xf32>
    %95 = arith.addf %92, %94 : vector<16x128xf32>
    %c0_48 = arith.constant 0 : index
    %c0_49 = arith.constant 0 : index
    %96 = vector.load %arg14[%c0_48, %c0_49] : memref<1x128xf32, #tpu.memory_space<vmem>>, vector<1x128xf32>
    %c0_50 = arith.constant 0 : index
    %c0_51 = arith.constant 0 : index
    %97 = vector.load %arg15[%c0_50, %c0_51] : memref<1x128xf32, #tpu.memory_space<vmem>>, vector<1x128xf32>
    %cst_52 = arith.constant dense<0.000000e+00> : vector<128xf32>
    %98 = vector.multi_reduction <add>, %95, %cst_52 [0] : vector<16x128xf32> to vector<128xf32>
    %99 = vector.shape_cast %98 : vector<128xf32> to vector<1x128xf32>
    %cst_53 = arith.constant 1.600000e+01 : f32
    %100 = vector.broadcast %cst_53 : f32 to vector<1x128xf32>
    %101 = arith.divf %99, %100 : vector<1x128xf32>
    %102 = vector.broadcast %101 : vector<1x128xf32> to vector<16x128xf32>
    %103 = arith.subf %95, %102 : vector<16x128xf32>
    %104 = arith.mulf %103, %103 : vector<16x128xf32>
    %cst_54 = arith.constant dense<0.000000e+00> : vector<128xf32>
    %105 = vector.multi_reduction <add>, %104, %cst_54 [0] : vector<16x128xf32> to vector<128xf32>
    %106 = vector.shape_cast %105 : vector<128xf32> to vector<1x128xf32>
    %cst_55 = arith.constant 1.600000e+01 : f32
    %107 = vector.broadcast %cst_55 : f32 to vector<1x128xf32>
    %108 = arith.divf %106, %107 : vector<1x128xf32>
    %109 = vector.broadcast %101 : vector<1x128xf32> to vector<16x128xf32>
    %110 = arith.subf %95, %109 : vector<16x128xf32>
    %cst_56 = arith.constant 9.99999974E-6 : f32
    %111 = vector.broadcast %cst_56 : f32 to vector<1x128xf32>
    %112 = arith.addf %108, %111 : vector<1x128xf32>
    %113 = math.rsqrt %112 : vector<1x128xf32>
    %114 = vector.broadcast %113 : vector<1x128xf32> to vector<16x128xf32>
    %115 = arith.mulf %110, %114 : vector<16x128xf32>
    %116 = vector.broadcast %96 : vector<1x128xf32> to vector<16x128xf32>
    %117 = arith.mulf %115, %116 : vector<16x128xf32>
    %118 = vector.broadcast %97 : vector<1x128xf32> to vector<16x128xf32>
    %119 = arith.addf %117, %118 : vector<16x128xf32>
    %cst_57 = arith.constant 0.000000e+00 : f32
    %120 = vector.broadcast %cst_57 : f32 to vector<16x128xf32>
    %121 = arith.maximumf %119, %120 : vector<16x128xf32>
    %c0_58 = arith.constant 0 : index
    %c0_59 = arith.constant 0 : index
    %122 = vector.load %arg16[%c0_58, %c0_59] : memref<128x64xf32, #tpu.memory_space<vmem>>, vector<128x64xf32>
    %cst_60 = arith.constant dense<0.000000e+00> : vector<16x64xf32>
    %123 = tpu.matmul %121, %122, %cst_60 {dimension_numbers = #tpu.dot_dimension_numbers<[1], [0], [0], [1], [0, 0, 1, 1], [], []>} : vector<16x128xf32>, vector<128x64xf32>, vector<16x64xf32> -> vector<16x64xf32>
    %c0_61 = arith.constant 0 : index
    %c0_62 = arith.constant 0 : index
    %124 = vector.load %arg17[%c0_61, %c0_62] : memref<1x64xf32, #tpu.memory_space<vmem>>, vector<1x64xf32>
    %125 = vector.broadcast %124 : vector<1x64xf32> to vector<16x64xf32>
    %126 = arith.addf %123, %125 : vector<16x64xf32>
    %c0_63 = arith.constant 0 : index
    %c0_64 = arith.constant 0 : index
    %127 = vector.load %arg18[%c0_63, %c0_64] : memref<1x64xf32, #tpu.memory_space<vmem>>, vector<1x64xf32>
    %c0_65 = arith.constant 0 : index
    %c0_66 = arith.constant 0 : index
    %128 = vector.load %arg19[%c0_65, %c0_66] : memref<1x64xf32, #tpu.memory_space<vmem>>, vector<1x64xf32>
    %cst_67 = arith.constant dense<0.000000e+00> : vector<64xf32>
    %129 = vector.multi_reduction <add>, %126, %cst_67 [0] : vector<16x64xf32> to vector<64xf32>
    %130 = vector.shape_cast %129 : vector<64xf32> to vector<1x64xf32>
    %cst_68 = arith.constant 1.600000e+01 : f32
    %131 = vector.broadcast %cst_68 : f32 to vector<1x64xf32>
    %132 = arith.divf %130, %131 : vector<1x64xf32>
    %133 = vector.broadcast %132 : vector<1x64xf32> to vector<16x64xf32>
    %134 = arith.subf %126, %133 : vector<16x64xf32>
    %135 = arith.mulf %134, %134 : vector<16x64xf32>
    %cst_69 = arith.constant dense<0.000000e+00> : vector<64xf32>
    %136 = vector.multi_reduction <add>, %135, %cst_69 [0] : vector<16x64xf32> to vector<64xf32>
    %137 = vector.shape_cast %136 : vector<64xf32> to vector<1x64xf32>
    %cst_70 = arith.constant 1.600000e+01 : f32
    %138 = vector.broadcast %cst_70 : f32 to vector<1x64xf32>
    %139 = arith.divf %137, %138 : vector<1x64xf32>
    %140 = vector.broadcast %132 : vector<1x64xf32> to vector<16x64xf32>
    %141 = arith.subf %126, %140 : vector<16x64xf32>
    %cst_71 = arith.constant 9.99999974E-6 : f32
    %142 = vector.broadcast %cst_71 : f32 to vector<1x64xf32>
    %143 = arith.addf %139, %142 : vector<1x64xf32>
    %144 = math.rsqrt %143 : vector<1x64xf32>
    %145 = vector.broadcast %144 : vector<1x64xf32> to vector<16x64xf32>
    %146 = arith.mulf %141, %145 : vector<16x64xf32>
    %147 = vector.broadcast %127 : vector<1x64xf32> to vector<16x64xf32>
    %148 = arith.mulf %146, %147 : vector<16x64xf32>
    %149 = vector.broadcast %128 : vector<1x64xf32> to vector<16x64xf32>
    %150 = arith.addf %148, %149 : vector<16x64xf32>
    %cst_72 = arith.constant 0.000000e+00 : f32
    %151 = vector.broadcast %cst_72 : f32 to vector<16x64xf32>
    %152 = arith.maximumf %150, %151 : vector<16x64xf32>
    %c0_73 = arith.constant 0 : index
    %c0_74 = arith.constant 0 : index
    %153 = vector.load %arg20[%c0_73, %c0_74] : memref<64x1xf32, #tpu.memory_space<vmem>>, vector<64x1xf32>
    %cst_75 = arith.constant dense<0.000000e+00> : vector<16x1xf32>
    %154 = tpu.matmul %152, %153, %cst_75 {dimension_numbers = #tpu.dot_dimension_numbers<[1], [0], [0], [1], [0, 0, 1, 1], [], []>} : vector<16x64xf32>, vector<64x1xf32>, vector<16x1xf32> -> vector<16x1xf32>
    %c0_76 = arith.constant 0 : index
    %c0_77 = arith.constant 0 : index
    %155 = vector.load %arg21[%c0_76, %c0_77] : memref<1x1xf32, #tpu.memory_space<vmem>>, vector<1x1xf32>
    %156 = vector.broadcast %155 : vector<1x1xf32> to vector<16x1xf32>
    %157 = arith.addf %154, %156 : vector<16x1xf32>
    %c0_78 = arith.constant 0 : index
    %c0_79 = arith.constant 0 : index
    %158 = vector.load %arg22[%c0_78, %c0_79] : memref<16x1xf32, #tpu.memory_space<vmem>>, vector<16x1xf32>
    tpu.vector_store %arg22[%c0_78, %c0_79], %157 {strides = array<i32>} : memref<16x1xf32, #tpu.memory_space<vmem>>, vector<16x1xf32>,
    return
  }
}

module attributes {stable_mosaic.version = 11 : i64} {
  func.func @_linear_kernel(%arg0: memref<8x64xf32, #tpu.memory_space<vmem>>, %arg1: memref<64x192xf32, #tpu.memory_space<vmem>>, %arg2: memref<1x192xf32, #tpu.memory_space<vmem>>, %arg3: memref<8x192xf32, #tpu.memory_space<vmem>>) attributes {dimension_semantics = [], scalar_prefetch = 0 : i64, scratch_operands = 0 : i64, tpu.core_type = #tpu.core_type<tc>} {
    %c0 = arith.constant 0 : index
    %c0_0 = arith.constant 0 : index
    %0 = vector.load %arg0[%c0, %c0_0] : memref<8x64xf32, #tpu.memory_space<vmem>>, vector<8x64xf32>
    %c0_1 = arith.constant 0 : index
    %c0_2 = arith.constant 0 : index
    %1 = vector.load %arg1[%c0_1, %c0_2] : memref<64x192xf32, #tpu.memory_space<vmem>>, vector<64x192xf32>
    %cst = arith.constant dense<0.000000e+00> : vector<8x192xf32>
    %2 = tpu.matmul %0, %1, %cst {dimension_numbers = #tpu.dot_dimension_numbers<[1], [0], [0], [1], [0, 0, 1, 1], [], []>} : vector<8x64xf32>, vector<64x192xf32>, vector<8x192xf32> -> vector<8x192xf32>
    %c0_3 = arith.constant 0 : index
    %c0_4 = arith.constant 0 : index
    %3 = vector.load %arg2[%c0_3, %c0_4] : memref<1x192xf32, #tpu.memory_space<vmem>>, vector<1x192xf32>
    %4 = vector.broadcast %3 : vector<1x192xf32> to vector<8x192xf32>
    %5 = arith.addf %2, %4 : vector<8x192xf32>
    %c0_5 = arith.constant 0 : index
    %c0_6 = arith.constant 0 : index
    %6 = vector.load %arg3[%c0_5, %c0_6] : memref<8x192xf32, #tpu.memory_space<vmem>>, vector<8x192xf32>
    tpu.vector_store %arg3[%c0_5, %c0_6], %5 {strides = array<i32>} : memref<8x192xf32, #tpu.memory_space<vmem>>, vector<8x192xf32>,
    return
  }
}

module attributes {stable_mosaic.version = 11 : i64} {
  func.func @_outproj_bn_relu_kernel(%arg0: memref<8x64xf32, #tpu.memory_space<vmem>>, %arg1: memref<64x64xf32, #tpu.memory_space<vmem>>, %arg2: memref<1x64xf32, #tpu.memory_space<vmem>>, %arg3: memref<1x64xf32, #tpu.memory_space<vmem>>, %arg4: memref<1x64xf32, #tpu.memory_space<vmem>>, %arg5: memref<8x64xf32, #tpu.memory_space<vmem>>) attributes {dimension_semantics = [], scalar_prefetch = 0 : i64, scratch_operands = 0 : i64, tpu.core_type = #tpu.core_type<tc>} {
    %c0 = arith.constant 0 : index
    %c0_0 = arith.constant 0 : index
    %0 = vector.load %arg0[%c0, %c0_0] : memref<8x64xf32, #tpu.memory_space<vmem>>, vector<8x64xf32>
    %c0_1 = arith.constant 0 : index
    %c0_2 = arith.constant 0 : index
    %1 = vector.load %arg1[%c0_1, %c0_2] : memref<64x64xf32, #tpu.memory_space<vmem>>, vector<64x64xf32>
    %cst = arith.constant dense<0.000000e+00> : vector<8x64xf32>
    %2 = tpu.matmul %0, %1, %cst {dimension_numbers = #tpu.dot_dimension_numbers<[1], [0], [0], [1], [0, 0, 1, 1], [], []>} : vector<8x64xf32>, vector<64x64xf32>, vector<8x64xf32> -> vector<8x64xf32>
    %c0_3 = arith.constant 0 : index
    %c0_4 = arith.constant 0 : index
    %3 = vector.load %arg2[%c0_3, %c0_4] : memref<1x64xf32, #tpu.memory_space<vmem>>, vector<1x64xf32>
    %4 = vector.broadcast %3 : vector<1x64xf32> to vector<8x64xf32>
    %5 = arith.addf %2, %4 : vector<8x64xf32>
    %c0_5 = arith.constant 0 : index
    %c0_6 = arith.constant 0 : index
    %6 = vector.load %arg3[%c0_5, %c0_6] : memref<1x64xf32, #tpu.memory_space<vmem>>, vector<1x64xf32>
    %c0_7 = arith.constant 0 : index
    %c0_8 = arith.constant 0 : index
    %7 = vector.load %arg4[%c0_7, %c0_8] : memref<1x64xf32, #tpu.memory_space<vmem>>, vector<1x64xf32>
    %cst_9 = arith.constant dense<0.000000e+00> : vector<64xf32>
    %8 = vector.multi_reduction <add>, %5, %cst_9 [0] : vector<8x64xf32> to vector<64xf32>
    %9 = vector.shape_cast %8 : vector<64xf32> to vector<1x64xf32>
    %cst_10 = arith.constant 8.000000e+00 : f32
    %10 = vector.broadcast %cst_10 : f32 to vector<1x64xf32>
    %11 = arith.divf %9, %10 : vector<1x64xf32>
    %12 = vector.broadcast %11 : vector<1x64xf32> to vector<8x64xf32>
    %13 = arith.subf %5, %12 : vector<8x64xf32>
    %14 = arith.mulf %13, %13 : vector<8x64xf32>
    %cst_11 = arith.constant dense<0.000000e+00> : vector<64xf32>
    %15 = vector.multi_reduction <add>, %14, %cst_11 [0] : vector<8x64xf32> to vector<64xf32>
    %16 = vector.shape_cast %15 : vector<64xf32> to vector<1x64xf32>
    %cst_12 = arith.constant 8.000000e+00 : f32
    %17 = vector.broadcast %cst_12 : f32 to vector<1x64xf32>
    %18 = arith.divf %16, %17 : vector<1x64xf32>
    %19 = vector.broadcast %11 : vector<1x64xf32> to vector<8x64xf32>
    %20 = arith.subf %5, %19 : vector<8x64xf32>
    %cst_13 = arith.constant 9.99999974E-6 : f32
    %21 = vector.broadcast %cst_13 : f32 to vector<1x64xf32>
    %22 = arith.addf %18, %21 : vector<1x64xf32>
    %23 = math.rsqrt %22 : vector<1x64xf32>
    %24 = vector.broadcast %23 : vector<1x64xf32> to vector<8x64xf32>
    %25 = arith.mulf %20, %24 : vector<8x64xf32>
    %26 = vector.broadcast %6 : vector<1x64xf32> to vector<8x64xf32>
    %27 = arith.mulf %25, %26 : vector<8x64xf32>
    %28 = vector.broadcast %7 : vector<1x64xf32> to vector<8x64xf32>
    %29 = arith.addf %27, %28 : vector<8x64xf32>
    %cst_14 = arith.constant 0.000000e+00 : f32
    %30 = vector.broadcast %cst_14 : f32 to vector<8x64xf32>
    %31 = arith.maximumf %29, %30 : vector<8x64xf32>
    %c0_15 = arith.constant 0 : index
    %c0_16 = arith.constant 0 : index
    %32 = vector.load %arg5[%c0_15, %c0_16] : memref<8x64xf32, #tpu.memory_space<vmem>>, vector<8x64xf32>
    tpu.vector_store %arg5[%c0_15, %c0_16], %31 {strides = array<i32>} : memref<8x64xf32, #tpu.memory_space<vmem>>, vector<8x64xf32>,
    return
  }
}

</mosaic_0001>

<bundles_post_ra>
// kernel: model_forward.15
= control target key start
LH: loop header
LB: loop body
LE: loop exit
PB: predicated region body
PF: predicated region fallthrough
CT: control target
= control target key end

     0   :  { %v237_v3 = vmov 0.0   ;;  %vm45_vm0 = vcmask 261120   ;;  %v30_v15 = vlaneseq  ;;  %vm206_vm1 = vcmask 523264   ;;  %s321_s1 = inlined_call_operand.vmem [shape: f32[32,320], index: 1, kind: input, shape index: {}]   ;;  %s322_s0 = inlined_call_operand.vmem [shape: f32[16,32], index: 0, kind: input, shape index: {}]   ;;  %s323_s2 = inlined_call_operand.vmem [shape: f32[1,320], index: 2, kind: input, shape index: {}]   ;;  %s324_s3 = inlined_call_operand.vmem [shape: f32[16,320], index: 3, kind: output, shape index: {}]  }
   0x1   :  { %v26_v0 = vld [vmem:[%s321_s1 + $0x50] sm:$0xff]  ;;  %v25_v1 = vld [vmem:[%s321_s1 + $0x48] sm:$0xff]  ;;  %v23_v2 = vld [vmem:[%s321_s1 + $0x38] sm:$0xff]  ;;  %116 = vmatprep.mubr.f32.mxu0 %v237_v3 }
   0x2   :  { %76 = vmatprep.subr.mxu0 %v26_v0  ;;  %v27_v4 = vld [vmem:[%s321_s1 + $0x58] sm:$0xff]  ;;  %v22_v5 = vld [vmem:[%s321_s1 + $0x30] sm:$0xff]  ;;  %v20_v6 = vld [vmem:[%s321_s1 + $0x20] sm:$0xff]  ;;  %v31_v16 = vshrl.u32 %v30_v15, 7 }
   0x3   :  { %77 = vmatpush1.msra.mxu0 %v25_v1  ;;  %225 = vmatprep.subr.mxu1 %v27_v4  ;;  %v24_v7 = vld [vmem:[%s321_s1 + $0x40] sm:$0xff]  ;;  %v19_v8 = vld [vmem:[%s321_s1 + $0x18] sm:$0xff]  ;;  %v21_v9 = vld [vmem:[%s321_s1 + $0x28] sm:$0xff] }
   0x4   :  { %78 = vmatprep.subr.mxu0 %v23_v2  ;;  %226 = vmatpush3.msra.mxu1 %v27_v4  ;;  %v17_v10 = vld [vmem:[%s321_s1 + $0x8] sm:$0xff]  ;;  %v16_v11 = vld [vmem:[%s321_s1] sm:$0xff]  ;;  %v18_v12 = vld [vmem:[%s321_s1 + $0x10] sm:$0xff]  ;;  %v32_v17 = vsub.s32 0, %v31_v16  ;;  %v36_v19 = vsub.s32 1, %v31_v16  ;;  %v40_v20 = vsub.s32 2, %v31_v16 }
   0x5   :  { %79 = vmatpush1.msra.mxu0 %v22_v5  ;;  %227 = vmatprep.subr.mxu1 %v24_v7  ;;  %v14_v13 = vld [vmem:[%s322_s0] sm:$0xff]  ;;  %v15_v14 = vld [vmem:[%s322_s0 + $0x8] sm:$0xff] }
   0x6   :  { %80 = vmatprep.subr.mxu0 %v20_v6  ;;  %228 = vmatpush3.msra.mxu1 %v24_v7  ;;  %v28_v18 = vld [vmem:[%s323_s2] sm:$0x7] }
   0x7   :  { %81 = vmatpush1.msra.mxu0 %v19_v8  ;;  %229 = vmatprep.subr.mxu1 %v21_v9  ;;  %v33_v21 = vrot.slane %v28_v18, %v32_v17  ;;  %v37_v22 = vrot.slane %v28_v18, %v36_v19  ;;  %v41_v23 = vrot.slane %v28_v18, %v40_v20 }
   0x8   :  { %82 = vmatprep.subr.mxu0 %v17_v10  ;;  %230 = vmatpush3.msra.mxu1 %v21_v9 }
   0x9   :  { %83 = vmatpush1.msra.mxu0 %v16_v11  ;;  %231 = vmatprep.subr.mxu1 %v18_v12 }
   0xa   :  { %215 = vmatmul.mubr.msk.f32.vlgmr.msra.gmra.mxu0 %vm45_vm0, %v14_v13  ;;  %232 = vmatpush3.msra.mxu1 %v18_v12 }
   0xb   :  { %233 = vmatprep.mubr.msk.f32.mxu1 %vm45_vm0, %v14_v13  ;;  %122 = vmatprep.mubr.f32.mxu0 %v237_v3 }
   0xc   :  { %234 = vmatmul.mubr.msk.f32.vlgmr.msra.gmra.mxu1 %vm45_vm0, %v15_v14 }
   0xe   :  { %216 = vmatmul.mubr.msk.f32.gmra.mxu0 %vm45_vm0, %v15_v14 }
  0xca   :  { %v118_v24 = vpop.f32.mrf.mxu0 }
  0xcb   :  { %v119_v25 = vadd.f32 %v118_v24, %v33_v21 }
  0xcc   :  { %v120_v26 = vpop.f32.mrf.mxu0  ;;  %v235_v27 = vpop.f32.mrf.mxu1 }
  0xcd   :  { %204 = vst [vmem:[%s324_s3] sm:$0xff] %v119_v25  ;;  %v121_v28 = vadd.f32 %v120_v26, %v37_v22  ;;  %v201_v29 = vadd.f32 %v235_v27, %v41_v23 }
  0xce   :  { %v124_v30 = vpop.f32.mrf.mxu0  ;;  %v195_v31 = vpop.f32.mrf.mxu1 }
  0xcf   :  { %205 = vst [vmem:[%s324_s3 + $0x8] sm:$0xff] %v121_v28  ;;  %210 = vst.msk [vmem:[%s324_s3 + $0x28] sm:$0xff] %vm206_vm1, %v201_v29  ;;  %v125_v32 = vadd.f32 %v124_v30, %v33_v21  ;;  %v196_v33 = vadd.f32 %v195_v31, %v41_v23 }
  0xd0   :  { %v126_v34 = vpop.f32.mrf.mxu0 }
  0xd1   :  { %208 = vst [vmem:[%s324_s3 + $0x18] sm:$0xff] %v125_v32  ;;  %207 = vst.msk [vmem:[%s324_s3 + $0x10] sm:$0xff] %vm206_vm1, %v196_v33  ;;  %v127_v35 = vadd.f32 %v126_v34, %v37_v22 }
  0xd3   :  { %209 = vst [vmem:[%s324_s3 + $0x20] sm:$0xff] %v127_v35 }

// kernel: model_forward.13
= control target key start
LH: loop header
LB: loop body
LE: loop exit
PB: predicated region body
PF: predicated region fallthrough
CT: control target
= control target key end

     0   :  { %v140_v3 = vmov 0.0   ;;  %vm36_vm0 = vcmask 261120   ;;  %v26_v11 = vlaneseq  ;;  %vm121_vm1 = vcmask 523264   ;;  %s206_s1 = inlined_call_operand.vmem [shape: f32[32,192], index: 1, kind: input, shape index: {}]   ;;  %s207_s0 = inlined_call_operand.vmem [shape: f32[16,32], index: 0, kind: input, shape index: {}]   ;;  %s208_s2 = inlined_call_operand.vmem [shape: f32[1,192], index: 2, kind: input, shape index: {}]   ;;  %s209_s3 = inlined_call_operand.vmem [shape: f32[16,192], index: 3, kind: output, shape index: {}]  }
   0x1   :  { %v23_v0 = vld [vmem:[%s206_s1 + $0x38] sm:$0xff]  ;;  %v22_v1 = vld [vmem:[%s206_s1 + $0x30] sm:$0xff]  ;;  %v21_v2 = vld [vmem:[%s206_s1 + $0x28] sm:$0xff]  ;;  %107 = vmatprep.mubr.f32.mxu0 %v140_v3  ;;  %113 = vmatprep.mubr.f32.mxu1 %v140_v3 }
   0x2   :  { %67 = vmatprep.subr.mxu0 %v23_v0  ;;  %131 = vmatprep.subr.mxu1 %v23_v0  ;;  %v20_v4 = vld [vmem:[%s206_s1 + $0x20] sm:$0xff]  ;;  %v19_v5 = vld [vmem:[%s206_s1 + $0x18] sm:$0xff]  ;;  %v18_v6 = vld [vmem:[%s206_s1 + $0x10] sm:$0xff]  ;;  %v27_v12 = vshrl.u32 %v26_v11, 7 }
   0x3   :  { %68 = vmatpush1.msra.mxu0 %v22_v1  ;;  %135 = vmatpush1.msra.mxu1 %v22_v1  ;;  %v17_v7 = vld [vmem:[%s206_s1 + $0x8] sm:$0xff]  ;;  %v16_v8 = vld [vmem:[%s206_s1] sm:$0xff] }
   0x4   :  { %69 = vmatprep.subr.mxu0 %v21_v2  ;;  %132 = vmatprep.subr.mxu1 %v21_v2  ;;  %v14_v9 = vld [vmem:[%s207_s0] sm:$0xff]  ;;  %v15_v10 = vld [vmem:[%s207_s0 + $0x8] sm:$0xff]  ;;  %v28_v13 = vsub.s32 0, %v27_v12  ;;  %v32_v15 = vsub.s32 1, %v27_v12 }
   0x5   :  { %70 = vmatpush1.msra.mxu0 %v20_v4  ;;  %136 = vmatpush1.msra.mxu1 %v20_v4  ;;  %v24_v14 = vld [vmem:[%s208_s2] sm:$0x3] }
   0x6   :  { %71 = vmatprep.subr.mxu0 %v19_v5  ;;  %133 = vmatprep.subr.mxu1 %v19_v5  ;;  %v29_v16 = vrot.slane %v24_v14, %v28_v13  ;;  %v33_v17 = vrot.slane %v24_v14, %v32_v15 }
   0x7   :  { %72 = vmatpush1.msra.mxu0 %v18_v6  ;;  %137 = vmatpush1.msra.mxu1 %v18_v6 }
   0x8   :  { %73 = vmatprep.subr.mxu0 %v17_v7  ;;  %134 = vmatprep.subr.mxu1 %v17_v7 }
   0x9   :  { %74 = vmatpush1.msra.mxu0 %v16_v8  ;;  %138 = vmatpush1.msra.mxu1 %v16_v8 }
   0xa   :  { %129 = vmatmul.mubr.msk.f32.vlgmr.msra.gmra.mxu0 %vm36_vm0, %v14_v9  ;;  %130 = vmatmul.mubr.msk.f32.vlgmr.msra.gmra.mxu1 %vm36_vm0, %v15_v10 }
  0xca   :  { %v109_v18 = vpop.f32.mrf.mxu0  ;;  %v115_v19 = vpop.f32.mrf.mxu1 }
  0xcb   :  { %v110_v20 = vadd.f32 %v109_v18, %v29_v16  ;;  %v116_v21 = vadd.f32 %v115_v19, %v29_v16 }
  0xcc   :  { %v111_v22 = vpop.f32.mrf.mxu0  ;;  %v117_v23 = vpop.f32.mrf.mxu1 }
  0xcd   :  { %120 = vst [vmem:[%s209_s3] sm:$0xff] %v110_v20  ;;  %123 = vst [vmem:[%s209_s3 + $0x10] sm:$0xff] %v116_v21  ;;  %v112_v24 = vadd.f32 %v111_v22, %v33_v17  ;;  %v118_v25 = vadd.f32 %v117_v23, %v33_v17 }
  0xcf   :  { %122 = vst.msk [vmem:[%s209_s3 + $0x8] sm:$0xff] %vm121_vm1, %v112_v24  ;;  %124 = vst.msk [vmem:[%s209_s3 + $0x18] sm:$0xff] %vm121_vm1, %v118_v25 }

// kernel: model_forward.14
= control target key start
LH: loop header
LB: loop body
LE: loop exit
PB: predicated region body
PF: predicated region fallthrough
CT: control target
= control target key end

     0   :  { %v119_v3 = vmov 0.0   ;;  %vm35_vm0 = vcmask 261120   ;;  %v25_v10 = vlaneseq  ;;  %vm111_vm1 = vcmask 523264   ;;  %s176_s1 = inlined_call_operand.vmem [shape: f32[32,192], index: 1, kind: input, shape index: {}]   ;;  %s177_s0 = inlined_call_operand.vmem [shape: f32[8,32], index: 0, kind: input, shape index: {}]   ;;  %s178_s2 = inlined_call_operand.vmem [shape: f32[1,192], index: 2, kind: input, shape index: {}]   ;;  %s179_s3 = inlined_call_operand.vmem [shape: f32[8,192], index: 3, kind: output, shape index: {}]  }
   0x1   :  { %v22_v0 = vld [vmem:[%s176_s1 + $0x38] sm:$0xff]  ;;  %v21_v1 = vld [vmem:[%s176_s1 + $0x30] sm:$0xff]  ;;  %v20_v2 = vld [vmem:[%s176_s1 + $0x28] sm:$0xff]  ;;  %103 = vmatprep.mubr.f32.mxu0 %v119_v3 }
   0x2   :  { %63 = vmatprep.subr.mxu0 %v22_v0  ;;  %v19_v4 = vld [vmem:[%s176_s1 + $0x20] sm:$0xff]  ;;  %v18_v5 = vld [vmem:[%s176_s1 + $0x18] sm:$0xff]  ;;  %v17_v6 = vld [vmem:[%s176_s1 + $0x10] sm:$0xff]  ;;  %v26_v11 = vshrl.u32 %v25_v10, 7 }
   0x3   :  { %64 = vmatpush1.msra.mxu0 %v21_v1  ;;  %v16_v7 = vld [vmem:[%s176_s1 + $0x8] sm:$0xff]  ;;  %v15_v8 = vld [vmem:[%s176_s1] sm:$0xff] }
   0x4   :  { %65 = vmatprep.subr.mxu0 %v20_v2  ;;  %v14_v9 = vld [vmem:[%s177_s0] sm:$0xff]  ;;  %v27_v12 = vsub.s32 0, %v26_v11  ;;  %v31_v14 = vsub.s32 1, %v26_v11 }
   0x5   :  { %66 = vmatpush1.msra.mxu0 %v19_v4  ;;  %v23_v13 = vld [vmem:[%s178_s2] sm:$0x3] }
   0x6   :  { %67 = vmatprep.subr.mxu0 %v18_v5  ;;  %v28_v15 = vrot.slane %v23_v13, %v27_v12  ;;  %v32_v16 = vrot.slane %v23_v13, %v31_v14 }
   0x7   :  { %68 = vmatpush1.msra.mxu0 %v17_v6 }
   0x8   :  { %69 = vmatprep.subr.mxu0 %v16_v7 }
   0x9   :  { %70 = vmatpush1.msra.mxu0 %v15_v8 }
   0xa   :  { %117 = vmatmul.mubr.msk.f32.vlgmr.msra.gmra.mxu0 %vm35_vm0, %v14_v9 }
  0xca   :  { %v105_v17 = vpop.f32.mrf.mxu0 }
  0xcb   :  { %v106_v18 = vadd.f32 %v105_v17, %v28_v15 }
  0xcc   :  { %v107_v19 = vpop.f32.mrf.mxu0 }
  0xcd   :  { %110 = vst [vmem:[%s179_s3] sm:$0xff] %v106_v18  ;;  %v108_v20 = vadd.f32 %v107_v19, %v32_v16 }
  0xcf   :  { %112 = vst.msk [vmem:[%s179_s3 + $0x8] sm:$0xff] %vm111_vm1, %v108_v20 }

// kernel: model_forward.18
= control target key start
LH: loop header
LB: loop body
LE: loop exit
PB: predicated region body
PF: predicated region fallthrough
CT: control target
= control target key end

     0   :  { %vm37_vm0 = vcmask 523264   ;;  %s293_s1 = inlined_call_operand.vmem [shape: f32[64,64], index: 1, kind: input, shape index: {}]   ;;  %s294_s0 = inlined_call_operand.vmem [shape: f32[16,64], index: 0, kind: input, shape index: {}]   ;;  %s295_s2 = inlined_call_operand.vmem [shape: f32[1,64], index: 2, kind: input, shape index: {}]   ;;  %s296_s3 = inlined_call_operand.vmem [shape: f32[1,64], index: 3, kind: input, shape index: {}]   ;;  %s297_s4 = inlined_call_operand.vmem [shape: f32[1,64], index: 4, kind: input, shape index: {}]   ;;  %s298_s5 = inlined_call_operand.vmem [shape: f32[16,64], index: 5, kind: output, shape index: {}]  }
   0x1   :  { %v29_v0 = vld [vmem:[%s293_s1 + $0x38] sm:$0xff]  ;;  %v28_v1 = vld [vmem:[%s293_s1 + $0x30] sm:$0xff]  ;;  %v27_v2 = vld [vmem:[%s293_s1 + $0x28] sm:$0xff] }
   0x2   :  { %189 = vmatprep.subr.mxu0 %v29_v0  ;;  %v20_v3 = vld [vmem:[%s294_s0] sm:$0xff]  ;;  %v25_v5 = vld [vmem:[%s293_s1 + $0x18] sm:$0xff]  ;;  %v24_v6 = vld [vmem:[%s293_s1 + $0x10] sm:$0xff] }
   0x3   :  { %190 = vmatpush3.msra.mxu0 %v29_v0  ;;  %205 = vmatprep.mubr.msk.f32.mxu0 %vm37_vm0, %v20_v3  ;;  %v26_v4 = vld [vmem:[%s293_s1 + $0x20] sm:$0xff]  ;;  %v23_v7 = vld [vmem:[%s293_s1 + $0x8] sm:$0xff] }
   0x4   :  { %191 = vmatprep.subr.mxu0 %v28_v1  ;;  %v22_v8 = vld [vmem:[%s293_s1] sm:$0xff]  ;;  %v21_v9 = vld [vmem:[%s294_s0 + $0x8] sm:$0xff] }
   0x5   :  { %192 = vmatpush3.msra.mxu0 %v28_v1  ;;  %v174_v10 = vld [vmem:[%s295_s2] ss:$0 sm:$0xff] }
   0x6   :  { %193 = vmatprep.subr.mxu0 %v27_v2  ;;  %v177_v41 = vld [vmem:[%s296_s3] ss:$0 sm:$0xff] }
   0x7   :  { %194 = vmatpush3.msra.mxu0 %v27_v2  ;;  %v178_v44 = vld [vmem:[%s297_s4] ss:$0 sm:$0xff] }
   0x8   :  { %195 = vmatprep.subr.mxu0 %v26_v4 }
   0x9   :  { %196 = vmatpush3.msra.mxu0 %v26_v4 }
   0xa   :  { %197 = vmatprep.subr.mxu0 %v25_v5 }
   0xb   :  { %198 = vmatpush3.msra.mxu0 %v25_v5 }
   0xc   :  { %199 = vmatprep.subr.mxu0 %v24_v6 }
   0xd   :  { %200 = vmatpush3.msra.mxu0 %v24_v6 }
   0xe   :  { %201 = vmatprep.subr.mxu0 %v23_v7 }
   0xf   :  { %202 = vmatpush3.msra.mxu0 %v23_v7 }
  0x10   :  { %203 = vmatprep.subr.mxu0 %v22_v8 }
  0x11   :  { %204 = vmatpush3.msra.mxu0 %v22_v8 }
  0x12   :  { %206 = vmatmul.mubr.msk.f32.vlgmr.msra.gmra.mxu0 %vm37_vm0, %v21_v9 }
  0xd2   :  { %v207_v11 = vpop.f32.mrf.mxu0 }
  0xd3   :  { %v116_v12 = vadd.f32 %v207_v11, %v174_v10 }
  0xd4   :  { %v110_v13 = vpop.f32.mrf.mxu0 }
  0xd5   :  { %v111_v14 = vadd.f32 %v174_v10, %v110_v13  ;;  %v122_v15 = vsel %vm37_vm0, %v116_v12, 0.0 }
  0xd7   :  { %v121_v16 = vsel %vm37_vm0, %v111_v14, 0.0 }
  0xd8   :  { %v123_v17 = vadd.f32 %v122_v15, %v121_v16 }
  0xda   :  { %v124_v18 = vrot.slane %v123_v17, 4 }
  0xdc   :  { %v125_v19 = vadd.f32 %v124_v18, %v123_v17 }
  0xde   :  { %v126_v20 = vrot.slane %v125_v19, 2 }
  0xe0   :  { %v127_v21 = vadd.f32 %v126_v20, %v125_v19 }
  0xe2   :  { %v128_v22 = vrot.slane %v127_v21, 1 }
  0xe4   :  { %v129_v23 = vadd.f32 %v128_v22, %v127_v21 }
  0xe6   :  { %v131_v24 = vmul.f32 0.0625, %v129_v23 }
  0xe8   :  { %v132_v25 = vsub.f32 %v111_v14, %v131_v24  ;;  %v133_v26 = vsub.f32 %v116_v12, %v131_v24 }
  0xea   :  { %v134_v27 = vmul.f32 %v132_v25, %v132_v25  ;;  %v135_v28 = vmul.f32 %v133_v26, %v133_v26 }
  0xec   :  { %v136_v29 = vsel %vm37_vm0, %v134_v27, 0.0  ;;  %v137_v30 = vsel %vm37_vm0, %v135_v28, 0.0 }
  0xed   :  { %v138_v31 = vadd.f32 %v137_v30, %v136_v29 }
  0xef   :  { %v139_v32 = vrot.slane %v138_v31, 4 }
  0xf1   :  { %v140_v33 = vadd.f32 %v139_v32, %v138_v31 }
  0xf3   :  { %v141_v34 = vrot.slane %v140_v33, 2 }
  0xf5   :  { %v142_v35 = vadd.f32 %v141_v34, %v140_v33 }
  0xf7   :  { %v143_v36 = vrot.slane %v142_v35, 1 }
  0xf9   :  { %v144_v37 = vadd.f32 %v143_v36, %v142_v35 }
  0xfb   :  { %v145_v38 = vmul.f32 0.0625, %v144_v37 }
  0xfd   :  { %v146_v39 = vadd.f32 1e-05, %v145_v38 }
  0xff   :  { %208 = vrsqrt.f32 %v146_v39 }
 0x10c   :  { %v209_v40 = vpop.eup %208 }
 0x10d   :  { %v148_v42 = vmul.f32 %v209_v40, %v132_v25  ;;  %v149_v43 = vmul.f32 %v209_v40, %v133_v26 }
 0x10f   :  { %v156_v45 = vmul.f32 %v177_v41, %v148_v42  ;;  %v157_v46 = vmul.f32 %v177_v41, %v149_v43 }
 0x111   :  { %v164_v47 = vadd.f32 %v178_v44, %v156_v45  ;;  %v165_v48 = vadd.f32 %v178_v44, %v157_v46 }
 0x113   :  { %v166_v49 = vmax.f32 %v164_v47, 0.0  ;;  %v167_v50 = vmax.f32 %v165_v48, 0.0 }
 0x115   :  { %168 = vst.msk [vmem:[%s298_s5] sm:$0xff] %vm37_vm0, %v166_v49  ;;  %169 = vst.msk [vmem:[%s298_s5 + $0x8] sm:$0xff] %vm37_vm0, %v167_v50 }

// kernel: model_forward.21
= control target key start
LH: loop header
LB: loop body
LE: loop exit
PB: predicated region body
PF: predicated region fallthrough
CT: control target
= control target key end

     0   :  { %v260_v3 = vmov 0.0   ;;  %vm57_vm0 = vcmask 523264   ;;  %v42_v27 = vlaneseq  ;;  %s386_s1 = inlined_call_operand.vmem [shape: f32[64,320], index: 1, kind: input, shape index: {}]   ;;  %s387_s0 = inlined_call_operand.vmem [shape: f32[16,64], index: 0, kind: input, shape index: {}]   ;;  %s388_s2 = inlined_call_operand.vmem [shape: f32[1,320], index: 2, kind: input, shape index: {}]   ;;  %s389_s3 = inlined_call_operand.vmem [shape: f32[16,320], index: 3, kind: output, shape index: {}]  }
   0x1   :  { %v38_v0 = vld [vmem:[%s386_s1 + $0xb0] sm:$0xff]  ;;  %v37_v1 = vld [vmem:[%s386_s1 + $0xa8] sm:$0xff]  ;;  %v35_v2 = vld [vmem:[%s386_s1 + $0x98] sm:$0xff]  ;;  %128 = vmatprep.mubr.f32.mxu0 %v260_v3 }
   0x2   :  { %80 = vmatprep.subr.mxu0 %v38_v0  ;;  %v39_v4 = vld [vmem:[%s386_s1 + $0xb8] sm:$0xff]  ;;  %v34_v5 = vld [vmem:[%s386_s1 + $0x90] sm:$0xff]  ;;  %v32_v6 = vld [vmem:[%s386_s1 + $0x80] sm:$0xff]  ;;  %v43_v28 = vshrl.u32 %v42_v27, 7 }
   0x3   :  { %81 = vmatpush1.msra.mxu0 %v37_v1  ;;  %240 = vmatprep.subr.mxu1 %v39_v4  ;;  %v36_v7 = vld [vmem:[%s386_s1 + $0xa0] sm:$0xff]  ;;  %v31_v8 = vld [vmem:[%s386_s1 + $0x78] sm:$0xff]  ;;  %v33_v9 = vld [vmem:[%s386_s1 + $0x88] sm:$0xff] }
   0x4   :  { %82 = vmatprep.subr.mxu0 %v35_v2  ;;  %241 = vmatpush3.msra.mxu1 %v39_v4  ;;  %v29_v10 = vld [vmem:[%s386_s1 + $0x68] sm:$0xff]  ;;  %v28_v11 = vld [vmem:[%s386_s1 + $0x60] sm:$0xff]  ;;  %v30_v12 = vld [vmem:[%s386_s1 + $0x70] sm:$0xff]  ;;  %v44_v29 = vsub.s32 0, %v43_v28  ;;  %v48_v31 = vsub.s32 1, %v43_v28  ;;  %v52_v32 = vsub.s32 2, %v43_v28 }
   0x5   :  { %83 = vmatpush1.msra.mxu0 %v34_v5  ;;  %242 = vmatprep.subr.mxu1 %v36_v7  ;;  %v26_v13 = vld [vmem:[%s386_s1 + $0x50] sm:$0xff]  ;;  %v25_v14 = vld [vmem:[%s386_s1 + $0x48] sm:$0xff]  ;;  %v27_v15 = vld [vmem:[%s386_s1 + $0x58] sm:$0xff] }
   0x6   :  { %84 = vmatprep.subr.mxu0 %v32_v6  ;;  %243 = vmatpush3.msra.mxu1 %v36_v7  ;;  %v23_v16 = vld [vmem:[%s386_s1 + $0x38] sm:$0xff]  ;;  %v22_v17 = vld [vmem:[%s386_s1 + $0x30] sm:$0xff]  ;;  %v24_v18 = vld [vmem:[%s386_s1 + $0x40] sm:$0xff] }
   0x7   :  { %85 = vmatpush1.msra.mxu0 %v31_v8  ;;  %244 = vmatprep.subr.mxu1 %v33_v9  ;;  %v20_v19 = vld [vmem:[%s386_s1 + $0x20] sm:$0xff]  ;;  %v19_v20 = vld [vmem:[%s386_s1 + $0x18] sm:$0xff]  ;;  %v21_v21 = vld [vmem:[%s386_s1 + $0x28] sm:$0xff] }
   0x8   :  { %86 = vmatprep.subr.mxu0 %v29_v10  ;;  %245 = vmatpush3.msra.mxu1 %v33_v9  ;;  %v17_v22 = vld [vmem:[%s386_s1 + $0x8] sm:$0xff]  ;;  %v16_v23 = vld [vmem:[%s386_s1] sm:$0xff]  ;;  %v18_v24 = vld [vmem:[%s386_s1 + $0x10] sm:$0xff] }
   0x9   :  { %87 = vmatpush1.msra.mxu0 %v28_v11  ;;  %246 = vmatprep.subr.mxu1 %v30_v12  ;;  %v14_v25 = vld [vmem:[%s387_s0] sm:$0xff]  ;;  %v15_v26 = vld [vmem:[%s387_s0 + $0x8] sm:$0xff] }
   0xa   :  { %88 = vmatprep.subr.mxu0 %v26_v13  ;;  %247 = vmatpush3.msra.mxu1 %v30_v12  ;;  %v40_v30 = vld [vmem:[%s388_s2] sm:$0x7] }
   0xb   :  { %89 = vmatpush1.msra.mxu0 %v25_v14  ;;  %248 = vmatprep.subr.mxu1 %v27_v15  ;;  %v45_v33 = vrot.slane %v40_v30, %v44_v29  ;;  %v49_v34 = vrot.slane %v40_v30, %v48_v31  ;;  %v53_v35 = vrot.slane %v40_v30, %v52_v32 }
   0xc   :  { %90 = vmatprep.subr.mxu0 %v23_v16  ;;  %249 = vmatpush3.msra.mxu1 %v27_v15 }
   0xd   :  { %91 = vmatpush1.msra.mxu0 %v22_v17  ;;  %250 = vmatprep.subr.mxu1 %v24_v18 }
   0xe   :  { %92 = vmatprep.subr.mxu0 %v20_v19  ;;  %251 = vmatpush3.msra.mxu1 %v24_v18 }
   0xf   :  { %93 = vmatpush1.msra.mxu0 %v19_v20  ;;  %252 = vmatprep.subr.mxu1 %v21_v21 }
  0x10   :  { %94 = vmatprep.subr.mxu0 %v17_v22  ;;  %253 = vmatpush3.msra.mxu1 %v21_v21 }
  0x11   :  { %95 = vmatpush1.msra.mxu0 %v16_v23  ;;  %254 = vmatprep.subr.mxu1 %v18_v24 }
  0x12   :  { %226 = vmatmul.mubr.msk.f32.vlgmr.msra.gmra.mxu0 %vm57_vm0, %v14_v25  ;;  %255 = vmatpush3.msra.mxu1 %v18_v24 }
  0x13   :  { %256 = vmatprep.mubr.msk.f32.mxu1 %vm57_vm0, %v14_v25  ;;  %134 = vmatprep.mubr.f32.mxu0 %v260_v3 }
  0x14   :  { %257 = vmatmul.mubr.msk.f32.vlgmr.msra.gmra.mxu1 %vm57_vm0, %v15_v26 }
  0x16   :  { %227 = vmatmul.mubr.msk.f32.gmra.mxu0 %vm57_vm0, %v15_v26 }
  0xd2   :  { %v130_v36 = vpop.f32.mrf.mxu0 }
  0xd3   :  { %v131_v37 = vadd.f32 %v130_v36, %v45_v33 }
  0xd4   :  { %v132_v38 = vpop.f32.mrf.mxu0  ;;  %v258_v39 = vpop.f32.mrf.mxu1 }
  0xd5   :  { %216 = vst [vmem:[%s389_s3] sm:$0xff] %v131_v37  ;;  %v133_v40 = vadd.f32 %v132_v38, %v49_v34  ;;  %v213_v41 = vadd.f32 %v258_v39, %v53_v35 }
  0xd6   :  { %v136_v42 = vpop.f32.mrf.mxu0  ;;  %v207_v43 = vpop.f32.mrf.mxu1 }
  0xd7   :  { %217 = vst [vmem:[%s389_s3 + $0x8] sm:$0xff] %v133_v40  ;;  %221 = vst.msk [vmem:[%s389_s3 + $0x28] sm:$0xff] %vm57_vm0, %v213_v41  ;;  %v137_v44 = vadd.f32 %v136_v42, %v45_v33  ;;  %v208_v45 = vadd.f32 %v207_v43, %v53_v35 }
  0xd8   :  { %v138_v46 = vpop.f32.mrf.mxu0 }
  0xd9   :  { %219 = vst [vmem:[%s389_s3 + $0x18] sm:$0xff] %v137_v44  ;;  %218 = vst.msk [vmem:[%s389_s3 + $0x10] sm:$0xff] %vm57_vm0, %v208_v45  ;;  %v139_v47 = vadd.f32 %v138_v46, %v49_v34 }
  0xdb   :  { %220 = vst [vmem:[%s389_s3 + $0x20] sm:$0xff] %v139_v47 }

// kernel: model_forward.19
= control target key start
LH: loop header
LB: loop body
LE: loop exit
PB: predicated region body
PF: predicated region fallthrough
CT: control target
= control target key end

     0   :  { %v155_v3 = vmov 0.0   ;;  %vm44_vm0 = vcmask 523264   ;;  %v34_v19 = vlaneseq  ;;  %s249_s1 = inlined_call_operand.vmem [shape: f32[64,192], index: 1, kind: input, shape index: {}]   ;;  %s250_s0 = inlined_call_operand.vmem [shape: f32[16,64], index: 0, kind: input, shape index: {}]   ;;  %s251_s2 = inlined_call_operand.vmem [shape: f32[1,192], index: 2, kind: input, shape index: {}]   ;;  %s252_s3 = inlined_call_operand.vmem [shape: f32[16,192], index: 3, kind: output, shape index: {}]  }
   0x1   :  { %v31_v0 = vld [vmem:[%s249_s1 + $0x78] sm:$0xff]  ;;  %v30_v1 = vld [vmem:[%s249_s1 + $0x70] sm:$0xff]  ;;  %v29_v2 = vld [vmem:[%s249_s1 + $0x68] sm:$0xff]  ;;  %115 = vmatprep.mubr.f32.mxu0 %v155_v3  ;;  %121 = vmatprep.mubr.f32.mxu1 %v155_v3 }
   0x2   :  { %67 = vmatprep.subr.mxu0 %v31_v0  ;;  %138 = vmatprep.subr.mxu1 %v31_v0  ;;  %v28_v4 = vld [vmem:[%s249_s1 + $0x60] sm:$0xff]  ;;  %v27_v5 = vld [vmem:[%s249_s1 + $0x58] sm:$0xff]  ;;  %v26_v6 = vld [vmem:[%s249_s1 + $0x50] sm:$0xff]  ;;  %v35_v20 = vshrl.u32 %v34_v19, 7 }
   0x3   :  { %68 = vmatpush1.msra.mxu0 %v30_v1  ;;  %146 = vmatpush1.msra.mxu1 %v30_v1  ;;  %v25_v7 = vld [vmem:[%s249_s1 + $0x48] sm:$0xff]  ;;  %v24_v8 = vld [vmem:[%s249_s1 + $0x40] sm:$0xff]  ;;  %v23_v9 = vld [vmem:[%s249_s1 + $0x38] sm:$0xff] }
   0x4   :  { %69 = vmatprep.subr.mxu0 %v29_v2  ;;  %139 = vmatprep.subr.mxu1 %v29_v2  ;;  %v22_v10 = vld [vmem:[%s249_s1 + $0x30] sm:$0xff]  ;;  %v21_v11 = vld [vmem:[%s249_s1 + $0x28] sm:$0xff]  ;;  %v20_v12 = vld [vmem:[%s249_s1 + $0x20] sm:$0xff]  ;;  %v36_v21 = vsub.s32 0, %v35_v20  ;;  %v40_v23 = vsub.s32 1, %v35_v20 }
   0x5   :  { %70 = vmatpush1.msra.mxu0 %v28_v4  ;;  %147 = vmatpush1.msra.mxu1 %v28_v4  ;;  %v19_v13 = vld [vmem:[%s249_s1 + $0x18] sm:$0xff]  ;;  %v18_v14 = vld [vmem:[%s249_s1 + $0x10] sm:$0xff]  ;;  %v17_v15 = vld [vmem:[%s249_s1 + $0x8] sm:$0xff] }
   0x6   :  { %71 = vmatprep.subr.mxu0 %v27_v5  ;;  %140 = vmatprep.subr.mxu1 %v27_v5  ;;  %v16_v16 = vld [vmem:[%s249_s1] sm:$0xff]  ;;  %v15_v18 = vld [vmem:[%s250_s0 + $0x8] sm:$0xff] }
   0x7   :  { %72 = vmatpush1.msra.mxu0 %v26_v6  ;;  %148 = vmatpush1.msra.mxu1 %v26_v6  ;;  %v14_v17 = vld [vmem:[%s250_s0] sm:$0xff] }
   0x8   :  { %73 = vmatprep.subr.mxu0 %v25_v7  ;;  %141 = vmatprep.subr.mxu1 %v25_v7  ;;  %v32_v22 = vld [vmem:[%s251_s2] sm:$0x3] }
   0x9   :  { %74 = vmatpush1.msra.mxu0 %v24_v8  ;;  %149 = vmatpush1.msra.mxu1 %v24_v8  ;;  %v37_v24 = vrot.slane %v32_v22, %v36_v21  ;;  %v41_v25 = vrot.slane %v32_v22, %v40_v23 }
   0xa   :  { %75 = vmatprep.subr.mxu0 %v23_v9  ;;  %142 = vmatprep.subr.mxu1 %v23_v9 }
   0xb   :  { %76 = vmatpush1.msra.mxu0 %v22_v10  ;;  %150 = vmatpush1.msra.mxu1 %v22_v10 }
   0xc   :  { %77 = vmatprep.subr.mxu0 %v21_v11  ;;  %143 = vmatprep.subr.mxu1 %v21_v11 }
   0xd   :  { %78 = vmatpush1.msra.mxu0 %v20_v12  ;;  %151 = vmatpush1.msra.mxu1 %v20_v12 }
   0xe   :  { %79 = vmatprep.subr.mxu0 %v19_v13  ;;  %144 = vmatprep.subr.mxu1 %v19_v13 }
   0xf   :  { %80 = vmatpush1.msra.mxu0 %v18_v14  ;;  %152 = vmatpush1.msra.mxu1 %v18_v14 }
  0x10   :  { %81 = vmatprep.subr.mxu0 %v17_v15  ;;  %145 = vmatprep.subr.mxu1 %v17_v15 }
  0x11   :  { %82 = vmatpush1.msra.mxu0 %v16_v16  ;;  %153 = vmatpush1.msra.mxu1 %v16_v16 }
  0x12   :  { %136 = vmatmul.mubr.msk.f32.vlgmr.msra.gmra.mxu0 %vm44_vm0, %v14_v17  ;;  %137 = vmatmul.mubr.msk.f32.vlgmr.msra.gmra.mxu1 %vm44_vm0, %v15_v18 }
  0xd2   :  { %v117_v26 = vpop.f32.mrf.mxu0  ;;  %v123_v27 = vpop.f32.mrf.mxu1 }
  0xd3   :  { %v118_v28 = vadd.f32 %v117_v26, %v37_v24  ;;  %v124_v29 = vadd.f32 %v123_v27, %v37_v24 }
  0xd4   :  { %v119_v30 = vpop.f32.mrf.mxu0  ;;  %v125_v31 = vpop.f32.mrf.mxu1 }
  0xd5   :  { %128 = vst [vmem:[%s252_s3] sm:$0xff] %v118_v28  ;;  %130 = vst [vmem:[%s252_s3 + $0x10] sm:$0xff] %v124_v29  ;;  %v120_v32 = vadd.f32 %v119_v30, %v41_v25  ;;  %v126_v33 = vadd.f32 %v125_v31, %v41_v25 }
  0xd7   :  { %129 = vst.msk [vmem:[%s252_s3 + $0x8] sm:$0xff] %vm44_vm0, %v120_v32  ;;  %131 = vst.msk [vmem:[%s252_s3 + $0x18] sm:$0xff] %vm44_vm0, %v126_v33 }

// kernel: model_forward.22
= control target key start
LH: loop header
LB: loop body
LE: loop exit
PB: predicated region body
PF: predicated region fallthrough
CT: control target
= control target key end

     0   :  { %vm43_vm0 = vcmask 523264   ;;  %v127_v10 = vlaneseq  ;;  %s340_s2 = inlined_call_operand.vmem [shape: f32[64,64], index: 2, kind: input, shape index: {}]   ;;  %s341_s0 = inlined_call_operand.vmem [shape: f32[16,64], index: 0, kind: input, shape index: {}]   ;;  %s342_s4 = inlined_call_operand.vmem [shape: f32[1,64], index: 4, kind: input, shape index: {}]   ;;  %s343_s1 = inlined_call_operand.vmem [shape: f32[16,64], index: 1, kind: input, shape index: {}]   ;;  %s344_s3 = inlined_call_operand.vmem [shape: f32[1,64], index: 3, kind: input, shape index: {}]   ;;  %s345_s5 = inlined_call_operand.vmem [shape: f32[1,64], index: 5, kind: input, shape index: {}]   ;;  %s346_s6 = inlined_call_operand.vmem [shape: f32[1,64], index: 6, kind: input, shape index: {}]   ;;  %s347_s7 = inlined_call_operand.vmem [shape: f32[16,64], index: 7, kind: output, shape index: {}]  }
   0x1   :  { %v35_v0 = vld [vmem:[%s340_s2 + $0x38] sm:$0xff]  ;;  %v34_v1 = vld [vmem:[%s340_s2 + $0x30] sm:$0xff]  ;;  %v33_v2 = vld [vmem:[%s340_s2 + $0x28] sm:$0xff] }
   0x2   :  { %217 = vmatprep.subr.mxu0 %v35_v0  ;;  %v26_v3 = vld [vmem:[%s341_s0] sm:$0xff]  ;;  %v31_v5 = vld [vmem:[%s340_s2 + $0x18] sm:$0xff]  ;;  %v30_v6 = vld [vmem:[%s340_s2 + $0x10] sm:$0xff]  ;;  %v128_v11 = vshrl.u32 %v127_v10, 7 }
   0x3   :  { %218 = vmatpush3.msra.mxu0 %v35_v0  ;;  %233 = vmatprep.mubr.msk.f32.mxu0 %vm43_vm0, %v26_v3  ;;  %v32_v4 = vld [vmem:[%s340_s2 + $0x20] sm:$0xff]  ;;  %v29_v7 = vld [vmem:[%s340_s2 + $0x8] sm:$0xff] }
   0x4   :  { %219 = vmatprep.subr.mxu0 %v34_v1  ;;  %v28_v8 = vld [vmem:[%s340_s2] sm:$0xff]  ;;  %v27_v9 = vld [vmem:[%s341_s0 + $0x8] sm:$0xff]  ;;  %v129_v13 = vsub.s32 0, %v128_v11 }
   0x5   :  { %220 = vmatpush3.msra.mxu0 %v34_v1  ;;  %v125_v12 = vld [vmem:[%s342_s4] sm:$0x1]  ;;  %v136_v17 = vld [vmem:[%s343_s1 + $0x8] sm:$0xff] }
   0x6   :  { %221 = vmatprep.subr.mxu0 %v33_v2  ;;  %v134_v14 = vsub.f32 1.0, %v125_v12  ;;  %v202_v16 = vld [vmem:[%s344_s3] ss:$0 sm:$0xff]  ;;  %v130_v18 = vrot.slane %v125_v12, %v129_v13 }
   0x7   :  { %222 = vmatpush3.msra.mxu0 %v33_v2  ;;  %v135_v20 = vld [vmem:[%s343_s1] sm:$0xff] }
   0x8   :  { %223 = vmatprep.subr.mxu0 %v32_v4  ;;  %v141_v15 = vrot.slane %v134_v14, %v129_v13  ;;  %v205_v56 = vld [vmem:[%s345_s5] ss:$0 sm:$0xff] }
   0x9   :  { %224 = vmatpush3.msra.mxu0 %v32_v4  ;;  %v206_v59 = vld [vmem:[%s346_s6] ss:$0 sm:$0xff] }
   0xa   :  { %225 = vmatprep.subr.mxu0 %v31_v5  ;;  %v144_v22 = vmul.f32 %v141_v15, %v136_v17  ;;  %v143_v26 = vmul.f32 %v141_v15, %v135_v20 }
   0xb   :  { %226 = vmatpush3.msra.mxu0 %v31_v5 }
   0xc   :  { %227 = vmatprep.subr.mxu0 %v30_v6 }
   0xd   :  { %228 = vmatpush3.msra.mxu0 %v30_v6 }
   0xe   :  { %229 = vmatprep.subr.mxu0 %v29_v7 }
   0xf   :  { %230 = vmatpush3.msra.mxu0 %v29_v7 }
  0x10   :  { %231 = vmatprep.subr.mxu0 %v28_v8 }
  0x11   :  { %232 = vmatpush3.msra.mxu0 %v28_v8 }
  0x12   :  { %234 = vmatmul.mubr.msk.f32.vlgmr.msra.gmra.mxu0 %vm43_vm0, %v27_v9 }
  0xd2   :  { %v235_v19 = vpop.f32.mrf.mxu0 }
  0xd3   :  { %v122_v21 = vadd.f32 %v235_v19, %v202_v16 }
  0xd4   :  { %v116_v23 = vpop.f32.mrf.mxu0 }
  0xd5   :  { %v133_v24 = vmul.f32 %v130_v18, %v122_v21  ;;  %v117_v25 = vadd.f32 %v202_v16, %v116_v23 }
  0xd7   :  { %v146_v27 = vadd.f32 %v144_v22, %v133_v24  ;;  %v132_v28 = vmul.f32 %v130_v18, %v117_v25 }
  0xd9   :  { %v145_v29 = vadd.f32 %v143_v26, %v132_v28  ;;  %v150_v30 = vsel %vm43_vm0, %v146_v27, 0.0 }
  0xdb   :  { %v149_v31 = vsel %vm43_vm0, %v145_v29, 0.0 }
  0xdc   :  { %v151_v32 = vadd.f32 %v150_v30, %v149_v31 }
  0xde   :  { %v152_v33 = vrot.slane %v151_v32, 4 }
  0xe0   :  { %v153_v34 = vadd.f32 %v152_v33, %v151_v32 }
  0xe2   :  { %v154_v35 = vrot.slane %v153_v34, 2 }
  0xe4   :  { %v155_v36 = vadd.f32 %v154_v35, %v153_v34 }
  0xe6   :  { %v156_v37 = vrot.slane %v155_v36, 1 }
  0xe8   :  { %v157_v38 = vadd.f32 %v156_v37, %v155_v36 }
  0xea   :  { %v159_v39 = vmul.f32 0.0625, %v157_v38 }
  0xec   :  { %v160_v40 = vsub.f32 %v145_v29, %v159_v39  ;;  %v161_v41 = vsub.f32 %v146_v27, %v159_v39 }
  0xee   :  { %v162_v42 = vmul.f32 %v160_v40, %v160_v40  ;;  %v163_v43 = vmul.f32 %v161_v41, %v161_v41 }
  0xf0   :  { %v164_v44 = vsel %vm43_vm0, %v162_v42, 0.0  ;;  %v165_v45 = vsel %vm43_vm0, %v163_v43, 0.0 }
  0xf1   :  { %v166_v46 = vadd.f32 %v165_v45, %v164_v44 }
  0xf3   :  { %v167_v47 = vrot.slane %v166_v46, 4 }
  0xf5   :  { %v168_v48 = vadd.f32 %v167_v47, %v166_v46 }
  0xf7   :  { %v169_v49 = vrot.slane %v168_v48, 2 }
  0xf9   :  { %v170_v50 = vadd.f32 %v169_v49, %v168_v48 }
  0xfb   :  { %v171_v51 = vrot.slane %v170_v50, 1 }
  0xfd   :  { %v172_v52 = vadd.f32 %v171_v51, %v170_v50 }
  0xff   :  { %v173_v53 = vmul.f32 0.0625, %v172_v52 }
 0x101   :  { %v174_v54 = vadd.f32 1e-05, %v173_v53 }
 0x103   :  { %236 = vrsqrt.f32 %v174_v54 }
 0x110   :  { %v237_v55 = vpop.eup %236 }
 0x111   :  { %v176_v57 = vmul.f32 %v237_v55, %v160_v40  ;;  %v177_v58 = vmul.f32 %v237_v55, %v161_v41 }
 0x113   :  { %v184_v60 = vmul.f32 %v205_v56, %v176_v57  ;;  %v185_v61 = vmul.f32 %v205_v56, %v177_v58 }
 0x115   :  { %v192_v62 = vadd.f32 %v206_v59, %v184_v60  ;;  %v193_v63 = vadd.f32 %v206_v59, %v185_v61 }
 0x117   :  { %v194_v0 = vmax.f32 %v192_v62, 0.0  ;;  %v195_v1 = vmax.f32 %v193_v63, 0.0 }
 0x119   :  { %196 = vst.msk [vmem:[%s347_s7] sm:$0xff] %vm43_vm0, %v194_v0  ;;  %197 = vst.msk [vmem:[%s347_s7 + $0x8] sm:$0xff] %vm43_vm0, %v195_v1 }

// kernel: model_forward.20
= control target key start
LH: loop header
LB: loop body
LE: loop exit
PB: predicated region body
PF: predicated region fallthrough
CT: control target
= control target key end

     0   :  { %v126_v3 = vmov 0.0   ;;  %vm43_vm0 = vcmask 523264   ;;  %v33_v18 = vlaneseq  ;;  %s209_s1 = inlined_call_operand.vmem [shape: f32[64,192], index: 1, kind: input, shape index: {}]   ;;  %s210_s0 = inlined_call_operand.vmem [shape: f32[8,64], index: 0, kind: input, shape index: {}]   ;;  %s211_s2 = inlined_call_operand.vmem [shape: f32[1,192], index: 2, kind: input, shape index: {}]   ;;  %s212_s3 = inlined_call_operand.vmem [shape: f32[8,192], index: 3, kind: output, shape index: {}]  }
   0x1   :  { %v30_v0 = vld [vmem:[%s209_s1 + $0x78] sm:$0xff]  ;;  %v29_v1 = vld [vmem:[%s209_s1 + $0x70] sm:$0xff]  ;;  %v28_v2 = vld [vmem:[%s209_s1 + $0x68] sm:$0xff]  ;;  %111 = vmatprep.mubr.f32.mxu0 %v126_v3 }
   0x2   :  { %63 = vmatprep.subr.mxu0 %v30_v0  ;;  %v27_v4 = vld [vmem:[%s209_s1 + $0x60] sm:$0xff]  ;;  %v26_v5 = vld [vmem:[%s209_s1 + $0x58] sm:$0xff]  ;;  %v25_v6 = vld [vmem:[%s209_s1 + $0x50] sm:$0xff]  ;;  %v34_v19 = vshrl.u32 %v33_v18, 7 }
   0x3   :  { %64 = vmatpush1.msra.mxu0 %v29_v1  ;;  %v24_v7 = vld [vmem:[%s209_s1 + $0x48] sm:$0xff]  ;;  %v23_v8 = vld [vmem:[%s209_s1 + $0x40] sm:$0xff]  ;;  %v22_v9 = vld [vmem:[%s209_s1 + $0x38] sm:$0xff] }
   0x4   :  { %65 = vmatprep.subr.mxu0 %v28_v2  ;;  %v21_v10 = vld [vmem:[%s209_s1 + $0x30] sm:$0xff]  ;;  %v20_v11 = vld [vmem:[%s209_s1 + $0x28] sm:$0xff]  ;;  %v19_v12 = vld [vmem:[%s209_s1 + $0x20] sm:$0xff]  ;;  %v35_v20 = vsub.s32 0, %v34_v19  ;;  %v39_v22 = vsub.s32 1, %v34_v19 }
   0x5   :  { %66 = vmatpush1.msra.mxu0 %v27_v4  ;;  %v18_v13 = vld [vmem:[%s209_s1 + $0x18] sm:$0xff]  ;;  %v17_v14 = vld [vmem:[%s209_s1 + $0x10] sm:$0xff]  ;;  %v16_v15 = vld [vmem:[%s209_s1 + $0x8] sm:$0xff] }
   0x6   :  { %67 = vmatprep.subr.mxu0 %v26_v5  ;;  %v15_v16 = vld [vmem:[%s209_s1] sm:$0xff] }
   0x7   :  { %68 = vmatpush1.msra.mxu0 %v25_v6  ;;  %v14_v17 = vld [vmem:[%s210_s0] sm:$0xff] }
   0x8   :  { %69 = vmatprep.subr.mxu0 %v24_v7  ;;  %v31_v21 = vld [vmem:[%s211_s2] sm:$0x3] }
   0x9   :  { %70 = vmatpush1.msra.mxu0 %v23_v8  ;;  %v36_v23 = vrot.slane %v31_v21, %v35_v20  ;;  %v40_v24 = vrot.slane %v31_v21, %v39_v22 }
   0xa   :  { %71 = vmatprep.subr.mxu0 %v22_v9 }
   0xb   :  { %72 = vmatpush1.msra.mxu0 %v21_v10 }
   0xc   :  { %73 = vmatprep.subr.mxu0 %v20_v11 }
   0xd   :  { %74 = vmatpush1.msra.mxu0 %v19_v12 }
   0xe   :  { %75 = vmatprep.subr.mxu0 %v18_v13 }
   0xf   :  { %76 = vmatpush1.msra.mxu0 %v17_v14 }
  0x10   :  { %77 = vmatprep.subr.mxu0 %v16_v15 }
  0x11   :  { %78 = vmatpush1.msra.mxu0 %v15_v16 }
  0x12   :  { %124 = vmatmul.mubr.msk.f32.vlgmr.msra.gmra.mxu0 %vm43_vm0, %v14_v17 }
  0xd2   :  { %v113_v25 = vpop.f32.mrf.mxu0 }
  0xd3   :  { %v114_v26 = vadd.f32 %v113_v25, %v36_v23 }
  0xd4   :  { %v115_v27 = vpop.f32.mrf.mxu0 }
  0xd5   :  { %118 = vst [vmem:[%s212_s3] sm:$0xff] %v114_v26  ;;  %v116_v28 = vadd.f32 %v115_v27, %v40_v24 }
  0xd7   :  { %119 = vst.msk [vmem:[%s212_s3 + $0x8] sm:$0xff] %vm43_vm0, %v116_v28 }

// kernel: model_forward.24
= control target key start
LH: loop header
LB: loop body
LE: loop exit
PB: predicated region body
PF: predicated region fallthrough
CT: control target
= control target key end

     0   :  { %vm83_vm0 = vcmask 523264   ;;  %v1547_v18 = vmov 0.0   ;;  %vm167_vm1 = vcmask 261120   ;;  %vm1355_vm2 = vcmask 7168   ;;  %s2430_s1 = inlined_call_operand.vmem [shape: f32[64,32], index: 1, kind: input, shape index: {}]   ;;  %s2431_s0 = inlined_call_operand.vmem [shape: f32[16,64], index: 0, kind: input, shape index: {}]   ;;  %s2432_s4 = inlined_call_operand.vmem [shape: f32[32,512], index: 4, kind: input, shape index: {}]   ;;  %s2433_s2 = inlined_call_operand.vmem [shape: f32[1,32], index: 2, kind: input, shape index: {}]   ;;  %s2434_s3 = inlined_call_operand.vmem [shape: f32[1,32], index: 3, kind: input, shape index: {}]   ;;  %s2435_s8 = inlined_call_operand.vmem [shape: f32[512,256], index: 8, kind: input, shape index: {}]   ;;  %s2436_s5 = inlined_call_operand.vmem [shape: f32[1,512], index: 5, kind: input, shape index: {}]   ;;  %s2437_s6 = inlined_call_operand.vmem [shape: f32[1,512], index: 6, kind: input, shape index: {}]   ;;  %s2438_s7 = inlined_call_operand.vmem [shape: f32[1,512], index: 7, kind: input, shape index: {}]   ;;  %s2439_s12 = inlined_call_operand.vmem [shape: f32[256,128], index: 12, kind: input, shape index: {}]   ;;  %s2440_s9 = inlined_call_operand.vmem [shape: f32[1,256], index: 9, kind: input, shape index: {}]   ;;  %s2441_s10 = inlined_call_operand.vmem [shape: f32[1,256], index: 10, kind: input, shape index: {}]   ;;  %s2442_s11 = inlined_call_operand.vmem [shape: f32[1,256], index: 11, kind: input, shape index: {}]   ;;  %s2443_s16 = inlined_call_operand.vmem [shape: f32[128,64], index: 16, kind: input, shape index: {}]   ;;  %s2444_s13 = inlined_call_operand.vmem [shape: f32[1,128], index: 13, kind: input, shape index: {}]   ;;  %s2445_s14 = inlined_call_operand.vmem [shape: f32[1,128], index: 14, kind: input, shape index: {}]   ;;  %s2446_s15 = inlined_call_operand.vmem [shape: f32[1,128], index: 15, kind: input, shape index: {}]   ;;  %s2447_s20 = inlined_call_operand.vmem [shape: f32[64,1], index: 20, kind: input, shape index: {}]   ;;  %s2448_s21 = inlined_call_operand.<no memory space> [shape: f32[1,1], index: 21, kind: input, shape index: {}]   ;;  %s2449_s17 = inlined_call_operand.vmem [shape: f32[1,64], index: 17, kind: input, shape index: {}]   ;;  %s2450_s18 = inlined_call_operand.vmem [shape: f32[1,64], index: 18, kind: input, shape index: {}]   ;;  %s2451_s19 = inlined_call_operand.vmem [shape: f32[1,64], index: 19, kind: input, shape index: {}]   ;;  %s2452_s22 = inlined_call_operand.vmem [shape: f32[16,1], index: 22, kind: output, shape index: {}]  }
   0x1   :  { %2457 = sst [smem:[#allocation3_spill]] %s2430_s1  ;;  %323 = vmatprep.mubr.f32.mxu1 %v1547_v18 }
   0x2   :  { %2458 = sst [smem:[#allocation4_spill]] %s2431_s0 }
   0x3   :  { %2459 = sst [smem:[#allocation5_spill]] %s2432_s4 }
   0x4   :  { %2460 = sst [smem:[#allocation6_spill]] %s2433_s2 }
   0x5   :  { %2461 = sst [smem:[#allocation7_spill]] %s2434_s3 }
   0x6   :  { %2462 = sst [smem:[#allocation8_spill]] %s2435_s8 }
   0x7   :  { %2463 = sst [smem:[#allocation9_spill]] %s2436_s5 }
   0x8   :  { %s2464_s29 = sld [smem:[#allocation3_spill]] }
   0x9   :  { %s2465_s24 = sld [smem:[#allocation4_spill]] }
   0xa   :  { %s2466_s25 = sld [smem:[#allocation5_spill]] }
   0xb   :  { %s2468_s30 = sld [smem:[#allocation7_spill]] }
   0xc   :  { %s2469_s23 = sld [smem:[#allocation8_spill]] }
   0xd   :  { %s2470_s26 = sld [smem:[#allocation9_spill]] }
   0xe   :  { %v82_v0 = vld [vmem:[%s2464_s29 + $0x38] sm:$0xff]  ;;  %v81_v1 = vld [vmem:[%s2464_s29 + $0x30] sm:$0xff]  ;;  %v80_v2 = vld [vmem:[%s2464_s29 + $0x28] sm:$0xff] }
   0xf   :  { %1455 = vmatprep.subr.mxu0 %v82_v0  ;;  %v73_v3 = vld [vmem:[%s2465_s24] sm:$0xff]  ;;  %v78_v5 = vld [vmem:[%s2464_s29 + $0x18] sm:$0xff]  ;;  %v77_v6 = vld [vmem:[%s2464_s29 + $0x10] sm:$0xff] }
  0x10   :  { %1456 = vmatpush3.msra.mxu0 %v82_v0  ;;  %1471 = vmatprep.mubr.msk.f32.mxu0 %vm83_vm0, %v73_v3  ;;  %v79_v4 = vld [vmem:[%s2464_s29 + $0x20] sm:$0xff]  ;;  %v76_v7 = vld [vmem:[%s2464_s29 + $0x8] sm:$0xff]  ;;  %v230_v19 = vld [vmem:[%s2466_s25 + $0x78] sm:$0xff] }
  0x11   :  { %1457 = vmatprep.subr.mxu0 %v81_v1  ;;  %v75_v8 = vld [vmem:[%s2464_s29] sm:$0xff]  ;;  %v74_v9 = vld [vmem:[%s2465_s24 + $0x8] sm:$0xff]  ;;  %s2467_s24 = sld [smem:[#allocation6_spill]]  ;;  %v229_v56 = vld [vmem:[%s2466_s25 + $0x70] sm:$0xff] }
  0x12   :  { %1458 = vmatpush3.msra.mxu0 %v81_v1  ;;  %v228_v10 = vld [vmem:[%s2466_s25 + $0x68] sm:$0xff]  ;;  %v227_v11 = vld [vmem:[%s2466_s25 + $0x60] sm:$0xff]  ;;  %v226_v58 = vld [vmem:[%s2466_s25 + $0x58] sm:$0xff] }
  0x13   :  { %1459 = vmatprep.subr.mxu0 %v80_v2  ;;  %283 = vmatprep.subr.mxu1 %v228_v10  ;;  %v224_v12 = vld [vmem:[%s2466_s25 + $0x48] sm:$0xff]  ;;  %v223_v13 = vld [vmem:[%s2466_s25 + $0x40] sm:$0xff]  ;;  %v225_v59 = vld [vmem:[%s2466_s25 + $0x50] sm:$0xff] }
  0x14   :  { %1460 = vmatpush3.msra.mxu0 %v80_v2  ;;  %284 = vmatpush1.msra.mxu1 %v227_v11  ;;  %v220_v14 = vld [vmem:[%s2466_s25 + $0x28] sm:$0xff]  ;;  %v219_v15 = vld [vmem:[%s2466_s25 + $0x20] sm:$0xff]  ;;  %v222_v60 = vld [vmem:[%s2466_s25 + $0x38] sm:$0xff] }
  0x15   :  { %1461 = vmatprep.subr.mxu0 %v79_v4  ;;  %285 = vmatprep.subr.mxu1 %v224_v12  ;;  %v216_v16 = vld [vmem:[%s2466_s25 + $0x8] sm:$0xff]  ;;  %v215_v17 = vld [vmem:[%s2466_s25] sm:$0xff]  ;;  %v221_v62 = vld [vmem:[%s2466_s25 + $0x30] sm:$0xff] }
  0x16   :  { %1462 = vmatpush3.msra.mxu0 %v79_v4  ;;  %286 = vmatpush1.msra.mxu1 %v223_v13  ;;  %v1365_v51 = vld [vmem:[%s2468_s30] ss:$0 sm:$0xff]  ;;  %v218_v63 = vld [vmem:[%s2466_s25 + $0x18] sm:$0xff]  ;;  %v217_v0 = vld [vmem:[%s2466_s25 + $0x10] sm:$0xff] }
  0x17   :  { %1463 = vmatprep.subr.mxu0 %v78_v5  ;;  %287 = vmatprep.subr.mxu1 %v220_v14  ;;  %v1364_v48 = vld [vmem:[%s2467_s24] ss:$0 sm:$0xff]  ;;  %v608_v1 = vld [vmem:[%s2469_s23 + $0xf8] sm:$0xff]  ;;  %v607_v2 = vld [vmem:[%s2469_s23 + $0xf0] sm:$0xff] }
  0x18   :  { %1464 = vmatpush3.msra.mxu0 %v78_v5  ;;  %288 = vmatpush1.msra.mxu1 %v219_v15  ;;  %v606_v3 = vld [vmem:[%s2469_s23 + $0xe8] sm:$0xff]  ;;  %v605_v4 = vld [vmem:[%s2469_s23 + $0xe0] sm:$0xff]  ;;  %v604_v5 = vld [vmem:[%s2469_s23 + $0xd8] sm:$0xff] }
  0x19   :  { %1465 = vmatprep.subr.mxu0 %v77_v6  ;;  %289 = vmatprep.subr.mxu1 %v216_v16  ;;  %v672_v10 = vld [vmem:[%s2469_s23 + $0x2f8] sm:$0xff]  ;;  %v599_v11 = vld [vmem:[%s2469_s23 + $0xb0] sm:$0xff]  ;;  %v598_v13 = vld [vmem:[%s2469_s23 + $0xa8] sm:$0xff] }
  0x1a   :  { %1466 = vmatpush3.msra.mxu0 %v77_v6  ;;  %290 = vmatpush1.msra.mxu1 %v215_v17  ;;  %v603_v6 = vld [vmem:[%s2469_s23 + $0xd0] sm:$0xff]  ;;  %v670_v14 = vld [vmem:[%s2469_s23 + $0x2e8] sm:$0xff]  ;;  %v597_v15 = vld [vmem:[%s2469_s23 + $0xa0] sm:$0xff] }
  0x1b   :  { %1467 = vmatprep.subr.mxu0 %v76_v7  ;;  %360 = vmatprep.subr.mxu1 %v230_v19  ;;  %v671_v12 = vld [vmem:[%s2469_s23 + $0x2f0] sm:$0xff]  ;;  %v669_v16 = vld [vmem:[%s2469_s23 + $0x2e0] sm:$0xff]  ;;  %v596_v17 = vld [vmem:[%s2469_s23 + $0x98] sm:$0xff] }
  0x1c   :  { %1468 = vmatpush3.msra.mxu0 %v76_v7  ;;  %v602_v7 = vld [vmem:[%s2469_s23 + $0xc8] sm:$0xff]  ;;  %v595_v19 = vld [vmem:[%s2469_s23 + $0x90] sm:$0xff] }
  0x1d   :  { %1469 = vmatprep.subr.mxu0 %v75_v8 }
  0x1e   :  { %1470 = vmatpush3.msra.mxu0 %v75_v8  ;;  %v601_v8 = vld [vmem:[%s2469_s23 + $0xc0] sm:$0xff] }
  0x1f   :  { %1472 = vmatmul.mubr.msk.f32.vlgmr.msra.gmra.mxu0 %vm83_vm0, %v74_v9  ;;  %717 = vmatprep.subr.mxu0 %v608_v1  ;;  %v600_v9 = vld [vmem:[%s2469_s23 + $0xb8] sm:$0xff] }
  0x20   :  { %718 = vmatpush1.msra.mxu0 %v607_v2  ;;  %v636_v1 = vld [vmem:[%s2469_s23 + $0x1d8] sm:$0xff] }
  0x21   :  { %719 = vmatprep.subr.mxu0 %v606_v3  ;;  %v644_v2 = vld [vmem:[%s2469_s23 + $0x218] sm:$0xff]  ;;  %v635_v3 = vld [vmem:[%s2469_s23 + $0x1d0] sm:$0xff] }
  0x22   :  { %720 = vmatpush1.msra.mxu0 %v605_v4  ;;  %v643_v4 = vld [vmem:[%s2469_s23 + $0x210] sm:$0xff] }
  0x23   :  { %721 = vmatprep.subr.mxu0 %v604_v5  ;;  %v634_v5 = vld [vmem:[%s2469_s23 + $0x1c8] sm:$0xff] }
  0x24   :  { %722 = vmatpush1.msra.mxu0 %v603_v6  ;;  %v642_v6 = vld [vmem:[%s2469_s23 + $0x208] sm:$0xff] }
  0x25   :  { %723 = vmatprep.subr.mxu0 %v602_v7  ;;  %v633_v7 = vld [vmem:[%s2469_s23 + $0x1c0] sm:$0xff] }
  0x26   :  { %724 = vmatpush1.msra.mxu0 %v601_v8  ;;  %v641_v8 = vld [vmem:[%s2469_s23 + $0x200] sm:$0xff] }
  0x27   :  { %725 = vmatprep.subr.mxu0 %v600_v9  ;;  %v632_v9 = vld [vmem:[%s2469_s23 + $0x1b8] sm:$0xff] }
  0x28   :  { %726 = vmatpush1.msra.mxu0 %v599_v11  ;;  %v631_v11 = vld [vmem:[%s2469_s23 + $0x1b0] sm:$0xff] }
  0x29   :  { %727 = vmatprep.subr.mxu0 %v598_v13  ;;  %v630_v13 = vld [vmem:[%s2469_s23 + $0x1a8] sm:$0xff] }
  0x2a   :  { %728 = vmatpush1.msra.mxu0 %v597_v15  ;;  %v629_v15 = vld [vmem:[%s2469_s23 + $0x1a0] sm:$0xff] }
  0x2b   :  { %729 = vmatprep.subr.mxu0 %v596_v17  ;;  %v628_v17 = vld [vmem:[%s2469_s23 + $0x198] sm:$0xff] }
  0x2c   :  { %730 = vmatpush1.msra.mxu0 %v595_v19  ;;  %v627_v19 = vld [vmem:[%s2469_s23 + $0x190] sm:$0xff] }
  0xdf   :  { %v1473_v20 = vpop.f32.mrf.mxu0 }
  0xe0   :  { %v169_v22 = vsel %vm167_vm1, %v1473_v20, 0.0 }
  0xe1   :  { %v156_v21 = vpop.f32.mrf.mxu0 }
  0xe2   :  { %v168_v23 = vsel %vm167_vm1, %v156_v21, 0.0 }
  0xe3   :  { %v170_v24 = vadd.f32 %v169_v22, %v168_v23  ;;  %v666_v22 = vld [vmem:[%s2469_s23 + $0x2c8] sm:$0xff]  ;;  %v593_v23 = vld [vmem:[%s2469_s23 + $0x80] sm:$0xff] }
  0xe5   :  { %v171_v25 = vrot.slane %v170_v24, 4 }
  0xe7   :  { %v172_v26 = vadd.f32 %v171_v25, %v170_v24  ;;  %v665_v24 = vld [vmem:[%s2469_s23 + $0x2c0] sm:$0xff]  ;;  %v592_v25 = vld [vmem:[%s2469_s23 + $0x78] sm:$0xff] }
  0xe9   :  { %v173_v27 = vrot.slane %v172_v26, 2 }
  0xeb   :  { %v174_v28 = vadd.f32 %v173_v27, %v172_v26  ;;  %v664_v26 = vld [vmem:[%s2469_s23 + $0x2b8] sm:$0xff]  ;;  %v591_v27 = vld [vmem:[%s2469_s23 + $0x70] sm:$0xff] }
  0xed   :  { %v175_v29 = vrot.slane %v174_v28, 1 }
  0xef   :  { %v176_v30 = vadd.f32 %v175_v29, %v174_v28  ;;  %v663_v28 = vld [vmem:[%s2469_s23 + $0x2b0] sm:$0xff]  ;;  %v590_v29 = vld [vmem:[%s2469_s23 + $0x68] sm:$0xff] }
  0xf1   :  { %v178_v31 = vmul.f32 0.0625, %v176_v30  ;;  %v662_v30 = vld [vmem:[%s2469_s23 + $0x2a8] sm:$0xff] }
  0xf3   :  { %v179_v32 = vsub.f32 %v156_v21, %v178_v31  ;;  %v180_v33 = vsub.f32 %v1473_v20, %v178_v31  ;;  %v667_v20 = vld [vmem:[%s2469_s23 + $0x2d0] sm:$0xff]  ;;  %v594_v21 = vld [vmem:[%s2469_s23 + $0x88] sm:$0xff]  ;;  %v589_v31 = vld [vmem:[%s2469_s23 + $0x60] sm:$0xff] }
  0xf4   :  { %731 = vmatprep.subr.mxu0 %v594_v21  ;;  %v626_v21 = vld [vmem:[%s2469_s23 + $0x188] sm:$0xff] }
  0xf5   :  { %v181_v34 = vmul.f32 %v179_v32, %v179_v32  ;;  %v182_v35 = vmul.f32 %v180_v33, %v180_v33  ;;  %732 = vmatpush1.msra.mxu0 %v593_v23  ;;  %v625_v23 = vld [vmem:[%s2469_s23 + $0x180] sm:$0xff] }
  0xf6   :  { %733 = vmatprep.subr.mxu0 %v592_v25  ;;  %v624_v25 = vld [vmem:[%s2469_s23 + $0x178] sm:$0xff] }
  0xf7   :  { %v183_v36 = vsel %vm167_vm1, %v181_v34, 0.0  ;;  %v184_v37 = vsel %vm167_vm1, %v182_v35, 0.0  ;;  %734 = vmatpush1.msra.mxu0 %v591_v27  ;;  %v660_v34 = vld [vmem:[%s2469_s23 + $0x298] sm:$0xff]  ;;  %v587_v35 = vld [vmem:[%s2469_s23 + $0x50] sm:$0xff] }
  0xf8   :  { %v185_v38 = vadd.f32 %v184_v37, %v183_v36  ;;  %735 = vmatprep.subr.mxu0 %v590_v29  ;;  %v659_v36 = vld [vmem:[%s2469_s23 + $0x290] sm:$0xff]  ;;  %v586_v37 = vld [vmem:[%s2469_s23 + $0x48] sm:$0xff] }
  0xf9   :  { %736 = vmatpush1.msra.mxu0 %v589_v31  ;;  %v623_v27 = vld [vmem:[%s2469_s23 + $0x170] sm:$0xff]  ;;  %v622_v29 = vld [vmem:[%s2469_s23 + $0x168] sm:$0xff]  ;;  %v621_v31 = vld [vmem:[%s2469_s23 + $0x160] sm:$0xff] }
  0xfa   :  { %v186_v39 = vrot.slane %v185_v38, 4 }
  0xfc   :  { %v187_v40 = vadd.f32 %v186_v39, %v185_v38  ;;  %v658_v38 = vld [vmem:[%s2469_s23 + $0x288] sm:$0xff]  ;;  %v585_v39 = vld [vmem:[%s2469_s23 + $0x40] sm:$0xff] }
  0xfe   :  { %v188_v41 = vrot.slane %v187_v40, 2 }
 0x100   :  { %v189_v42 = vadd.f32 %v188_v41, %v187_v40  ;;  %v657_v40 = vld [vmem:[%s2469_s23 + $0x280] sm:$0xff]  ;;  %v584_v41 = vld [vmem:[%s2469_s23 + $0x38] sm:$0xff] }
 0x102   :  { %v190_v43 = vrot.slane %v189_v42, 1 }
 0x104   :  { %v191_v44 = vadd.f32 %v190_v43, %v189_v42  ;;  %v656_v42 = vld [vmem:[%s2469_s23 + $0x278] sm:$0xff]  ;;  %v583_v43 = vld [vmem:[%s2469_s23 + $0x30] sm:$0xff] }
 0x106   :  { %v192_v45 = vmul.f32 0.0625, %v191_v44  ;;  %v655_v44 = vld [vmem:[%s2469_s23 + $0x270] sm:$0xff] }
 0x108   :  { %v193_v46 = vadd.f32 1e-05, %v192_v45  ;;  %v582_v45 = vld [vmem:[%s2469_s23 + $0x28] sm:$0xff] }
 0x10a   :  { %1529 = vrsqrt.f32 %v193_v46  ;;  %v654_v46 = vld [vmem:[%s2469_s23 + $0x268] sm:$0xff] }
 0x117   :  { %v1530_v47 = vpop.eup %1529 }
 0x118   :  { %v195_v49 = vmul.f32 %v1530_v47, %v179_v32  ;;  %v196_v50 = vmul.f32 %v1530_v47, %v180_v33  ;;  %v661_v32 = vld [vmem:[%s2469_s23 + $0x2a0] sm:$0xff]  ;;  %v588_v33 = vld [vmem:[%s2469_s23 + $0x58] sm:$0xff] }
 0x119   :  { %737 = vmatprep.subr.mxu0 %v588_v33  ;;  %v581_v47 = vld [vmem:[%s2469_s23 + $0x20] sm:$0xff]  ;;  %v620_v33 = vld [vmem:[%s2469_s23 + $0x158] sm:$0xff] }
 0x11a   :  { %v203_v52 = vmul.f32 %v1364_v48, %v195_v49  ;;  %v204_v53 = vmul.f32 %v1364_v48, %v196_v50  ;;  %738 = vmatpush1.msra.mxu0 %v587_v35  ;;  %v653_v48 = vld [vmem:[%s2469_s23 + $0x260] sm:$0xff]  ;;  %v580_v49 = vld [vmem:[%s2469_s23 + $0x18] sm:$0xff]  ;;  %v619_v35 = vld [vmem:[%s2469_s23 + $0x150] sm:$0xff] }
 0x11b   :  { %739 = vmatprep.subr.mxu0 %v586_v37  ;;  %v652_v50 = vld [vmem:[%s2469_s23 + $0x258] sm:$0xff]  ;;  %v618_v37 = vld [vmem:[%s2469_s23 + $0x148] sm:$0xff] }
 0x11c   :  { %v211_v54 = vadd.f32 %v1365_v51, %v203_v52  ;;  %v212_v57 = vadd.f32 %v1365_v51, %v204_v53  ;;  %740 = vmatpush1.msra.mxu0 %v585_v39  ;;  %v579_v51 = vld [vmem:[%s2469_s23 + $0x10] sm:$0xff]  ;;  %v578_v53 = vld [vmem:[%s2469_s23 + $0x8] sm:$0xff]  ;;  %v617_v39 = vld [vmem:[%s2469_s23 + $0x140] sm:$0xff] }
 0x11d   :  { %741 = vmatprep.subr.mxu0 %v584_v41  ;;  %v651_v52 = vld [vmem:[%s2469_s23 + $0x250] sm:$0xff]  ;;  %v616_v41 = vld [vmem:[%s2469_s23 + $0x138] sm:$0xff] }
 0x11e   :  { %v213_v55 = vmax.f32 %v211_v54, 0.0  ;;  %v214_v61 = vmax.f32 %v212_v57, 0.0  ;;  %742 = vmatpush1.msra.mxu0 %v583_v43  ;;  %v650_v54 = vld [vmem:[%s2469_s23 + $0x248] sm:$0xff]  ;;  %v640_v57 = vld [vmem:[%s2469_s23 + $0x1f8] sm:$0xff]  ;;  %v615_v43 = vld [vmem:[%s2469_s23 + $0x130] sm:$0xff] }
 0x11f   :  { %743 = vmatprep.subr.mxu0 %v582_v45  ;;  %v614_v45 = vld [vmem:[%s2469_s23 + $0x128] sm:$0xff] }
 0x120   :  { %1366 = vmatmul.mubr.msk.f32.vlgmr.msra.gmra.mxu1 %vm167_vm1, %v213_v55  ;;  %744 = vmatpush1.msra.mxu0 %v581_v47  ;;  %v613_v47 = vld [vmem:[%s2469_s23 + $0x120] sm:$0xff] }
 0x121   :  { %361 = vmatpush1.msra.mxu1 %v229_v56  ;;  %329 = vmatprep.mubr.f32.mxu1 %v1547_v18  ;;  %v649_v56 = vld [vmem:[%s2469_s23 + $0x240] sm:$0xff] }
 0x122   :  { %362 = vmatprep.subr.mxu1 %v226_v58  ;;  %745 = vmatprep.subr.mxu0 %v580_v49  ;;  %v648_v58 = vld [vmem:[%s2469_s23 + $0x238] sm:$0xff] }
 0x123   :  { %363 = vmatpush1.msra.mxu1 %v225_v59  ;;  %746 = vmatpush1.msra.mxu0 %v579_v51  ;;  %v639_v59 = vld [vmem:[%s2469_s23 + $0x1f0] sm:$0xff]  ;;  %v612_v49 = vld [vmem:[%s2469_s23 + $0x118] sm:$0xff] }
 0x124   :  { %364 = vmatprep.subr.mxu1 %v222_v60  ;;  %1367 = vmatmul.mubr.msk.f32.gmra.mxu1 %vm167_vm1, %v214_v61  ;;  %v647_v60 = vld [vmem:[%s2469_s23 + $0x230] sm:$0xff] }
 0x125   :  { %365 = vmatpush1.msra.mxu1 %v221_v62  ;;  %400 = vmatprep.mubr.f32.mxu1 %v1547_v18  ;;  %v646_v62 = vld [vmem:[%s2469_s23 + $0x228] sm:$0xff]  ;;  %v611_v51 = vld [vmem:[%s2469_s23 + $0x110] sm:$0xff] }
 0x126   :  { %366 = vmatprep.subr.mxu1 %v218_v63  ;;  %747 = vmatprep.subr.mxu0 %v578_v53  ;;  %v637_v63 = vld [vmem:[%s2469_s23 + $0x1e0] sm:$0xff]  ;;  %v610_v53 = vld [vmem:[%s2469_s23 + $0x108] sm:$0xff] }
 0x127   :  { %367 = vmatpush1.msra.mxu1 %v217_v0  ;;  %v645_v0 = vld [vmem:[%s2469_s23 + $0x220] sm:$0xff] }
 0x128   :  { %1368 = vmatmul.mubr.msk.f32.vlgmr.msra.gmra.mxu1 %vm167_vm1, %v213_v55  ;;  %794 = vmatprep.subr.mxu1 %v672_v10  ;;  %v577_v55 = vld [vmem:[%s2469_s23] sm:$0xff]  ;;  %v704_v10 = vld [vmem:[%s2469_s23 + $0x3f8] sm:$0xff] }
 0x129   :  { %406 = vmatprep.mubr.f32.mxu1 %v1547_v18  ;;  %795 = vmatpush1.msra.mxu1 %v671_v12  ;;  %v668_v18 = vld [vmem:[%s2469_s23 + $0x2d8] sm:$0xff]  ;;  %v703_v12 = vld [vmem:[%s2469_s23 + $0x3f0] sm:$0xff] }
 0x12a   :  { %796 = vmatprep.subr.mxu1 %v670_v14  ;;  %748 = vmatpush1.msra.mxu0 %v577_v55  ;;  %v702_v14 = vld [vmem:[%s2469_s23 + $0x3e8] sm:$0xff]  ;;  %v609_v55 = vld [vmem:[%s2469_s23 + $0x100] sm:$0xff] }
 0x12b   :  { %797 = vmatpush1.msra.mxu1 %v669_v16  ;;  %749 = vmatprep.subr.mxu0 %v640_v57  ;;  %v701_v16 = vld [vmem:[%s2469_s23 + $0x3e0] sm:$0xff]  ;;  %v680_v57 = vld [vmem:[%s2469_s23 + $0x338] sm:$0xff] }
 0x12c   :  { %1369 = vmatmul.mubr.msk.f32.gmra.mxu1 %vm167_vm1, %v214_v61  ;;  %798 = vmatprep.subr.mxu1 %v668_v18  ;;  %v638_v61 = vld [vmem:[%s2469_s23 + $0x1e8] sm:$0xff]  ;;  %v700_v18 = vld [vmem:[%s2469_s23 + $0x3d8] sm:$0xff] }
 0x12d   :  { %799 = vmatpush1.msra.mxu1 %v667_v20  ;;  %750 = vmatpush2.msra.mxu0 %v639_v59  ;;  %v699_v20 = vld [vmem:[%s2469_s23 + $0x3d0] sm:$0xff]  ;;  %v678_v59 = vld [vmem:[%s2469_s23 + $0x328] sm:$0xff] }
 0x12e   :  { %800 = vmatprep.subr.mxu1 %v666_v22  ;;  %751 = vmatprep.subr.mxu0 %v638_v61  ;;  %v698_v22 = vld [vmem:[%s2469_s23 + $0x3c8] sm:$0xff]  ;;  %v676_v61 = vld [vmem:[%s2469_s23 + $0x318] sm:$0xff] }
 0x12f   :  { %801 = vmatpush1.msra.mxu1 %v665_v24  ;;  %752 = vmatpush2.msra.mxu0 %v637_v63  ;;  %v697_v24 = vld [vmem:[%s2469_s23 + $0x3c0] sm:$0xff]  ;;  %v674_v63 = vld [vmem:[%s2469_s23 + $0x308] sm:$0xff] }
 0x130   :  { %802 = vmatprep.subr.mxu1 %v664_v26  ;;  %753 = vmatprep.subr.mxu0 %v636_v1  ;;  %v696_v26 = vld [vmem:[%s2469_s23 + $0x3b8] sm:$0xff]  ;;  %v233_v1 = vlaneseq }
 0x131   :  { %803 = vmatpush1.msra.mxu1 %v663_v28  ;;  %754 = vmatpush2.msra.mxu0 %v635_v3  ;;  %v695_v28 = vld [vmem:[%s2469_s23 + $0x3b0] sm:$0xff] }
 0x132   :  { %804 = vmatprep.subr.mxu1 %v662_v30  ;;  %755 = vmatprep.subr.mxu0 %v634_v5  ;;  %v694_v30 = vld [vmem:[%s2469_s23 + $0x3a8] sm:$0xff] }
 0x133   :  { %805 = vmatpush1.msra.mxu1 %v661_v32  ;;  %756 = vmatpush2.msra.mxu0 %v633_v7  ;;  %v693_v32 = vld [vmem:[%s2469_s23 + $0x3a0] sm:$0xff] }
 0x134   :  { %806 = vmatprep.subr.mxu1 %v660_v34  ;;  %757 = vmatprep.subr.mxu0 %v632_v9  ;;  %v692_v34 = vld [vmem:[%s2469_s23 + $0x398] sm:$0xff] }
 0x135   :  { %807 = vmatpush1.msra.mxu1 %v659_v36  ;;  %758 = vmatpush2.msra.mxu0 %v631_v11  ;;  %v691_v36 = vld [vmem:[%s2469_s23 + $0x390] sm:$0xff] }
 0x136   :  { %808 = vmatprep.subr.mxu1 %v658_v38  ;;  %759 = vmatprep.subr.mxu0 %v630_v13  ;;  %v690_v38 = vld [vmem:[%s2469_s23 + $0x388] sm:$0xff] }
 0x137   :  { %809 = vmatpush1.msra.mxu1 %v657_v40  ;;  %760 = vmatpush2.msra.mxu0 %v629_v15  ;;  %v689_v40 = vld [vmem:[%s2469_s23 + $0x380] sm:$0xff] }
 0x138   :  { %810 = vmatprep.subr.mxu1 %v656_v42  ;;  %761 = vmatprep.subr.mxu0 %v628_v17  ;;  %v688_v42 = vld [vmem:[%s2469_s23 + $0x378] sm:$0xff] }
 0x139   :  { %811 = vmatpush1.msra.mxu1 %v655_v44  ;;  %762 = vmatpush2.msra.mxu0 %v627_v19  ;;  %v687_v44 = vld [vmem:[%s2469_s23 + $0x370] sm:$0xff] }
 0x13a   :  { %812 = vmatprep.subr.mxu1 %v654_v46  ;;  %763 = vmatprep.subr.mxu0 %v626_v21  ;;  %v686_v46 = vld [vmem:[%s2469_s23 + $0x368] sm:$0xff] }
 0x13b   :  { %813 = vmatpush1.msra.mxu1 %v653_v48  ;;  %764 = vmatpush2.msra.mxu0 %v625_v23  ;;  %v685_v48 = vld [vmem:[%s2469_s23 + $0x360] sm:$0xff] }
 0x13c   :  { %814 = vmatprep.subr.mxu1 %v652_v50  ;;  %765 = vmatprep.subr.mxu0 %v624_v25  ;;  %v684_v50 = vld [vmem:[%s2469_s23 + $0x358] sm:$0xff] }
 0x13d   :  { %815 = vmatpush1.msra.mxu1 %v651_v52  ;;  %766 = vmatpush2.msra.mxu0 %v623_v27  ;;  %v683_v52 = vld [vmem:[%s2469_s23 + $0x350] sm:$0xff] }
 0x13e   :  { %816 = vmatprep.subr.mxu1 %v650_v54  ;;  %767 = vmatprep.subr.mxu0 %v622_v29  ;;  %v682_v54 = vld [vmem:[%s2469_s23 + $0x348] sm:$0xff] }
 0x13f   :  { %817 = vmatpush1.msra.mxu1 %v649_v56  ;;  %768 = vmatpush2.msra.mxu0 %v621_v31  ;;  %v681_v56 = vld [vmem:[%s2469_s23 + $0x340] sm:$0xff] }
 0x140   :  { %818 = vmatprep.subr.mxu1 %v648_v58  ;;  %769 = vmatprep.subr.mxu0 %v620_v33  ;;  %v679_v58 = vld [vmem:[%s2469_s23 + $0x330] sm:$0xff] }
 0x141   :  { %819 = vmatpush1.msra.mxu1 %v647_v60  ;;  %770 = vmatpush2.msra.mxu0 %v619_v35  ;;  %v677_v60 = vld [vmem:[%s2469_s23 + $0x320] sm:$0xff] }
 0x142   :  { %820 = vmatprep.subr.mxu1 %v646_v62  ;;  %771 = vmatprep.subr.mxu0 %v618_v37  ;;  %v675_v62 = vld [vmem:[%s2469_s23 + $0x310] sm:$0xff] }
 0x143   :  { %821 = vmatpush1.msra.mxu1 %v645_v0  ;;  %772 = vmatpush2.msra.mxu0 %v617_v39  ;;  %v673_v0 = vld [vmem:[%s2469_s23 + $0x300] sm:$0xff] }
 0x144   :  { %822 = vmatprep.subr.mxu1 %v644_v2  ;;  %773 = vmatprep.subr.mxu0 %v616_v41  ;;  %v234_v2 = vshrl.u32 %v233_v1, 7 }
 0x145   :  { %823 = vmatpush1.msra.mxu1 %v643_v4  ;;  %774 = vmatpush2.msra.mxu0 %v615_v43  ;;  %v231_v4 = vld [vmem:[%s2470_s26] sm:$0xf] }
 0x146   :  { %824 = vmatprep.subr.mxu1 %v642_v6  ;;  %775 = vmatprep.subr.mxu0 %v614_v45  ;;  %v2145_v3 = vsub.s32 0, %v234_v2  ;;  %v2150_v5 = vsub.s32 1, %v234_v2  ;;  %v2154_v13 = vsub.s32 2, %v234_v2  ;;  %v2156_v15 = vsub.s32 3, %v234_v2 }
 0x147   :  { %825 = vmatpush1.msra.mxu1 %v641_v8  ;;  %776 = vmatpush2.msra.mxu0 %v613_v47 }
 0x148   :  { %826 = vmatprep.subr.mxu1 %v704_v10  ;;  %777 = vmatprep.subr.mxu0 %v612_v49  ;;  %v236_v7 = vrot.slane %v231_v4, %v2145_v3  ;;  %v240_v9 = vrot.slane %v231_v4, %v2150_v5  ;;  %v248_v23 = vrot.slane %v231_v4, %v2156_v15 }
 0x149   :  { %827 = vmatpush2.msra.mxu1 %v703_v12  ;;  %778 = vmatpush2.msra.mxu0 %v611_v51 }
 0x14a   :  { %828 = vmatprep.subr.mxu1 %v702_v14  ;;  %779 = vmatprep.subr.mxu0 %v610_v53 }
 0x14b   :  { %829 = vmatpush2.msra.mxu1 %v701_v16  ;;  %780 = vmatpush2.msra.mxu0 %v609_v55 }
 0x14c   :  { %830 = vmatprep.subr.mxu1 %v700_v18 }
 0x14d   :  { %831 = vmatpush2.msra.mxu1 %v699_v20 }
 0x14e   :  { %832 = vmatprep.subr.mxu1 %v698_v22  ;;  %v244_v22 = vrot.slane %v231_v4, %v2154_v13 }
 0x14f   :  { %833 = vmatpush2.msra.mxu1 %v697_v24 }
 0x150   :  { %834 = vmatprep.subr.mxu1 %v696_v26 }
 0x151   :  { %835 = vmatpush2.msra.mxu1 %v695_v28 }
 0x152   :  { %836 = vmatprep.subr.mxu1 %v694_v30 }
 0x153   :  { %837 = vmatpush2.msra.mxu1 %v693_v32 }
 0x154   :  { %838 = vmatprep.subr.mxu1 %v692_v34 }
 0x155   :  { %839 = vmatpush2.msra.mxu1 %v691_v36 }
 0x156   :  { %840 = vmatprep.subr.mxu1 %v690_v38 }
 0x157   :  { %841 = vmatpush2.msra.mxu1 %v689_v40 }
 0x158   :  { %842 = vmatprep.subr.mxu1 %v688_v42 }
 0x159   :  { %843 = vmatpush2.msra.mxu1 %v687_v44 }
 0x15a   :  { %844 = vmatprep.subr.mxu1 %v686_v46 }
 0x15b   :  { %845 = vmatpush2.msra.mxu1 %v685_v48 }
 0x15c   :  { %846 = vmatprep.subr.mxu1 %v684_v50 }
 0x15d   :  { %847 = vmatpush2.msra.mxu1 %v683_v52 }
 0x15e   :  { %848 = vmatprep.subr.mxu1 %v682_v54 }
 0x15f   :  { %849 = vmatpush2.msra.mxu1 %v681_v56 }
 0x160   :  { %850 = vmatprep.subr.mxu1 %v680_v57 }
 0x161   :  { %851 = vmatpush2.msra.mxu1 %v679_v58 }
 0x162   :  { %852 = vmatprep.subr.mxu1 %v678_v59 }
 0x163   :  { %853 = vmatpush2.msra.mxu1 %v677_v60 }
 0x164   :  { %854 = vmatprep.subr.mxu1 %v676_v61 }
 0x165   :  { %855 = vmatpush2.msra.mxu1 %v675_v62 }
 0x166   :  { %856 = vmatprep.subr.mxu1 %v674_v63 }
 0x167   :  { %857 = vmatpush2.msra.mxu1 %v673_v0 }
 0x1e0   :  { %v325_v6 = vpop.f32.mrf.mxu1 }
 0x1e1   :  { %v326_v11 = vadd.f32 %v325_v6, %v236_v7 }
 0x1e2   :  { %v327_v8 = vpop.f32.mrf.mxu1 }
 0x1e3   :  { %v328_v16 = vadd.f32 %v327_v8, %v240_v9 }
 0x1e4   :  { %v331_v10 = vpop.f32.mrf.mxu1 }
 0x1e5   :  { %v332_v12 = vadd.f32 %v331_v10, %v236_v7 }
 0x1e6   :  { %v333_v14 = vpop.f32.mrf.mxu1 }
 0x1e7   :  { %v415_v17 = vadd.f32 %v332_v12, %v326_v11  ;;  %v334_v18 = vadd.f32 %v333_v14, %v240_v9 }
 0x1e8   :  { %v402_v19 = vpop.f32.mrf.mxu1 }
 0x1e9   :  { %v416_v20 = vrot.slane %v415_v17, 4  ;;  %v422_v21 = vadd.f32 %v334_v18, %v328_v16  ;;  %v403_v30 = vadd.f32 %v402_v19, %v244_v22 }
 0x1ea   :  { %v404_v24 = vpop.f32.mrf.mxu1 }
 0x1eb   :  { %v417_v25 = vadd.f32 %v416_v20, %v415_v17  ;;  %v423_v26 = vrot.slane %v422_v21, 4  ;;  %v405_v32 = vadd.f32 %v404_v24, %v248_v23 }
 0x1ec   :  { %v408_v27 = vpop.f32.mrf.mxu1 }
 0x1ed   :  { %v418_v28 = vrot.slane %v417_v25, 2  ;;  %v424_v29 = vadd.f32 %v423_v26, %v422_v21  ;;  %v409_v31 = vadd.f32 %v408_v27, %v244_v22 }
 0x1ee   :  { %v410_v33 = vpop.f32.mrf.mxu1 }
 0x1ef   :  { %v419_v34 = vadd.f32 %v418_v28, %v417_v25  ;;  %v425_v35 = vrot.slane %v424_v29, 2  ;;  %v429_v36 = vadd.f32 %v409_v31, %v403_v30  ;;  %v411_v37 = vadd.f32 %v410_v33, %v248_v23 }
 0x1f1   :  { %v420_v38 = vrot.slane %v419_v34, 1  ;;  %v426_v39 = vadd.f32 %v425_v35, %v424_v29  ;;  %v430_v40 = vrot.slane %v429_v36, 4  ;;  %v436_v41 = vadd.f32 %v411_v37, %v405_v32 }
 0x1f3   :  { %v421_v42 = vadd.f32 %v420_v38, %v419_v34  ;;  %v427_v43 = vrot.slane %v426_v39, 1  ;;  %v431_v44 = vadd.f32 %v430_v40, %v429_v36  ;;  %v437_v45 = vrot.slane %v436_v41, 4 }
 0x1f5   :  { %v443_v46 = vmul.f32 0.0625, %v421_v42  ;;  %v428_v47 = vadd.f32 %v427_v43, %v426_v39  ;;  %v432_v48 = vrot.slane %v431_v44, 2  ;;  %v438_v49 = vadd.f32 %v437_v45, %v436_v41 }
 0x1f7   :  { %v2160_v50 = vsub.f32 %v326_v11, %v443_v46  ;;  %v2162_v51 = vsub.f32 %v332_v12, %v443_v46  ;;  %v444_v52 = vmul.f32 0.0625, %v428_v47  ;;  %v433_v53 = vadd.f32 %v432_v48, %v431_v44 }
 0x1f8   :  { %v439_v54 = vrot.slane %v438_v49, 2 }
 0x1f9   :  { %v455_v55 = vmul.f32 %v2160_v50, %v2160_v50  ;;  %v459_v56 = vmul.f32 %v2162_v51, %v2162_v51  ;;  %v2168_v57 = vsub.f32 %v328_v16, %v444_v52  ;;  %v2170_v58 = vsub.f32 %v334_v18, %v444_v52 }
 0x1fa   :  { %v434_v59 = vrot.slane %v433_v53, 1  ;;  %v440_v60 = vadd.f32 %v439_v54, %v438_v49 }
 0x1fb   :  { %v463_v61 = vadd.f32 %v459_v56, %v455_v55  ;;  %v456_v62 = vmul.f32 %v2168_v57, %v2168_v57  ;;  %v460_v63 = vmul.f32 %v2170_v58, %v2170_v58  ;;  %v414_v55 = vld [vmem:[%s2438_s7] sm:$0xf] }
 0x1fc   :  { %v435_v0 = vadd.f32 %v434_v59, %v433_v53  ;;  %v441_v1 = vrot.slane %v440_v60, 1  ;;  %v413_v53 = vld [vmem:[%s2437_s6] sm:$0xf] }
 0x1fd   :  { %v464_v2 = vrot.slane %v463_v61, 4  ;;  %v470_v4 = vadd.f32 %v460_v63, %v456_v62  ;;  %v515_v56 = vrot.slane %v413_v53, %v2145_v3 }
 0x1fe   :  { %v445_v6 = vmul.f32 0.0625, %v435_v0  ;;  %v442_v7 = vadd.f32 %v441_v1, %v440_v60  ;;  %v544_v0 = vrot.slane %v414_v55, %v2145_v3 }
 0x1ff   :  { %v465_v8 = vadd.f32 %v464_v2, %v463_v61  ;;  %v471_v9 = vrot.slane %v470_v4, 4  ;;  %v519_v61 = vrot.slane %v413_v53, %v2150_v5 }
 0x200   :  { %v2176_v10 = vsub.f32 %v403_v30, %v445_v6  ;;  %v2178_v11 = vsub.f32 %v409_v31, %v445_v6  ;;  %v446_v12 = vmul.f32 0.0625, %v442_v7 }
 0x201   :  { %v466_v14 = vrot.slane %v465_v8, 2  ;;  %v472_v16 = vadd.f32 %v471_v9, %v470_v4  ;;  %v548_v4 = vrot.slane %v414_v55, %v2150_v5 }
 0x202   :  { %v457_v17 = vmul.f32 %v2176_v10, %v2176_v10  ;;  %v461_v18 = vmul.f32 %v2178_v11, %v2178_v11  ;;  %v2184_v19 = vsub.f32 %v405_v32, %v446_v12  ;;  %v2186_v20 = vsub.f32 %v411_v37, %v446_v12 }
 0x203   :  { %v467_v21 = vadd.f32 %v466_v14, %v465_v8  ;;  %v473_v22 = vrot.slane %v472_v16, 2 }
 0x204   :  { %v477_v23 = vadd.f32 %v461_v18, %v457_v17  ;;  %v458_v24 = vmul.f32 %v2184_v19, %v2184_v19  ;;  %v462_v25 = vmul.f32 %v2186_v20, %v2186_v20 }
 0x205   :  { %v468_v26 = vrot.slane %v467_v21, 1  ;;  %v474_v27 = vadd.f32 %v473_v22, %v472_v16  ;;  %v523_v16 = vrot.slane %v413_v53, %v2154_v13 }
 0x206   :  { %v478_v28 = vrot.slane %v477_v23, 4  ;;  %v484_v29 = vadd.f32 %v462_v25, %v458_v24  ;;  %v552_v25 = vrot.slane %v414_v55, %v2154_v13 }
 0x207   :  { %v469_v30 = vadd.f32 %v468_v26, %v467_v21  ;;  %v475_v31 = vrot.slane %v474_v27, 1 }
 0x208   :  { %v479_v33 = vadd.f32 %v478_v28, %v477_v23  ;;  %v485_v32 = vrot.slane %v484_v29, 4 }
 0x209   :  { %v491_v34 = vmul.f32 0.0625, %v469_v30  ;;  %v476_v35 = vadd.f32 %v475_v31, %v474_v27 }
 0x20a   :  { %v480_v36 = vrot.slane %v479_v33, 2  ;;  %v486_v37 = vadd.f32 %v485_v32, %v484_v29  ;;  %v556_v29 = vrot.slane %v414_v55, %v2156_v15  ;;  %v962_v55 = vld [vmem:[%s2439_s12 + $0x38] sm:$0xff] }
 0x20b   :  { %v495_v38 = vadd.f32 1e-05, %v491_v34  ;;  %v492_v39 = vmul.f32 0.0625, %v476_v35 }
 0x20c   :  { %v481_v40 = vadd.f32 %v480_v36, %v479_v33  ;;  %v487_v41 = vrot.slane %v486_v37, 2 }
 0x20d   :  { %1531 = vrsqrt.f32 %v495_v38  ;;  %v496_v42 = vadd.f32 1e-05, %v492_v39  ;;  %v985_v38 = vld [vmem:[%s2439_s12 + $0xf0] sm:$0xff] }
 0x20e   :  { %v482_v43 = vrot.slane %v481_v40, 1  ;;  %v488_v44 = vadd.f32 %v487_v41, %v486_v37  ;;  %v969_v39 = vld [vmem:[%s2439_s12 + $0x70] sm:$0xff]  ;;  %v968_v41 = vld [vmem:[%s2439_s12 + $0x68] sm:$0xff] }
 0x20f   :  { %1533 = vrsqrt.f32 %v496_v42  ;;  %v983_v42 = vld [vmem:[%s2439_s12 + $0xe0] sm:$0xff] }
 0x210   :  { %v483_v45 = vadd.f32 %v482_v43, %v481_v40  ;;  %v489_v46 = vrot.slane %v488_v44, 1  ;;  %v984_v40 = vld [vmem:[%s2439_s12 + $0xe8] sm:$0xff]  ;;  %v967_v43 = vld [vmem:[%s2439_s12 + $0x60] sm:$0xff] }
 0x212   :  { %v493_v47 = vmul.f32 0.0625, %v483_v45  ;;  %v490_v48 = vadd.f32 %v489_v46, %v488_v44  ;;  %v982_v44 = vld [vmem:[%s2439_s12 + $0xd8] sm:$0xff]  ;;  %v981_v46 = vld [vmem:[%s2439_s12 + $0xd0] sm:$0xff] }
 0x213   :  { %v966_v45 = vld [vmem:[%s2439_s12 + $0x58] sm:$0xff] }
 0x214   :  { %v497_v49 = vadd.f32 1e-05, %v493_v47  ;;  %v494_v52 = vmul.f32 0.0625, %v490_v48  ;;  %v965_v47 = vld [vmem:[%s2439_s12 + $0x50] sm:$0xff]  ;;  %v980_v48 = vld [vmem:[%s2439_s12 + $0xc8] sm:$0xff] }
 0x216   :  { %1535 = vrsqrt.f32 %v497_v49  ;;  %v498_v54 = vadd.f32 1e-05, %v494_v52  ;;  %v964_v49 = vld [vmem:[%s2439_s12 + $0x48] sm:$0xff]  ;;  %v979_v52 = vld [vmem:[%s2439_s12 + $0xc0] sm:$0xff] }
 0x218   :  { %1537 = vrsqrt.f32 %v498_v54  ;;  %v978_v54 = vld [vmem:[%s2439_s12 + $0xb8] sm:$0xff] }
 0x21a   :  { %v1532_v59 = vpop.eup %1531 }
 0x21b   :  { %v503_v60 = vmul.f32 %v1532_v59, %v2160_v50  ;;  %v507_v63 = vmul.f32 %v1532_v59, %v2162_v51  ;;  %v961_v59 = vld [vmem:[%s2439_s12 + $0x30] sm:$0xff] }
 0x21c   :  { %v1534_v62 = vpop.eup %1533 }
 0x21d   :  { %v508_v1 = vmul.f32 %v1534_v62, %v2170_v58  ;;  %v504_v2 = vmul.f32 %v1534_v62, %v2168_v57  ;;  %v532_v6 = vmul.f32 %v515_v56, %v503_v60  ;;  %v536_v12 = vmul.f32 %v515_v56, %v507_v63  ;;  %v977_v56 = vld [vmem:[%s2439_s12 + $0xb0] sm:$0xff]  ;;  %v976_v60 = vld [vmem:[%s2439_s12 + $0xa8] sm:$0xff]  ;;  %v975_v62 = vld [vmem:[%s2439_s12 + $0xa0] sm:$0xff] }
 0x21e   :  { %v527_v58 = vrot.slane %v413_v53, %v2156_v15  ;;  %v986_v15 = vld [vmem:[%s2439_s12 + $0xf8] sm:$0xff]  ;;  %v963_v53 = vld [vmem:[%s2439_s12 + $0x40] sm:$0xff] }
 0x21f   :  { %v533_v7 = vmul.f32 %v519_v61, %v504_v2  ;;  %v537_v8 = vmul.f32 %v519_v61, %v508_v1  ;;  %v561_v9 = vadd.f32 %v544_v0, %v532_v6  ;;  %v565_v22 = vadd.f32 %v544_v0, %v536_v12  ;;  %1389 = vmatprep.subr.mxu0 %v986_v15  ;;  %v960_v61 = vld [vmem:[%s2439_s12 + $0x28] sm:$0xff]  ;;  %v959_v63 = vld [vmem:[%s2439_s12 + $0x20] sm:$0xff]  ;;  %v974_v0 = vld [vmem:[%s2439_s12 + $0x98] sm:$0xff] }
 0x220   :  { %v958_v1 = vld [vmem:[%s2439_s12 + $0x18] sm:$0xff]  ;;  %v973_v2 = vld [vmem:[%s2439_s12 + $0x90] sm:$0xff]  ;;  %v972_v6 = vld [vmem:[%s2439_s12 + $0x88] sm:$0xff] }
 0x221   :  { %v562_v14 = vadd.f32 %v548_v4, %v533_v7  ;;  %v566_v50 = vadd.f32 %v548_v4, %v537_v8  ;;  %v569_v21 = vmax.f32 %v561_v9, 0.0  ;;  %v957_v4 = vld [vmem:[%s2439_s12 + $0x10] sm:$0xff]  ;;  %v956_v7 = vld [vmem:[%s2439_s12 + $0x8] sm:$0xff]  ;;  %v971_v8 = vld [vmem:[%s2439_s12 + $0x80] sm:$0xff] }
 0x222   :  { %v955_v9 = vld [vmem:[%s2439_s12] sm:$0xff] }
 0x223   :  { %v1536_v17 = vpop.eup %1535  ;;  %v570_v18 = vmax.f32 %v562_v14, 0.0  ;;  %v574_v24 = vmax.f32 %v566_v50, 0.0  ;;  %v705_v50 = vld [vmem:[%s2440_s9] sm:$0x3] }
 0x224   :  { %v505_v51 = vmul.f32 %v1536_v17, %v2176_v10  ;;  %v509_v23 = vmul.f32 %v1536_v17, %v2178_v11  ;;  %v573_v10 = vmax.f32 %v565_v22, 0.0  ;;  %v710_v17 = vrot.slane %v705_v50, %v2145_v3 }
 0x225   :  { %v1538_v57 = vpop.eup %1537  ;;  %781 = vmatprep.mubr.f32.mxu0 %v570_v18 }
 0x226   :  { %v534_v26 = vmul.f32 %v523_v16, %v505_v51  ;;  %v510_v27 = vmul.f32 %v1538_v57, %v2186_v20  ;;  %782 = vmatmul.mubr.f32.vlgmr.msra.gmra.mxu0 %v569_v21  ;;  %v506_v28 = vmul.f32 %v1538_v57, %v2184_v19  ;;  %v538_v32 = vmul.f32 %v523_v16, %v509_v23  ;;  %v970_v19 = vld [vmem:[%s2439_s12 + $0x78] sm:$0xff] }
 0x227   :  { %787 = vmatprep.mubr.f32.mxu0 %v574_v24  ;;  %1390 = vmatpush3.msra.mxu0 %v970_v19  ;;  %v714_v51 = vrot.slane %v705_v50, %v2150_v5 }
 0x228   :  { %v535_v30 = vmul.f32 %v527_v58, %v506_v28  ;;  %v539_v31 = vmul.f32 %v527_v58, %v510_v27  ;;  %v563_v33 = vadd.f32 %v552_v25, %v534_v26  ;;  %v567_v13 = vadd.f32 %v552_v25, %v538_v32  ;;  %1391 = vmatprep.subr.mxu0 %v985_v38 }
 0x229   :  { %1392 = vmatpush3.msra.mxu0 %v969_v39 }
 0x22a   :  { %788 = vmatmul.mubr.f32.gmra.mxu0 %v573_v10  ;;  %v564_v11 = vadd.f32 %v556_v29, %v535_v30  ;;  %v568_v34 = vadd.f32 %v556_v29, %v539_v31  ;;  %v571_v36 = vmax.f32 %v563_v33, 0.0  ;;  %v575_v20 = vmax.f32 %v567_v13, 0.0  ;;  %1393 = vmatprep.subr.mxu0 %v984_v40 }
 0x22b   :  { %1394 = vmatpush3.msra.mxu0 %v968_v41 }
 0x22c   :  { %v572_v35 = vmax.f32 %v564_v11, 0.0  ;;  %v576_v37 = vmax.f32 %v568_v34, 0.0  ;;  %1395 = vmatprep.subr.mxu0 %v983_v42 }
 0x22d   :  { %1396 = vmatpush3.msra.mxu0 %v967_v43 }
 0x22e   :  { %858 = vmatprep.mubr.f32.mxu1 %v572_v35  ;;  %1397 = vmatprep.subr.mxu0 %v982_v44 }
 0x22f   :  { %859 = vmatmul.mubr.f32.vlgmr.msra.gmra.mxu1 %v571_v36  ;;  %1398 = vmatpush3.msra.mxu0 %v966_v45 }
 0x230   :  { %864 = vmatprep.mubr.f32.mxu1 %v576_v37  ;;  %1399 = vmatprep.subr.mxu0 %v981_v46 }
 0x231   :  { %1400 = vmatpush3.msra.mxu0 %v965_v47 }
 0x232   :  { %1401 = vmatprep.subr.mxu0 %v980_v48 }
 0x233   :  { %865 = vmatmul.mubr.f32.gmra.mxu1 %v575_v20  ;;  %1402 = vmatpush3.msra.mxu0 %v964_v49 }
 0x234   :  { %1403 = vmatprep.subr.mxu0 %v979_v52 }
 0x235   :  { %1404 = vmatpush3.msra.mxu0 %v963_v53 }
 0x236   :  { %1405 = vmatprep.subr.mxu0 %v978_v54 }
 0x237   :  { %1406 = vmatpush3.msra.mxu0 %v962_v55 }
 0x238   :  { %1407 = vmatprep.subr.mxu0 %v977_v56 }
 0x239   :  { %1408 = vmatpush3.msra.mxu0 %v961_v59 }
 0x23a   :  { %1409 = vmatprep.subr.mxu0 %v976_v60 }
 0x23b   :  { %1410 = vmatpush3.msra.mxu0 %v960_v61 }
 0x23c   :  { %1411 = vmatprep.subr.mxu0 %v975_v62 }
 0x23d   :  { %1412 = vmatpush3.msra.mxu0 %v959_v63 }
 0x23e   :  { %1413 = vmatprep.subr.mxu0 %v974_v0 }
 0x23f   :  { %1414 = vmatpush3.msra.mxu0 %v958_v1 }
 0x240   :  { %1415 = vmatprep.subr.mxu0 %v973_v2 }
 0x241   :  { %1416 = vmatpush3.msra.mxu0 %v957_v4 }
 0x242   :  { %1417 = vmatprep.subr.mxu0 %v972_v6 }
 0x243   :  { %1418 = vmatpush3.msra.mxu0 %v956_v7 }
 0x244   :  { %1419 = vmatprep.subr.mxu0 %v971_v8 }
 0x245   :  { %1420 = vmatpush3.msra.mxu0 %v955_v9  ;;  %v871_v9 = vld [vmem:[%s2441_s10] sm:$0x3] }
 0x2e6   :  { %v783_v12 = vpop.f32.mrf.mxu0 }
 0x2e7   :  { %v784_v58 = vadd.f32 %v783_v12, %v710_v17  ;;  %v872_v12 = vld [vmem:[%s2442_s11] sm:$0x3] }
 0x2e8   :  { %v785_v14 = vpop.f32.mrf.mxu0 }
 0x2e9   :  { %v786_v24 = vadd.f32 %v785_v14, %v714_v51  ;;  %v925_v14 = vrot.slane %v871_v9, %v2145_v3 }
 0x2ea   :  { %v789_v16 = vpop.f32.mrf.mxu0 }
 0x2eb   :  { %v790_v57 = vadd.f32 %v789_v16, %v710_v17  ;;  %v929_v17 = vrot.slane %v871_v9, %v2150_v5 }
 0x2ec   :  { %v791_v21 = vpop.f32.mrf.mxu0 }
 0x2ed   :  { %v792_v25 = vadd.f32 %v791_v21, %v714_v51  ;;  %v940_v21 = vrot.slane %v872_v12, %v2145_v3  ;;  %v1128_v3 = vld [vmem:[%s2443_s16 + $0x78] sm:$0xff] }
 0x2ee   :  { %1474 = vmatprep.subr.mxu1 %v1128_v3 }
 0x2ef   :  { %v860_v18 = vpop.f32.mrf.mxu1  ;;  %1475 = vmatpush3.msra.mxu1 %v1128_v3  ;;  %v1259_v3 = vld [vmem:[%s2447_s20] sm:$0xff] }
 0x2f0   :  { %v861_v26 = vadd.f32 %v860_v18, %v784_v58 }
 0x2f1   :  { %v862_v22 = vpop.f32.mrf.mxu1 }
 0x2f2   :  { %v863_v29 = vadd.f32 %v862_v22, %v786_v24 }
 0x2f3   :  { %v866_v23 = vpop.f32.mrf.mxu1 }
 0x2f4   :  { %v867_v27 = vadd.f32 %v866_v23, %v790_v57  ;;  %v944_v23 = vrot.slane %v872_v12, %v2150_v5  ;;  %v1127_v5 = vld [vmem:[%s2443_s16 + $0x70] sm:$0xff] }
 0x2f5   :  { %v868_v28 = vpop.f32.mrf.mxu1  ;;  %1476 = vmatprep.subr.mxu1 %v1127_v5 }
 0x2f6   :  { %v873_v10 = vadd.f32 %v867_v27, %v861_v26  ;;  %v869_v30 = vadd.f32 %v868_v28, %v792_v25  ;;  %1477 = vmatpush3.msra.mxu1 %v1127_v5  ;;  %v27_v5 = vstv %s2448_s21 }
 0x2f7   :  { %28 = vst [vmem:[#allocation2] sm:$0x1] %v27_v5 }
 0x2f8   :  { %v874_v31 = vrot.slane %v873_v10, 4  ;;  %v880_v33 = vadd.f32 %v869_v30, %v863_v29 }
 0x2fa   :  { %v875_v32 = vadd.f32 %v874_v31, %v873_v10  ;;  %v881_v11 = vrot.slane %v880_v33, 4 }
 0x2fc   :  { %v876_v34 = vrot.slane %v875_v32, 2  ;;  %v882_v35 = vadd.f32 %v881_v11, %v880_v33  ;;  %v1126_v11 = vld [vmem:[%s2443_s16 + $0x68] sm:$0xff] }
 0x2fd   :  { %1478 = vmatprep.subr.mxu1 %v1126_v11 }
 0x2fe   :  { %v877_v36 = vadd.f32 %v876_v34, %v875_v32  ;;  %v883_v13 = vrot.slane %v882_v35, 2  ;;  %1479 = vmatpush3.msra.mxu1 %v1126_v11  ;;  %v1125_v34 = vld [vmem:[%s2443_s16 + $0x60] sm:$0xff] }
 0x2ff   :  { %1480 = vmatprep.subr.mxu1 %v1125_v34  ;;  %v1373_v11 = vld [vmem:[%s2449_s17] ss:$0 sm:$0xff] }
 0x300   :  { %v878_v37 = vrot.slane %v877_v36, 1  ;;  %v884_v20 = vadd.f32 %v883_v13, %v882_v35  ;;  %1481 = vmatpush3.msra.mxu1 %v1125_v34  ;;  %v1124_v35 = vld [vmem:[%s2443_s16 + $0x58] sm:$0xff]  ;;  %v1122_v13 = vld [vmem:[%s2443_s16 + $0x48] sm:$0xff] }
 0x301   :  { %1482 = vmatprep.subr.mxu1 %v1124_v35 }
 0x302   :  { %v879_v15 = vadd.f32 %v878_v37, %v877_v36  ;;  %v885_v19 = vrot.slane %v884_v20, 1  ;;  %1483 = vmatpush3.msra.mxu1 %v1124_v35  ;;  %v1123_v36 = vld [vmem:[%s2443_s16 + $0x50] sm:$0xff]  ;;  %v1121_v37 = vld [vmem:[%s2443_s16 + $0x40] sm:$0xff] }
 0x303   :  { %1484 = vmatprep.subr.mxu1 %v1123_v36 }
 0x304   :  { %v887_v38 = vmul.f32 0.0625, %v879_v15  ;;  %v886_v39 = vadd.f32 %v885_v19, %v884_v20  ;;  %1485 = vmatpush3.msra.mxu1 %v1123_v36  ;;  %v1120_v20 = vld [vmem:[%s2443_s16 + $0x38] sm:$0xff]  ;;  %v1119_v15 = vld [vmem:[%s2443_s16 + $0x30] sm:$0xff]  ;;  %v1118_v19 = vld [vmem:[%s2443_s16 + $0x28] sm:$0xff] }
 0x305   :  { %1486 = vmatprep.subr.mxu1 %v1122_v13 }
 0x306   :  { %v889_v40 = vsub.f32 %v861_v26, %v887_v38  ;;  %v891_v41 = vsub.f32 %v867_v27, %v887_v38  ;;  %v888_v42 = vmul.f32 0.0625, %v886_v39  ;;  %1487 = vmatpush3.msra.mxu1 %v1122_v13  ;;  %v1117_v38 = vld [vmem:[%s2443_s16 + $0x20] sm:$0xff]  ;;  %v1116_v39 = vld [vmem:[%s2443_s16 + $0x18] sm:$0xff] }
 0x307   :  { %1488 = vmatprep.subr.mxu1 %v1121_v37 }
 0x308   :  { %v893_v43 = vmul.f32 %v889_v40, %v889_v40  ;;  %v895_v44 = vmul.f32 %v891_v41, %v891_v41  ;;  %v890_v45 = vsub.f32 %v863_v29, %v888_v42  ;;  %v892_v46 = vsub.f32 %v869_v30, %v888_v42  ;;  %1489 = vmatpush3.msra.mxu1 %v1121_v37  ;;  %v1113_v42 = vld [vmem:[%s2443_s16] sm:$0xff] }
 0x309   :  { %1490 = vmatprep.subr.mxu1 %v1120_v20 }
 0x30a   :  { %v897_v47 = vadd.f32 %v895_v44, %v893_v43  ;;  %v894_v48 = vmul.f32 %v890_v45, %v890_v45  ;;  %v896_v49 = vmul.f32 %v892_v46, %v892_v46  ;;  %1491 = vmatpush3.msra.mxu1 %v1120_v20 }
 0x30b   :  { %1492 = vmatprep.subr.mxu1 %v1119_v15 }
 0x30c   :  { %v898_v52 = vrot.slane %v897_v47, 4  ;;  %v904_v53 = vadd.f32 %v896_v49, %v894_v48  ;;  %1493 = vmatpush3.msra.mxu1 %v1119_v15 }
 0x30d   :  { %1494 = vmatprep.subr.mxu1 %v1118_v19 }
 0x30e   :  { %v899_v54 = vadd.f32 %v898_v52, %v897_v47  ;;  %v905_v55 = vrot.slane %v904_v53, 4  ;;  %1495 = vmatpush3.msra.mxu1 %v1118_v19  ;;  %v1370_v47 = vld [vmem:[%s2444_s13] ss:$0 sm:$0xff] }
 0x30f   :  { %1496 = vmatprep.subr.mxu1 %v1117_v38 }
 0x310   :  { %v900_v56 = vrot.slane %v899_v54, 2  ;;  %v906_v59 = vadd.f32 %v905_v55, %v904_v53  ;;  %1497 = vmatpush3.msra.mxu1 %v1117_v38 }
 0x311   :  { %1498 = vmatprep.subr.mxu1 %v1116_v39 }
 0x312   :  { %v901_v60 = vadd.f32 %v900_v56, %v899_v54  ;;  %v907_v61 = vrot.slane %v906_v59, 2  ;;  %1499 = vmatpush3.msra.mxu1 %v1116_v39 }
 0x314   :  { %v902_v62 = vrot.slane %v901_v60, 1  ;;  %v908_v63 = vadd.f32 %v907_v61, %v906_v59 }
 0x316   :  { %v903_v0 = vadd.f32 %v902_v62, %v901_v60  ;;  %v909_v1 = vrot.slane %v908_v63, 1 }
 0x318   :  { %v911_v2 = vmul.f32 0.0625, %v903_v0  ;;  %v910_v4 = vadd.f32 %v909_v1, %v908_v63 }
 0x31a   :  { %v913_v6 = vadd.f32 1e-05, %v911_v2  ;;  %v912_v7 = vmul.f32 0.0625, %v910_v4 }
 0x31c   :  { %1539 = vrsqrt.f32 %v913_v6  ;;  %v914_v8 = vadd.f32 1e-05, %v912_v7 }
 0x31e   :  { %1541 = vrsqrt.f32 %v914_v8 }
 0x329   :  { %v1540_v50 = vpop.eup %1539 }
 0x32a   :  { %v917_v16 = vmul.f32 %v1540_v50, %v889_v40  ;;  %v919_v51 = vmul.f32 %v1540_v50, %v891_v41  ;;  %v1115_v40 = vld [vmem:[%s2443_s16 + $0x10] sm:$0xff]  ;;  %v1114_v41 = vld [vmem:[%s2443_s16 + $0x8] sm:$0xff] }
 0x32b   :  { %v1542_v18 = vpop.eup %1541  ;;  %1500 = vmatprep.subr.mxu1 %v1115_v40 }
 0x32c   :  { %v920_v22 = vmul.f32 %v1542_v18, %v892_v46  ;;  %v918_v58 = vmul.f32 %v1542_v18, %v890_v45  ;;  %v932_v57 = vmul.f32 %v925_v14, %v917_v16  ;;  %v934_v27 = vmul.f32 %v925_v14, %v919_v51  ;;  %1501 = vmatpush3.msra.mxu1 %v1115_v40  ;;  %v1371_v51 = vld [vmem:[%s2445_s14] ss:$0 sm:$0xff] }
 0x32d   :  { %1502 = vmatprep.subr.mxu1 %v1114_v41 }
 0x32e   :  { %v933_v24 = vmul.f32 %v929_v17, %v918_v58  ;;  %v935_v25 = vmul.f32 %v929_v17, %v920_v22  ;;  %v947_v26 = vadd.f32 %v940_v21, %v932_v57  ;;  %v949_v31 = vadd.f32 %v940_v21, %v934_v27  ;;  %1503 = vmatpush3.msra.mxu1 %v1114_v41  ;;  %v1372_v58 = vld [vmem:[%s2446_s15] ss:$0 sm:$0xff] }
 0x32f   :  { %1504 = vmatprep.subr.mxu1 %v1113_v42 }
 0x330   :  { %v948_v28 = vadd.f32 %v944_v23, %v933_v24  ;;  %v950_v29 = vadd.f32 %v944_v23, %v935_v25  ;;  %v951_v30 = vmax.f32 %v947_v26, 0.0  ;;  %v953_v32 = vmax.f32 %v949_v31, 0.0  ;;  %1505 = vmatpush3.msra.mxu1 %v1113_v42  ;;  %v1262_v31 = vld [vmem:[%s2447_s20 + $0x18] sm:$0xff] }
 0x332   :  { %v952_v10 = vmax.f32 %v948_v28, 0.0  ;;  %v954_v33 = vmax.f32 %v950_v29, 0.0  ;;  %v1266_v28 = vld [vmem:[%s2447_s20 + $0x38] sm:$0xff]  ;;  %v1265_v29 = vld [vmem:[%s2447_s20 + $0x30] sm:$0xff] }
 0x333   :  { %1509 = vmatprep.subr.mxu0 %v1266_v28 }
 0x334   :  { %1058 = vmatprep.mubr.f32.mxu0 %v952_v10  ;;  %v1264_v10 = vld [vmem:[%s2447_s20 + $0x28] sm:$0xff] }
 0x335   :  { %1059 = vmatmul.mubr.f32.vlgmr.msra.gmra.mxu0 %v951_v30  ;;  %v1263_v30 = vld [vmem:[%s2447_s20 + $0x20] sm:$0xff] }
 0x336   :  { %1063 = vmatprep.mubr.f32.mxu0 %v954_v33  ;;  %1510 = vmatpush3.msra.mxu0 %v1266_v28  ;;  %v1261_v33 = vld [vmem:[%s2447_s20 + $0x10] sm:$0xff] }
 0x337   :  { %1511 = vmatprep.subr.mxu0 %v1265_v29 }
 0x338   :  { %1512 = vmatpush3.msra.mxu0 %v1265_v29 }
 0x339   :  { %1064 = vmatmul.mubr.f32.gmra.mxu0 %v953_v32  ;;  %1513 = vmatprep.subr.mxu0 %v1264_v10  ;;  %v1260_v32 = vld [vmem:[%s2447_s20 + $0x8] sm:$0xff] }
 0x33a   :  { %1514 = vmatpush3.msra.mxu0 %v1264_v10 }
 0x33b   :  { %1515 = vmatprep.subr.mxu0 %v1263_v30 }
 0x33c   :  { %1516 = vmatpush3.msra.mxu0 %v1263_v30 }
 0x33d   :  { %1517 = vmatprep.subr.mxu0 %v1262_v31 }
 0x33e   :  { %1518 = vmatpush3.msra.mxu0 %v1262_v31 }
 0x33f   :  { %1519 = vmatprep.subr.mxu0 %v1261_v33 }
 0x340   :  { %1520 = vmatpush3.msra.mxu0 %v1261_v33 }
 0x341   :  { %1521 = vmatprep.subr.mxu0 %v1260_v32 }
 0x342   :  { %1522 = vmatpush3.msra.mxu0 %v1260_v32 }
 0x343   :  { %1523 = vmatprep.subr.mxu0 %v1259_v3 }
 0x344   :  { %1524 = vmatpush3.msra.mxu0 %v1259_v3 }
 0x3f5   :  { %v1421_v43 = vpop.f32.mrf.mxu0 }
 0x3f7   :  { %v1422_v44 = vpop.f32.mrf.mxu0 }
 0x3f8   :  { %v1423_v46 = vadd.f32 %v1422_v44, %v1421_v43 }
 0x3f9   :  { %v1424_v45 = vpop.f32.mrf.mxu0 }
 0x3fa   :  { %v1061_v52 = vadd.f32 %v1423_v46, %v1370_v47 }
 0x3fb   :  { %v1425_v48 = vpop.f32.mrf.mxu0 }
 0x3fc   :  { %v1426_v49 = vadd.f32 %v1425_v48, %v1424_v45 }
 0x3fe   :  { %v1066_v53 = vadd.f32 %v1426_v49, %v1370_v47 }
 0x400   :  { %v1071_v54 = vadd.f32 %v1066_v53, %v1061_v52 }
 0x402   :  { %v1072_v55 = vrot.slane %v1071_v54, 4 }
 0x404   :  { %v1073_v56 = vadd.f32 %v1072_v55, %v1071_v54 }
 0x406   :  { %v1074_v59 = vrot.slane %v1073_v56, 2 }
 0x408   :  { %v1075_v60 = vadd.f32 %v1074_v59, %v1073_v56 }
 0x40a   :  { %v1076_v61 = vrot.slane %v1075_v60, 1 }
 0x40c   :  { %v1077_v62 = vadd.f32 %v1076_v61, %v1075_v60 }
 0x40e   :  { %v1078_v63 = vmul.f32 0.0625, %v1077_v62 }
 0x410   :  { %v1079_v0 = vsub.f32 %v1061_v52, %v1078_v63  ;;  %v1080_v1 = vsub.f32 %v1066_v53, %v1078_v63 }
 0x412   :  { %v1081_v2 = vmul.f32 %v1079_v0, %v1079_v0  ;;  %v1082_v4 = vmul.f32 %v1080_v1, %v1080_v1 }
 0x414   :  { %v1083_v6 = vadd.f32 %v1082_v4, %v1081_v2  ;;  %v1375_v4 = vld [vmem:[%s2451_s19] ss:$0 sm:$0xff] }
 0x416   :  { %v1084_v7 = vrot.slane %v1083_v6, 4 }
 0x418   :  { %v1085_v8 = vadd.f32 %v1084_v7, %v1083_v6 }
 0x41a   :  { %v1086_v9 = vrot.slane %v1085_v8, 2 }
 0x41c   :  { %v1087_v12 = vadd.f32 %v1086_v9, %v1085_v8 }
 0x41e   :  { %v1088_v14 = vrot.slane %v1087_v12, 1 }
 0x420   :  { %v1089_v50 = vadd.f32 %v1088_v14, %v1087_v12 }
 0x422   :  { %v1090_v16 = vmul.f32 0.0625, %v1089_v50  ;;  %v1376_v50 = vld [vmem:[#allocation2] ss:$0 sm:$0xff] }
 0x424   :  { %v1091_v17 = vadd.f32 1e-05, %v1090_v16 }
 0x426   :  { %1543 = vrsqrt.f32 %v1091_v17 }
 0x433   :  { %v1544_v18 = vpop.eup %1543 }
 0x434   :  { %v1094_v21 = vmul.f32 %v1544_v18, %v1080_v1  ;;  %v1093_v22 = vmul.f32 %v1544_v18, %v1079_v0  ;;  %v1374_v0 = vld [vmem:[%s2450_s18] ss:$0 sm:$0xff] }
 0x436   :  { %v1101_v57 = vmul.f32 %v1371_v51, %v1093_v22  ;;  %v1102_v23 = vmul.f32 %v1371_v51, %v1094_v21 }
 0x438   :  { %v1109_v24 = vadd.f32 %v1372_v58, %v1101_v57  ;;  %v1110_v25 = vadd.f32 %v1372_v58, %v1102_v23 }
 0x43a   :  { %v1111_v26 = vmax.f32 %v1109_v24, 0.0  ;;  %v1112_v27 = vmax.f32 %v1110_v25, 0.0 }
 0x43c   :  { %1506 = vmatprep.mubr.f32.mxu1 %v1111_v26 }
 0x43d   :  { %1507 = vmatmul.mubr.f32.vlgmr.msra.gmra.mxu1 %v1112_v27 }
 0x4fd   :  { %v1508_v34 = vpop.f32.mrf.mxu1 }
 0x4fe   :  { %v1208_v35 = vadd.f32 %v1508_v34, %v1373_v11 }
 0x4ff   :  { %v1202_v36 = vpop.f32.mrf.mxu1 }
 0x500   :  { %v1203_v13 = vadd.f32 %v1373_v11, %v1202_v36  ;;  %v1214_v37 = vsel %vm83_vm0, %v1208_v35, 0.0 }
 0x502   :  { %v1213_v20 = vsel %vm83_vm0, %v1203_v13, 0.0 }
 0x503   :  { %v1215_v15 = vadd.f32 %v1214_v37, %v1213_v20 }
 0x505   :  { %v1216_v19 = vrot.slane %v1215_v15, 4 }
 0x507   :  { %v1217_v38 = vadd.f32 %v1216_v19, %v1215_v15 }
 0x509   :  { %v1218_v39 = vrot.slane %v1217_v38, 2 }
 0x50b   :  { %v1219_v40 = vadd.f32 %v1218_v39, %v1217_v38 }
 0x50d   :  { %v1220_v41 = vrot.slane %v1219_v40, 1 }
 0x50f   :  { %v1221_v42 = vadd.f32 %v1220_v41, %v1219_v40 }
 0x511   :  { %v1222_v43 = vmul.f32 0.0625, %v1221_v42 }
 0x513   :  { %v1223_v44 = vsub.f32 %v1203_v13, %v1222_v43  ;;  %v1224_v45 = vsub.f32 %v1208_v35, %v1222_v43 }
 0x515   :  { %v1225_v46 = vmul.f32 %v1223_v44, %v1223_v44  ;;  %v1226_v47 = vmul.f32 %v1224_v45, %v1224_v45 }
 0x517   :  { %v1227_v48 = vsel %vm83_vm0, %v1225_v46, 0.0  ;;  %v1228_v49 = vsel %vm83_vm0, %v1226_v47, 0.0 }
 0x518   :  { %v1229_v52 = vadd.f32 %v1228_v49, %v1227_v48 }
 0x51a   :  { %v1230_v53 = vrot.slane %v1229_v52, 4 }
 0x51c   :  { %v1231_v54 = vadd.f32 %v1230_v53, %v1229_v52 }
 0x51e   :  { %v1232_v55 = vrot.slane %v1231_v54, 2 }
 0x520   :  { %v1233_v56 = vadd.f32 %v1232_v55, %v1231_v54 }
 0x522   :  { %v1234_v59 = vrot.slane %v1233_v56, 1 }
 0x524   :  { %v1235_v60 = vadd.f32 %v1234_v59, %v1233_v56 }
 0x526   :  { %v1236_v61 = vmul.f32 0.0625, %v1235_v60 }
 0x528   :  { %v1237_v62 = vadd.f32 1e-05, %v1236_v61 }
 0x52a   :  { %1545 = vrsqrt.f32 %v1237_v62 }
 0x537   :  { %v1546_v63 = vpop.eup %1545 }
 0x538   :  { %v1239_v1 = vmul.f32 %v1546_v63, %v1223_v44  ;;  %v1240_v2 = vmul.f32 %v1546_v63, %v1224_v45 }
 0x53a   :  { %v1247_v6 = vmul.f32 %v1374_v0, %v1239_v1  ;;  %v1248_v7 = vmul.f32 %v1374_v0, %v1240_v2 }
 0x53c   :  { %v1255_v8 = vadd.f32 %v1375_v4, %v1247_v6  ;;  %v1256_v9 = vadd.f32 %v1375_v4, %v1248_v7 }
 0x53e   :  { %v1257_v12 = vmax.f32 %v1255_v8, 0.0  ;;  %v1258_v14 = vmax.f32 %v1256_v9, 0.0 }
 0x540   :  { %1525 = vmatprep.mubr.msk.f32.mxu0 %vm83_vm0, %v1257_v12 }
 0x541   :  { %1526 = vmatmul.mubr.msk.f32.vlgmr.msra.gmra.mxu0 %vm83_vm0, %v1258_v14 }
 0x601   :  { %v1527_v16 = vpop.f32.mrf.mxu0 }
 0x602   :  { %v1352_v17 = vadd.f32 %v1527_v16, %v1376_v50 }
 0x603   :  { %v1346_v18 = vpop.f32.mrf.mxu0 }
 0x604   :  { %1357 = vst.msk [vmem:[%s2452_s22 + $0x8] sm:$0xff] %vm1355_vm2, %v1352_v17  ;;  %v1347_v51 = vadd.f32 %v1376_v50, %v1346_v18 }
 0x606   :  { %1356 = vst.msk [vmem:[%s2452_s22] sm:$0xff] %vm1355_vm2, %v1347_v51 }

// kernel: model_forward.17
= control target key start
LH: loop header
LB: loop body
LE: loop exit
PB: predicated region body
PF: predicated region fallthrough
CT: control target
= control target key end

     0   :  { %v190_v0 = vmov 0.0   ;;  %vm191_vm0 = vmmov 0   ;;  %vm36_vm1 = vcmask 523264   ;;  %s265_s1 = inlined_call_operand.vmem [shape: f32[64,64], index: 1, kind: input, shape index: {}]   ;;  %s266_s0 = inlined_call_operand.vmem [shape: f32[8,64], index: 0, kind: input, shape index: {}]   ;;  %s267_s2 = inlined_call_operand.vmem [shape: f32[1,64], index: 2, kind: input, shape index: {}]   ;;  %s268_s3 = inlined_call_operand.vmem [shape: f32[1,64], index: 3, kind: input, shape index: {}]   ;;  %s269_s4 = inlined_call_operand.vmem [shape: f32[1,64], index: 4, kind: input, shape index: {}]   ;;  %s270_s5 = inlined_call_operand.vmem [shape: f32[8,64], index: 5, kind: output, shape index: {}]  }
   0x1   :  { %167 = vmatprep.subr.mxu0 %v190_v0  ;;  %v28_v1 = vld [vmem:[%s265_s1 + $0x38] sm:$0xff]  ;;  %v27_v2 = vld [vmem:[%s265_s1 + $0x30] sm:$0xff]  ;;  %183 = vmatprep.mubr.msk.f32.mxu0 %vm191_vm0, %v190_v0  ;;  %v26_v3 = vld [vmem:[%s265_s1 + $0x28] sm:$0xff] }
   0x2   :  { %168 = vmatpush3.msra.mxu0 %v28_v1  ;;  %v25_v4 = vld [vmem:[%s265_s1 + $0x20] sm:$0xff]  ;;  %v24_v5 = vld [vmem:[%s265_s1 + $0x18] sm:$0xff]  ;;  %v23_v6 = vld [vmem:[%s265_s1 + $0x10] sm:$0xff] }
   0x3   :  { %169 = vmatprep.subr.mxu0 %v190_v0  ;;  %v22_v7 = vld [vmem:[%s265_s1 + $0x8] sm:$0xff]  ;;  %v21_v8 = vld [vmem:[%s265_s1] sm:$0xff] }
   0x4   :  { %170 = vmatpush3.msra.mxu0 %v27_v2  ;;  %v20_v9 = vld [vmem:[%s266_s0] sm:$0xff] }
   0x5   :  { %171 = vmatprep.subr.mxu0 %v190_v0  ;;  %v154_v10 = vld [vmem:[%s267_s2] ss:$0 sm:$0xff] }
   0x6   :  { %172 = vmatpush3.msra.mxu0 %v26_v3  ;;  %v156_v34 = vld [vmem:[%s268_s3] ss:$0 sm:$0xff] }
   0x7   :  { %173 = vmatprep.subr.mxu0 %v190_v0  ;;  %v157_v36 = vld [vmem:[%s269_s4] ss:$0 sm:$0xff] }
   0x8   :  { %174 = vmatpush3.msra.mxu0 %v25_v4 }
   0x9   :  { %175 = vmatprep.subr.mxu0 %v190_v0 }
   0xa   :  { %176 = vmatpush3.msra.mxu0 %v24_v5 }
   0xb   :  { %177 = vmatprep.subr.mxu0 %v190_v0 }
   0xc   :  { %178 = vmatpush3.msra.mxu0 %v23_v6 }
   0xd   :  { %179 = vmatprep.subr.mxu0 %v190_v0 }
   0xe   :  { %180 = vmatpush3.msra.mxu0 %v22_v7 }
   0xf   :  { %181 = vmatprep.subr.mxu0 %v190_v0 }
  0x10   :  { %182 = vmatpush3.msra.mxu0 %v21_v8 }
  0x11   :  { %184 = vmatmul.mubr.msk.f32.vlgmr.msra.gmra.mxu0 %vm36_vm1, %v20_v9 }
  0xd1   :  { %v106_v11 = vpop.f32.mrf.mxu0 }
  0xd2   :  { %v107_v12 = vadd.f32 %v154_v10, %v106_v11 }
  0xd3   :  { %v185_v13 = vpop.f32.mrf.mxu0 }
  0xd4   :  { %v112_v14 = vsel %vm36_vm1, %v107_v12, 0.0 }
  0xd5   :  { %v113_v15 = vrot.slane %v112_v14, 4 }
  0xd7   :  { %v114_v16 = vadd.f32 %v113_v15, %v112_v14 }
  0xd9   :  { %v115_v17 = vrot.slane %v114_v16, 2 }
  0xdb   :  { %v116_v18 = vadd.f32 %v115_v17, %v114_v16 }
  0xdd   :  { %v117_v19 = vrot.slane %v116_v18, 1 }
  0xdf   :  { %v118_v20 = vadd.f32 %v117_v19, %v116_v18 }
  0xe1   :  { %v120_v21 = vmul.f32 0.125, %v118_v20 }
  0xe3   :  { %v121_v22 = vsub.f32 %v107_v12, %v120_v21 }
  0xe5   :  { %v122_v23 = vmul.f32 %v121_v22, %v121_v22 }
  0xe7   :  { %v123_v24 = vsel %vm36_vm1, %v122_v23, 0.0 }
  0xe8   :  { %v124_v25 = vrot.slane %v123_v24, 4 }
  0xea   :  { %v125_v26 = vadd.f32 %v124_v25, %v123_v24 }
  0xec   :  { %v126_v27 = vrot.slane %v125_v26, 2 }
  0xee   :  { %v127_v28 = vadd.f32 %v126_v27, %v125_v26 }
  0xf0   :  { %v128_v29 = vrot.slane %v127_v28, 1 }
  0xf2   :  { %v129_v30 = vadd.f32 %v128_v29, %v127_v28 }
  0xf4   :  { %v130_v31 = vmul.f32 0.125, %v129_v30 }
  0xf6   :  { %v131_v32 = vadd.f32 1e-05, %v130_v31 }
  0xf8   :  { %188 = vrsqrt.f32 %v131_v32 }
 0x105   :  { %v189_v33 = vpop.eup %188 }
 0x106   :  { %v133_v35 = vmul.f32 %v189_v33, %v121_v22 }
 0x108   :  { %v140_v37 = vmul.f32 %v156_v34, %v133_v35 }
 0x10a   :  { %v147_v38 = vadd.f32 %v157_v36, %v140_v37 }
 0x10c   :  { %v148_v39 = vmax.f32 %v147_v38, 0.0 }
 0x10e   :  { %149 = vst.msk [vmem:[%s270_s5] sm:$0xff] %vm36_vm1, %v148_v39 }

</bundles_post_ra>
